<compile_context>
chip_gen: v7x
topology: tpu7x:2x2x1
jax: 0.10.0
libtpu: 0.0.40
codegen_flags: <defaults>
</compile_context>

<pallas_src>
import functools
import math

import jax
import jax.numpy as jnp
from jax.experimental import pallas as pl
from jax.experimental.pallas import tpu as pltpu


def _layer_norm(x, gamma, beta, eps=1e-5):
    # x: (R, D), gamma/beta: (1, D); keep LN math in f32 on all chips.
    mean = jnp.mean(x, axis=-1, keepdims=True)
    var = jnp.mean((x - mean) ** 2, axis=-1, keepdims=True)
    return (x - mean) * jax.lax.rsqrt(var + eps) * gamma + beta


def _mha_block_kernel(q_ref, k_ref,
                      wfqT_ref, wqiT_ref, wkT_ref, wvT_ref,
                      woutT_ref, wfoT_ref, wgT_ref, b_ref,
                      o_ref, *, num_heads, use_ln, use_gate):
    f32 = jnp.float32
    Bt, Lq, dq = q_ref.shape
    _, Lk, dk = k_ref.shape
    dv = o_ref.shape[-1]
    hd = dv // num_heads
    Rq = Bt * Lq
    Rk = Bt * Lk
    cd = wfqT_ref.dtype                       # matmul operand dtype (f32 or bf16)

    # Flatten the (Bt, L, d) block to a (rows, features) slab: big-M matmuls.
    xq = q_ref[...].reshape(Rq, dq)
    xk = k_ref[...].reshape(Rk, dk)

    # Merged bias / LN-affine table (one (16, dv) input).
    b = b_ref[...]
    bfq, bqi, bk, bv = b[0:1], b[1:2], b[2:3], b[3:4]
    bo, bfo = b[4:5], b[5:6]
    g0, be0, g1, be1 = b[6:7], b[7:8], b[8:9], b[9:10]
    bg = b[10:11]

    def mm(x, w_ref):
        # Weights are pre-transposed offline: plain x @ W, no in-kernel .T.
        return jnp.dot(x.astype(cd), w_ref[...], preferred_element_type=f32)

    Qp = mm(xq, wfqT_ref) + bfq               # fc_q output (needed for residual)
    q = mm(Qp, wqiT_ref) + bqi                # q in-proj; 1/sqrt(hd) folded in
    k = mm(xk, wkT_ref) + bk                  # fc_k + k in-proj folded offline
    v = mm(xk, wvT_ref) + bv                  # fc_v + v in-proj folded offline

    q3 = q.reshape(Bt, Lq, dv).astype(cd)
    k3 = k.reshape(Bt, Lk, dv).astype(cd)
    v3 = v.reshape(Bt, Lk, dv).astype(cd)
    woutT = woutT_ref[...]

    # Per-head attention, batched over the Bt batch elements with
    # single-leading-batch-dim einsums. The head concat is folded into the
    # out-projection: A = sum_h o_h @ W_out^T[h*hd:(h+1)*hd, :], so no
    # narrow-lane concatenate / masked stores are needed.
    # NOTE: contraction width of the score/PV matmuls is hd (< 128 here);
    # for large-MXU shapes pad hd to 128 or use full-width head dims.
    A = jnp.zeros((Rq, dv), f32)
    for h in range(num_heads):
        sl = slice(h * hd, (h + 1) * hd)
        s = jnp.einsum("bqd,bkd->bqk", q3[:, :, sl], k3[:, :, sl],
                       preferred_element_type=f32)            # (Bt, Lq, Lk)
        s = s - jnp.max(s, axis=-1, keepdims=True)
        p = jnp.exp(s)
        p = p * pl.reciprocal(jnp.sum(p, axis=-1, keepdims=True), approx=True)
        oh = jnp.einsum("bqk,bkd->bqd", p.astype(cd), v3[:, :, sl],
                        preferred_element_type=f32)           # (Bt, Lq, hd)
        A = A + jnp.dot(oh.reshape(Rq, hd).astype(cd), woutT[sl, :],
                        preferred_element_type=f32)
    A = A + bo

    O = Qp + A                                # residual on the fc_q output
    if use_ln:
        O = _layer_norm(O, g0, be0)
    O = O + jnp.maximum(mm(O, wfoT_ref) + bfo, 0.0)
    if use_ln:
        O = _layer_norm(O, g1, be1)
    if use_gate:
        g = mm(xq, wgT_ref) + bg
        O = O * (g * jax.nn.sigmoid(g))       # SiLU gate on the raw Q input
    o_ref[...] = O.reshape(Bt, Lq, dv).astype(o_ref.dtype)


def _pick_block_batch(B, Lq, target_rows=256):
    """Largest divisor of B with Bt*Lq <= ~target_rows, keeping >= 2 grid steps."""
    want = max(1, target_rows // max(Lq, 1))
    divisors = [d for d in range(1, B + 1) if B % d == 0 and d <= want]
    multi_step = [d for d in divisors if B // d >= 2]
    pool = multi_step if multi_step else (divisors if divisors else [1])
    return max(pool)


def mha_block(Q, K, params, *, num_heads, ln=True, gated=True,
              compute_dtype=jnp.float32, block_batch=None, target_rows=256,
              vmem_limit_bytes=48 * 1024 * 1024):
    f32 = jnp.float32
    B, Lq, dq = Q.shape
    Bk, Lk, dk = K.shape
    assert Bk == B
    dv = params["wfq"].shape[0]
    assert dv % num_heads == 0
    hd = dv // num_heads
    scale = 1.0 / math.sqrt(hd)

    # ---------- offline weight preparation (done once, outside the kernel) ----------
    w_in = params["w_in"].astype(f32)
    b_in = params["b_in"].astype(f32).reshape(-1)
    wq_i, wk_i, wv_i = w_in[:dv], w_in[dv:2 * dv], w_in[2 * dv:]
    bq_i, bk_i, bv_i = b_in[:dv], b_in[dv:2 * dv], b_in[2 * dv:]

    wfqT = params["wfq"].astype(f32).T                    # (dq, dv)
    wqiT = (wq_i * scale).T                               # (dv, dv), scale folded
    wkT = (wk_i @ params["wfk"].astype(f32)).T            # (dk, dv), fc_k chain folded
    wvT = (wv_i @ params["wfv"].astype(f32)).T            # (dk, dv), fc_v chain folded
    woutT = params["w_out"].astype(f32).T                 # (dv, dv)
    wfoT = params["wfo"].astype(f32).T                    # (dv, dv)
    wgT = params["wg"].astype(f32).T                      # (dq, dv)

    bfq = params["bfq"].reshape(-1).astype(f32)
    bqi = bq_i * scale
    bk_eff = params["bfk"].reshape(-1).astype(f32) @ wk_i.T + bk_i
    bv_eff = params["bfv"].reshape(-1).astype(f32) @ wv_i.T + bv_i
    rows = [bfq, bqi, bk_eff, bv_eff,
            params["b_out"].reshape(-1).astype(f32),
            params["bfo"].reshape(-1).astype(f32),
            params["g0"].reshape(-1).astype(f32),
            params["be0"].reshape(-1).astype(f32),
            params["g1"].reshape(-1).astype(f32),
            params["be1"].reshape(-1).astype(f32),
            params["bg"].reshape(-1).astype(f32)]
    biases = jnp.zeros((16, dv), f32).at[:len(rows)].set(jnp.stack(rows))

    cd = jnp.dtype(compute_dtype)
    weights = tuple(w.astype(cd) for w in (wfqT, wqiT, wkT, wvT, woutT, wfoT, wgT))

    Bt = block_batch if block_batch is not None else _pick_block_batch(B, Lq, target_rows)
    assert B % Bt == 0, "block_batch must divide B"

    def inv_spec(a):  # grid-invariant (weight) input: full-array block
        return pl.BlockSpec(a.shape, lambda i: (0,) * a.ndim)

    in_specs = [
        pl.BlockSpec((Bt, Lq, dq), lambda i: (i, 0, 0)),
        pl.BlockSpec((Bt, Lk, dk), lambda i: (i, 0, 0)),
    ] + [inv_spec(w) for w in weights] + [inv_spec(biases)]

    kernel = functools.partial(_mha_block_kernel, num_heads=num_heads,
                               use_ln=ln, use_gate=gated)

    return pl.pallas_call(
        kernel,
        out_shape=jax.ShapeDtypeStruct((B, Lq, dv), jnp.float32),
        grid_spec=pltpu.PrefetchScalarGridSpec(
            num_scalar_prefetch=0,
            grid=(B // Bt,),
            in_specs=in_specs,
            out_specs=pl.BlockSpec((Bt, Lq, dv), lambda i: (i, 0, 0)),
        ),
        compiler_params=pltpu.CompilerParams(
            dimension_semantics=("parallel",),
            vmem_limit_bytes=vmem_limit_bytes,
        ),
    )(Q, K, *weights, biases)


def make_params(key, dim_Q, dim_K, dim_V):
    ks = jax.random.split(key, 18)

    def w(k, shape, scale=0.1):
        return jax.random.normal(k, shape, jnp.float32) * scale

    return {
        "wfq": w(ks[0], (dim_V, dim_Q)), "bfq": w(ks[1], (1, dim_V)),
        "wfk": w(ks[2], (dim_V, dim_K)), "bfk": w(ks[3], (1, dim_V)),
        "wfv": w(ks[4], (dim_V, dim_K)), "bfv": w(ks[5], (1, dim_V)),
        "w_in": w(ks[6], (3 * dim_V, dim_V)), "b_in": w(ks[7], (1, 3 * dim_V)),
        "w_out": w(ks[8], (dim_V, dim_V)), "b_out": w(ks[9], (1, dim_V)),
        "wfo": w(ks[10], (dim_V, dim_V)), "bfo": w(ks[11], (1, dim_V)),
        "g0": 1.0 + w(ks[12], (1, dim_V)), "be0": w(ks[13], (1, dim_V)),
        "g1": 1.0 + w(ks[14], (1, dim_V)), "be1": w(ks[15], (1, dim_V)),
        "wg": w(ks[16], (dim_V, dim_Q)), "bg": w(ks[17], (1, dim_V)),
    }


def mha_block_ref(Q, K, params, *, num_heads, ln=True, gated=True):
    """Pure-JAX reference mirroring the PyTorch forward (batch-first)."""
    dv = params["wfq"].shape[0]
    hd = dv // num_heads

    def lin(x, w, b):
        return x @ w.T + b[0]

    Qp = lin(Q, params["wfq"], params["bfq"])
    Kp = lin(K, params["wfk"], params["bfk"])
    Vp = lin(K, params["wfv"], params["bfv"])
    w_in, b_in = params["w_in"], params["b_in"][0]
    q = Qp @ w_in[:dv].T + b_in[:dv]
    k = Kp @ w_in[dv:2 * dv].T + b_in[dv:2 * dv]
    v = Vp @ w_in[2 * dv:].T + b_in[2 * dv:]
    B, Lq, _ = q.shape
    Lk = k.shape[1]
    q4 = q.reshape(B, Lq, num_heads, hd).transpose(0, 2, 1, 3)
    k4 = k.reshape(B, Lk, num_heads, hd).transpose(0, 2, 1, 3)
    v4 = v.reshape(B, Lk, num_heads, hd).transpose(0, 2, 1, 3)
    s = jnp.einsum("bhqd,bhkd->bhqk", q4, k4) / math.sqrt(hd)
    p = jax.nn.softmax(s, axis=-1)
    o = jnp.einsum("bhqk,bhkd->bhqd", p, v4).transpose(0, 2, 1, 3).reshape(B, Lq, dv)
    A = lin(o, params["w_out"], params["b_out"])
    O = Qp + A

    def lnorm(x, g, b):
        m = x.mean(-1, keepdims=True)
        var = ((x - m) ** 2).mean(-1, keepdims=True)
        return (x - m) / jnp.sqrt(var + 1e-5) * g[0] + b[0]

    if ln:
        O = lnorm(O, params["g0"], params["be0"])
    O = O + jax.nn.relu(lin(O, params["wfo"], params["bfo"]))
    if ln:
        O = lnorm(O, params["g1"], params["be1"])
    if gated:
        O = O * jax.nn.silu(lin(Q, params["wg"], params["bg"]))
    return O


if __name__ == "__main__":
    B, Lq, Lk = 8, 16, 16
    dim_Q = dim_K = dim_V = 128          # dv=128 => lane-dense output blocks
    num_heads = 4

    key = jax.random.PRNGKey(0)
    kq, kk, kp = jax.random.split(key, 3)
    Q = jax.random.normal(kq, (B, Lq, dim_Q), jnp.float32)
    K = jax.random.normal(kk, (B, Lk, dim_K), jnp.float32)
    params = make_params(kp, dim_Q, dim_K, dim_V)

    ref = mha_block_ref(Q, K, params, num_heads=num_heads, ln=True, gated=True)

    # f32 matmul operands (v5e-friendly path).
    out_f32 = mha_block(Q, K, params, num_heads=num_heads, ln=True, gated=True,
                        compute_dtype=jnp.float32)
    out_f32 = jax.block_until_ready(out_f32)
    assert out_f32.shape == (B, Lq, dim_V)
    err_f32 = float(jnp.max(jnp.abs(out_f32 - ref)))
    assert jnp.allclose(out_f32, ref, rtol=2e-2, atol=2e-2), f"f32 max abs err = {err_f32}"

    # bf16 matmul operands with f32 accumulation (v6e/v7x MXU fast path);
    # tolerance loosened accordingly.
    out_bf16 = mha_block(Q, K, params, num_heads=num_heads, ln=True, gated=True,
                         compute_dtype=jnp.bfloat16)
    out_bf16 = jax.block_until_ready(out_bf16)
    err_bf16 = float(jnp.max(jnp.abs(out_bf16 - ref)))
    assert jnp.allclose(out_bf16, ref, rtol=2.5e-1, atol=2.5e-1), f"bf16 max abs err = {err_bf16}"

    print("KERNEL_OK")
</pallas_src>

<mosaic_0001>
module attributes {stable_mosaic.version = 11 : i64} {
  func.func @_mha_block_kernel(%arg0: i32, %arg1: memref<4x16x128xf32, #tpu.memory_space<vmem>>, %arg2: memref<4x16x128xf32, #tpu.memory_space<vmem>>, %arg3: memref<128x128xf32, #tpu.memory_space<vmem>>, %arg4: memref<128x128xf32, #tpu.memory_space<vmem>>, %arg5: memref<128x128xf32, #tpu.memory_space<vmem>>, %arg6: memref<128x128xf32, #tpu.memory_space<vmem>>, %arg7: memref<128x128xf32, #tpu.memory_space<vmem>>, %arg8: memref<128x128xf32, #tpu.memory_space<vmem>>, %arg9: memref<128x128xf32, #tpu.memory_space<vmem>>, %arg10: memref<16x128xf32, #tpu.memory_space<vmem>>, %arg11: memref<4x16x128xf32, #tpu.memory_space<vmem>>) attributes {dimension_semantics = [#tpu.dimension_semantics<parallel>], iteration_bounds = array<i64: 2>, scalar_prefetch = 0 : i64, scratch_operands = 0 : i64, tpu.core_type = #tpu.core_type<tc>, window_params = [{transform_indices = @transform_0, window_bounds = array<i64: 4, 16, 128>}, {transform_indices = @transform_1, window_bounds = array<i64: 4, 16, 128>}, {pipeline_mode = #tpu.pipeline_mode<synchronous>, transform_indices = @transform_2, window_bounds = array<i64: 128, 128>}, {pipeline_mode = #tpu.pipeline_mode<synchronous>, transform_indices = @transform_3, window_bounds = array<i64: 128, 128>}, {pipeline_mode = #tpu.pipeline_mode<synchronous>, transform_indices = @transform_4, window_bounds = array<i64: 128, 128>}, {pipeline_mode = #tpu.pipeline_mode<synchronous>, transform_indices = @transform_5, window_bounds = array<i64: 128, 128>}, {pipeline_mode = #tpu.pipeline_mode<synchronous>, transform_indices = @transform_6, window_bounds = array<i64: 128, 128>}, {pipeline_mode = #tpu.pipeline_mode<synchronous>, transform_indices = @transform_7, window_bounds = array<i64: 128, 128>}, {pipeline_mode = #tpu.pipeline_mode<synchronous>, transform_indices = @transform_8, window_bounds = array<i64: 128, 128>}, {pipeline_mode = #tpu.pipeline_mode<synchronous>, transform_indices = @transform_9, window_bounds = array<i64: 16, 128>}, {transform_indices = @transform_10, window_bounds = array<i64: 4, 16, 128>}]} {
    %c0 = arith.constant 0 : index
    %c0_0 = arith.constant 0 : index
    %c0_1 = arith.constant 0 : index
    %0 = vector.load %arg1[%c0, %c0_0, %c0_1] : memref<4x16x128xf32, #tpu.memory_space<vmem>>, vector<4x16x128xf32>
    %1 = vector.shape_cast %0 : vector<4x16x128xf32> to vector<64x128xf32>
    %c0_2 = arith.constant 0 : index
    %c0_3 = arith.constant 0 : index
    %c0_4 = arith.constant 0 : index
    %2 = vector.load %arg2[%c0_2, %c0_3, %c0_4] : memref<4x16x128xf32, #tpu.memory_space<vmem>>, vector<4x16x128xf32>
    %3 = vector.shape_cast %2 : vector<4x16x128xf32> to vector<64x128xf32>
    %c0_5 = arith.constant 0 : index
    %c0_6 = arith.constant 0 : index
    %4 = vector.load %arg10[%c0_5, %c0_6] : memref<16x128xf32, #tpu.memory_space<vmem>>, vector<16x128xf32>
    %5 = vector.extract_strided_slice %4 {offsets = [0, 0], sizes = [1, 128], strides = [1, 1]} : vector<16x128xf32> to vector<1x128xf32>
    %6 = vector.extract_strided_slice %4 {offsets = [1, 0], sizes = [1, 128], strides = [1, 1]} : vector<16x128xf32> to vector<1x128xf32>
    %7 = vector.extract_strided_slice %4 {offsets = [2, 0], sizes = [1, 128], strides = [1, 1]} : vector<16x128xf32> to vector<1x128xf32>
    %8 = vector.extract_strided_slice %4 {offsets = [3, 0], sizes = [1, 128], strides = [1, 1]} : vector<16x128xf32> to vector<1x128xf32>
    %9 = vector.extract_strided_slice %4 {offsets = [4, 0], sizes = [1, 128], strides = [1, 1]} : vector<16x128xf32> to vector<1x128xf32>
    %10 = vector.extract_strided_slice %4 {offsets = [5, 0], sizes = [1, 128], strides = [1, 1]} : vector<16x128xf32> to vector<1x128xf32>
    %11 = vector.extract_strided_slice %4 {offsets = [6, 0], sizes = [1, 128], strides = [1, 1]} : vector<16x128xf32> to vector<1x128xf32>
    %12 = vector.extract_strided_slice %4 {offsets = [7, 0], sizes = [1, 128], strides = [1, 1]} : vector<16x128xf32> to vector<1x128xf32>
    %13 = vector.extract_strided_slice %4 {offsets = [8, 0], sizes = [1, 128], strides = [1, 1]} : vector<16x128xf32> to vector<1x128xf32>
    %14 = vector.extract_strided_slice %4 {offsets = [9, 0], sizes = [1, 128], strides = [1, 1]} : vector<16x128xf32> to vector<1x128xf32>
    %15 = vector.extract_strided_slice %4 {offsets = [10, 0], sizes = [1, 128], strides = [1, 1]} : vector<16x128xf32> to vector<1x128xf32>
    %c0_7 = arith.constant 0 : index
    %c0_8 = arith.constant 0 : index
    %16 = vector.load %arg3[%c0_7, %c0_8] : memref<128x128xf32, #tpu.memory_space<vmem>>, vector<128x128xf32>
    %cst = arith.constant dense<0.000000e+00> : vector<64x128xf32>
    %17 = tpu.matmul %1, %16, %cst {dimension_numbers = #tpu.dot_dimension_numbers<[1], [0], [0], [1], [0, 0, 1, 1], [], []>} : vector<64x128xf32>, vector<128x128xf32>, vector<64x128xf32> -> vector<64x128xf32>
    %18 = vector.broadcast %5 : vector<1x128xf32> to vector<64x128xf32>
    %19 = arith.addf %17, %18 : vector<64x128xf32>
    %c0_9 = arith.constant 0 : index
    %c0_10 = arith.constant 0 : index
    %20 = vector.load %arg4[%c0_9, %c0_10] : memref<128x128xf32, #tpu.memory_space<vmem>>, vector<128x128xf32>
    %cst_11 = arith.constant dense<0.000000e+00> : vector<64x128xf32>
    %21 = tpu.matmul %19, %20, %cst_11 {dimension_numbers = #tpu.dot_dimension_numbers<[1], [0], [0], [1], [0, 0, 1, 1], [], []>} : vector<64x128xf32>, vector<128x128xf32>, vector<64x128xf32> -> vector<64x128xf32>
    %22 = vector.broadcast %6 : vector<1x128xf32> to vector<64x128xf32>
    %23 = arith.addf %21, %22 : vector<64x128xf32>
    %c0_12 = arith.constant 0 : index
    %c0_13 = arith.constant 0 : index
    %24 = vector.load %arg5[%c0_12, %c0_13] : memref<128x128xf32, #tpu.memory_space<vmem>>, vector<128x128xf32>
    %cst_14 = arith.constant dense<0.000000e+00> : vector<64x128xf32>
    %25 = tpu.matmul %3, %24, %cst_14 {dimension_numbers = #tpu.dot_dimension_numbers<[1], [0], [0], [1], [0, 0, 1, 1], [], []>} : vector<64x128xf32>, vector<128x128xf32>, vector<64x128xf32> -> vector<64x128xf32>
    %26 = vector.broadcast %7 : vector<1x128xf32> to vector<64x128xf32>
    %27 = arith.addf %25, %26 : vector<64x128xf32>
    %c0_15 = arith.constant 0 : index
    %c0_16 = arith.constant 0 : index
    %28 = vector.load %arg6[%c0_15, %c0_16] : memref<128x128xf32, #tpu.memory_space<vmem>>, vector<128x128xf32>
    %cst_17 = arith.constant dense<0.000000e+00> : vector<64x128xf32>
    %29 = tpu.matmul %3, %28, %cst_17 {dimension_numbers = #tpu.dot_dimension_numbers<[1], [0], [0], [1], [0, 0, 1, 1], [], []>} : vector<64x128xf32>, vector<128x128xf32>, vector<64x128xf32> -> vector<64x128xf32>
    %30 = vector.broadcast %8 : vector<1x128xf32> to vector<64x128xf32>
    %31 = arith.addf %29, %30 : vector<64x128xf32>
    %32 = vector.shape_cast %23 : vector<64x128xf32> to vector<4x16x128xf32>
    %33 = vector.shape_cast %27 : vector<64x128xf32> to vector<4x16x128xf32>
    %34 = vector.shape_cast %31 : vector<64x128xf32> to vector<4x16x128xf32>
    %c0_18 = arith.constant 0 : index
    %c0_19 = arith.constant 0 : index
    %35 = vector.load %arg7[%c0_18, %c0_19] : memref<128x128xf32, #tpu.memory_space<vmem>>, vector<128x128xf32>
    %cst_20 = arith.constant 0.000000e+00 : f32
    %36 = vector.broadcast %cst_20 : f32 to vector<64x128xf32>
    %37 = vector.extract_strided_slice %32 {offsets = [0, 0, 0], sizes = [4, 16, 32], strides = [1, 1, 1]} : vector<4x16x128xf32> to vector<4x16x32xf32>
    %38 = vector.extract_strided_slice %33 {offsets = [0, 0, 0], sizes = [4, 16, 32], strides = [1, 1, 1]} : vector<4x16x128xf32> to vector<4x16x32xf32>
    "tpu.trace_start"() <{level = 10 : i32, message = "bqd,bkd->bqk"}> : () -> ()
    %cst_21 = arith.constant dense<0.000000e+00> : vector<4x16x16xf32>
    %39 = tpu.matmul %37, %38, %cst_21 {dimension_numbers = #tpu.dot_dimension_numbers<[2], [2], [1], [1], [0, 0, 0, 1, 1, 1], [0], [0]>} : vector<4x16x32xf32>, vector<4x16x32xf32>, vector<4x16x16xf32> -> vector<4x16x16xf32>
    "tpu.trace_stop"() : () -> ()
    %cst_22 = arith.constant dense<0xFF800000> : vector<4x16xf32>
    %40 = vector.multi_reduction <maximumf>, %39, %cst_22 [2] : vector<4x16x16xf32> to vector<4x16xf32>
    %41 = vector.shape_cast %40 : vector<4x16xf32> to vector<4x16x1xf32>
    %42 = vector.broadcast %41 : vector<4x16x1xf32> to vector<4x16x16xf32>
    %43 = arith.subf %39, %42 : vector<4x16x16xf32>
    %44 = math.exp %43 : vector<4x16x16xf32>
    %cst_23 = arith.constant dense<0.000000e+00> : vector<4x16xf32>
    %45 = vector.multi_reduction <add>, %44, %cst_23 [2] : vector<4x16x16xf32> to vector<4x16xf32>
    %46 = vector.shape_cast %45 : vector<4x16xf32> to vector<4x16x1xf32>
    %47 = tpu.reciprocal %46 {approx = true} : vector<4x16x1xf32> -> vector<4x16x1xf32>
    %48 = vector.broadcast %47 : vector<4x16x1xf32> to vector<4x16x16xf32>
    %49 = arith.mulf %44, %48 : vector<4x16x16xf32>
    %50 = vector.extract_strided_slice %34 {offsets = [0, 0, 0], sizes = [4, 16, 32], strides = [1, 1, 1]} : vector<4x16x128xf32> to vector<4x16x32xf32>
    "tpu.trace_start"() <{level = 10 : i32, message = "bqk,bkd->bqd"}> : () -> ()
    %cst_24 = arith.constant dense<0.000000e+00> : vector<4x16x32xf32>
    %51 = tpu.matmul %49, %50, %cst_24 {dimension_numbers = #tpu.dot_dimension_numbers<[2], [1], [1], [2], [0, 0, 0, 1, 1, 2], [0], [0]>} : vector<4x16x16xf32>, vector<4x16x32xf32>, vector<4x16x32xf32> -> vector<4x16x32xf32>
    "tpu.trace_stop"() : () -> ()
    %52 = vector.shape_cast %51 : vector<4x16x32xf32> to vector<64x32xf32>
    %53 = vector.extract_strided_slice %35 {offsets = [0, 0], sizes = [32, 128], strides = [1, 1]} : vector<128x128xf32> to vector<32x128xf32>
    %cst_25 = arith.constant dense<0.000000e+00> : vector<64x128xf32>
    %54 = tpu.matmul %52, %53, %cst_25 {dimension_numbers = #tpu.dot_dimension_numbers<[1], [0], [0], [1], [0, 0, 1, 1], [], []>} : vector<64x32xf32>, vector<32x128xf32>, vector<64x128xf32> -> vector<64x128xf32>
    %55 = arith.addf %36, %54 : vector<64x128xf32>
    %56 = vector.extract_strided_slice %32 {offsets = [0, 0, 32], sizes = [4, 16, 32], strides = [1, 1, 1]} : vector<4x16x128xf32> to vector<4x16x32xf32>
    %57 = vector.extract_strided_slice %33 {offsets = [0, 0, 32], sizes = [4, 16, 32], strides = [1, 1, 1]} : vector<4x16x128xf32> to vector<4x16x32xf32>
    "tpu.trace_start"() <{level = 10 : i32, message = "bqd,bkd->bqk"}> : () -> ()
    %cst_26 = arith.constant dense<0.000000e+00> : vector<4x16x16xf32>
    %58 = tpu.matmul %56, %57, %cst_26 {dimension_numbers = #tpu.dot_dimension_numbers<[2], [2], [1], [1], [0, 0, 0, 1, 1, 1], [0], [0]>} : vector<4x16x32xf32>, vector<4x16x32xf32>, vector<4x16x16xf32> -> vector<4x16x16xf32>
    "tpu.trace_stop"() : () -> ()
    %cst_27 = arith.constant dense<0xFF800000> : vector<4x16xf32>
    %59 = vector.multi_reduction <maximumf>, %58, %cst_27 [2] : vector<4x16x16xf32> to vector<4x16xf32>
    %60 = vector.shape_cast %59 : vector<4x16xf32> to vector<4x16x1xf32>
    %61 = vector.broadcast %60 : vector<4x16x1xf32> to vector<4x16x16xf32>
    %62 = arith.subf %58, %61 : vector<4x16x16xf32>
    %63 = math.exp %62 : vector<4x16x16xf32>
    %cst_28 = arith.constant dense<0.000000e+00> : vector<4x16xf32>
    %64 = vector.multi_reduction <add>, %63, %cst_28 [2] : vector<4x16x16xf32> to vector<4x16xf32>
    %65 = vector.shape_cast %64 : vector<4x16xf32> to vector<4x16x1xf32>
    %66 = tpu.reciprocal %65 {approx = true} : vector<4x16x1xf32> -> vector<4x16x1xf32>
    %67 = vector.broadcast %66 : vector<4x16x1xf32> to vector<4x16x16xf32>
    %68 = arith.mulf %63, %67 : vector<4x16x16xf32>
    %69 = vector.extract_strided_slice %34 {offsets = [0, 0, 32], sizes = [4, 16, 32], strides = [1, 1, 1]} : vector<4x16x128xf32> to vector<4x16x32xf32>
    "tpu.trace_start"() <{level = 10 : i32, message = "bqk,bkd->bqd"}> : () -> ()
    %cst_29 = arith.constant dense<0.000000e+00> : vector<4x16x32xf32>
    %70 = tpu.matmul %68, %69, %cst_29 {dimension_numbers = #tpu.dot_dimension_numbers<[2], [1], [1], [2], [0, 0, 0, 1, 1, 2], [0], [0]>} : vector<4x16x16xf32>, vector<4x16x32xf32>, vector<4x16x32xf32> -> vector<4x16x32xf32>
    "tpu.trace_stop"() : () -> ()
    %71 = vector.shape_cast %70 : vector<4x16x32xf32> to vector<64x32xf32>
    %72 = vector.extract_strided_slice %35 {offsets = [32, 0], sizes = [32, 128], strides = [1, 1]} : vector<128x128xf32> to vector<32x128xf32>
    %cst_30 = arith.constant dense<0.000000e+00> : vector<64x128xf32>
    %73 = tpu.matmul %71, %72, %cst_30 {dimension_numbers = #tpu.dot_dimension_numbers<[1], [0], [0], [1], [0, 0, 1, 1], [], []>} : vector<64x32xf32>, vector<32x128xf32>, vector<64x128xf32> -> vector<64x128xf32>
    %74 = arith.addf %55, %73 : vector<64x128xf32>
    %75 = vector.extract_strided_slice %32 {offsets = [0, 0, 64], sizes = [4, 16, 32], strides = [1, 1, 1]} : vector<4x16x128xf32> to vector<4x16x32xf32>
    %76 = vector.extract_strided_slice %33 {offsets = [0, 0, 64], sizes = [4, 16, 32], strides = [1, 1, 1]} : vector<4x16x128xf32> to vector<4x16x32xf32>
    "tpu.trace_start"() <{level = 10 : i32, message = "bqd,bkd->bqk"}> : () -> ()
    %cst_31 = arith.constant dense<0.000000e+00> : vector<4x16x16xf32>
    %77 = tpu.matmul %75, %76, %cst_31 {dimension_numbers = #tpu.dot_dimension_numbers<[2], [2], [1], [1], [0, 0, 0, 1, 1, 1], [0], [0]>} : vector<4x16x32xf32>, vector<4x16x32xf32>, vector<4x16x16xf32> -> vector<4x16x16xf32>
    "tpu.trace_stop"() : () -> ()
    %cst_32 = arith.constant dense<0xFF800000> : vector<4x16xf32>
    %78 = vector.multi_reduction <maximumf>, %77, %cst_32 [2] : vector<4x16x16xf32> to vector<4x16xf32>
    %79 = vector.shape_cast %78 : vector<4x16xf32> to vector<4x16x1xf32>
    %80 = vector.broadcast %79 : vector<4x16x1xf32> to vector<4x16x16xf32>
    %81 = arith.subf %77, %80 : vector<4x16x16xf32>
    %82 = math.exp %81 : vector<4x16x16xf32>
    %cst_33 = arith.constant dense<0.000000e+00> : vector<4x16xf32>
    %83 = vector.multi_reduction <add>, %82, %cst_33 [2] : vector<4x16x16xf32> to vector<4x16xf32>
    %84 = vector.shape_cast %83 : vector<4x16xf32> to vector<4x16x1xf32>
    %85 = tpu.reciprocal %84 {approx = true} : vector<4x16x1xf32> -> vector<4x16x1xf32>
    %86 = vector.broadcast %85 : vector<4x16x1xf32> to vector<4x16x16xf32>
    %87 = arith.mulf %82, %86 : vector<4x16x16xf32>
    %88 = vector.extract_strided_slice %34 {offsets = [0, 0, 64], sizes = [4, 16, 32], strides = [1, 1, 1]} : vector<4x16x128xf32> to vector<4x16x32xf32>
    "tpu.trace_start"() <{level = 10 : i32, message = "bqk,bkd->bqd"}> : () -> ()
    %cst_34 = arith.constant dense<0.000000e+00> : vector<4x16x32xf32>
    %89 = tpu.matmul %87, %88, %cst_34 {dimension_numbers = #tpu.dot_dimension_numbers<[2], [1], [1], [2], [0, 0, 0, 1, 1, 2], [0], [0]>} : vector<4x16x16xf32>, vector<4x16x32xf32>, vector<4x16x32xf32> -> vector<4x16x32xf32>
    "tpu.trace_stop"() : () -> ()
    %90 = vector.shape_cast %89 : vector<4x16x32xf32> to vector<64x32xf32>
    %91 = vector.extract_strided_slice %35 {offsets = [64, 0], sizes = [32, 128], strides = [1, 1]} : vector<128x128xf32> to vector<32x128xf32>
    %cst_35 = arith.constant dense<0.000000e+00> : vector<64x128xf32>
    %92 = tpu.matmul %90, %91, %cst_35 {dimension_numbers = #tpu.dot_dimension_numbers<[1], [0], [0], [1], [0, 0, 1, 1], [], []>} : vector<64x32xf32>, vector<32x128xf32>, vector<64x128xf32> -> vector<64x128xf32>
    %93 = arith.addf %74, %92 : vector<64x128xf32>
    %94 = vector.extract_strided_slice %32 {offsets = [0, 0, 96], sizes = [4, 16, 32], strides = [1, 1, 1]} : vector<4x16x128xf32> to vector<4x16x32xf32>
    %95 = vector.extract_strided_slice %33 {offsets = [0, 0, 96], sizes = [4, 16, 32], strides = [1, 1, 1]} : vector<4x16x128xf32> to vector<4x16x32xf32>
    "tpu.trace_start"() <{level = 10 : i32, message = "bqd,bkd->bqk"}> : () -> ()
    %cst_36 = arith.constant dense<0.000000e+00> : vector<4x16x16xf32>
    %96 = tpu.matmul %94, %95, %cst_36 {dimension_numbers = #tpu.dot_dimension_numbers<[2], [2], [1], [1], [0, 0, 0, 1, 1, 1], [0], [0]>} : vector<4x16x32xf32>, vector<4x16x32xf32>, vector<4x16x16xf32> -> vector<4x16x16xf32>
    "tpu.trace_stop"() : () -> ()
    %cst_37 = arith.constant dense<0xFF800000> : vector<4x16xf32>
    %97 = vector.multi_reduction <maximumf>, %96, %cst_37 [2] : vector<4x16x16xf32> to vector<4x16xf32>
    %98 = vector.shape_cast %97 : vector<4x16xf32> to vector<4x16x1xf32>
    %99 = vector.broadcast %98 : vector<4x16x1xf32> to vector<4x16x16xf32>
    %100 = arith.subf %96, %99 : vector<4x16x16xf32>
    %101 = math.exp %100 : vector<4x16x16xf32>
    %cst_38 = arith.constant dense<0.000000e+00> : vector<4x16xf32>
    %102 = vector.multi_reduction <add>, %101, %cst_38 [2] : vector<4x16x16xf32> to vector<4x16xf32>
    %103 = vector.shape_cast %102 : vector<4x16xf32> to vector<4x16x1xf32>
    %104 = tpu.reciprocal %103 {approx = true} : vector<4x16x1xf32> -> vector<4x16x1xf32>
    %105 = vector.broadcast %104 : vector<4x16x1xf32> to vector<4x16x16xf32>
    %106 = arith.mulf %101, %105 : vector<4x16x16xf32>
    %107 = vector.extract_strided_slice %34 {offsets = [0, 0, 96], sizes = [4, 16, 32], strides = [1, 1, 1]} : vector<4x16x128xf32> to vector<4x16x32xf32>
    "tpu.trace_start"() <{level = 10 : i32, message = "bqk,bkd->bqd"}> : () -> ()
    %cst_39 = arith.constant dense<0.000000e+00> : vector<4x16x32xf32>
    %108 = tpu.matmul %106, %107, %cst_39 {dimension_numbers = #tpu.dot_dimension_numbers<[2], [1], [1], [2], [0, 0, 0, 1, 1, 2], [0], [0]>} : vector<4x16x16xf32>, vector<4x16x32xf32>, vector<4x16x32xf32> -> vector<4x16x32xf32>
    "tpu.trace_stop"() : () -> ()
    %109 = vector.shape_cast %108 : vector<4x16x32xf32> to vector<64x32xf32>
    %110 = vector.extract_strided_slice %35 {offsets = [96, 0], sizes = [32, 128], strides = [1, 1]} : vector<128x128xf32> to vector<32x128xf32>
    %cst_40 = arith.constant dense<0.000000e+00> : vector<64x128xf32>
    %111 = tpu.matmul %109, %110, %cst_40 {dimension_numbers = #tpu.dot_dimension_numbers<[1], [0], [0], [1], [0, 0, 1, 1], [], []>} : vector<64x32xf32>, vector<32x128xf32>, vector<64x128xf32> -> vector<64x128xf32>
    %112 = arith.addf %93, %111 : vector<64x128xf32>
    %113 = vector.broadcast %9 : vector<1x128xf32> to vector<64x128xf32>
    %114 = arith.addf %112, %113 : vector<64x128xf32>
    %115 = arith.addf %19, %114 : vector<64x128xf32>
    %cst_41 = arith.constant dense<0.000000e+00> : vector<64xf32>
    %116 = vector.multi_reduction <add>, %115, %cst_41 [1] : vector<64x128xf32> to vector<64xf32>
    %117 = vector.shape_cast %116 : vector<64xf32> to vector<64x1xf32>
    %cst_42 = arith.constant 1.280000e+02 : f32
    %118 = vector.broadcast %cst_42 : f32 to vector<64x1xf32>
    %119 = arith.divf %117, %118 : vector<64x1xf32>
    %120 = vector.broadcast %119 : vector<64x1xf32> to vector<64x128xf32>
    %121 = arith.subf %115, %120 : vector<64x128xf32>
    %122 = arith.mulf %121, %121 : vector<64x128xf32>
    %cst_43 = arith.constant dense<0.000000e+00> : vector<64xf32>
    %123 = vector.multi_reduction <add>, %122, %cst_43 [1] : vector<64x128xf32> to vector<64xf32>
    %124 = vector.shape_cast %123 : vector<64xf32> to vector<64x1xf32>
    %cst_44 = arith.constant 1.280000e+02 : f32
    %125 = vector.broadcast %cst_44 : f32 to vector<64x1xf32>
    %126 = arith.divf %124, %125 : vector<64x1xf32>
    %127 = vector.broadcast %119 : vector<64x1xf32> to vector<64x128xf32>
    %128 = arith.subf %115, %127 : vector<64x128xf32>
    %cst_45 = arith.constant 9.99999974E-6 : f32
    %129 = vector.broadcast %cst_45 : f32 to vector<64x1xf32>
    %130 = arith.addf %126, %129 : vector<64x1xf32>
    %131 = math.rsqrt %130 : vector<64x1xf32>
    %132 = vector.broadcast %131 : vector<64x1xf32> to vector<64x128xf32>
    %133 = arith.mulf %128, %132 : vector<64x128xf32>
    %134 = vector.broadcast %11 : vector<1x128xf32> to vector<64x128xf32>
    %135 = arith.mulf %133, %134 : vector<64x128xf32>
    %136 = vector.broadcast %12 : vector<1x128xf32> to vector<64x128xf32>
    %137 = arith.addf %135, %136 : vector<64x128xf32>
    %c0_46 = arith.constant 0 : index
    %c0_47 = arith.constant 0 : index
    %138 = vector.load %arg8[%c0_46, %c0_47] : memref<128x128xf32, #tpu.memory_space<vmem>>, vector<128x128xf32>
    %cst_48 = arith.constant dense<0.000000e+00> : vector<64x128xf32>
    %139 = tpu.matmul %137, %138, %cst_48 {dimension_numbers = #tpu.dot_dimension_numbers<[1], [0], [0], [1], [0, 0, 1, 1], [], []>} : vector<64x128xf32>, vector<128x128xf32>, vector<64x128xf32> -> vector<64x128xf32>
    %140 = vector.broadcast %10 : vector<1x128xf32> to vector<64x128xf32>
    %141 = arith.addf %139, %140 : vector<64x128xf32>
    %cst_49 = arith.constant 0.000000e+00 : f32
    %142 = vector.broadcast %cst_49 : f32 to vector<64x128xf32>
    %143 = arith.maximumf %141, %142 : vector<64x128xf32>
    %144 = arith.addf %137, %143 : vector<64x128xf32>
    %cst_50 = arith.constant dense<0.000000e+00> : vector<64xf32>
    %145 = vector.multi_reduction <add>, %144, %cst_50 [1] : vector<64x128xf32> to vector<64xf32>
    %146 = vector.shape_cast %145 : vector<64xf32> to vector<64x1xf32>
    %cst_51 = arith.constant 1.280000e+02 : f32
    %147 = vector.broadcast %cst_51 : f32 to vector<64x1xf32>
    %148 = arith.divf %146, %147 : vector<64x1xf32>
    %149 = vector.broadcast %148 : vector<64x1xf32> to vector<64x128xf32>
    %150 = arith.subf %144, %149 : vector<64x128xf32>
    %151 = arith.mulf %150, %150 : vector<64x128xf32>
    %cst_52 = arith.constant dense<0.000000e+00> : vector<64xf32>
    %152 = vector.multi_reduction <add>, %151, %cst_52 [1] : vector<64x128xf32> to vector<64xf32>
    %153 = vector.shape_cast %152 : vector<64xf32> to vector<64x1xf32>
    %cst_53 = arith.constant 1.280000e+02 : f32
    %154 = vector.broadcast %cst_53 : f32 to vector<64x1xf32>
    %155 = arith.divf %153, %154 : vector<64x1xf32>
    %156 = vector.broadcast %148 : vector<64x1xf32> to vector<64x128xf32>
    %157 = arith.subf %144, %156 : vector<64x128xf32>
    %cst_54 = arith.constant 9.99999974E-6 : f32
    %158 = vector.broadcast %cst_54 : f32 to vector<64x1xf32>
    %159 = arith.addf %155, %158 : vector<64x1xf32>
    %160 = math.rsqrt %159 : vector<64x1xf32>
    %161 = vector.broadcast %160 : vector<64x1xf32> to vector<64x128xf32>
    %162 = arith.mulf %157, %161 : vector<64x128xf32>
    %163 = vector.broadcast %13 : vector<1x128xf32> to vector<64x128xf32>
    %164 = arith.mulf %162, %163 : vector<64x128xf32>
    %165 = vector.broadcast %14 : vector<1x128xf32> to vector<64x128xf32>
    %166 = arith.addf %164, %165 : vector<64x128xf32>
    %c0_55 = arith.constant 0 : index
    %c0_56 = arith.constant 0 : index
    %167 = vector.load %arg9[%c0_55, %c0_56] : memref<128x128xf32, #tpu.memory_space<vmem>>, vector<128x128xf32>
    %cst_57 = arith.constant dense<0.000000e+00> : vector<64x128xf32>
    %168 = tpu.matmul %1, %167, %cst_57 {dimension_numbers = #tpu.dot_dimension_numbers<[1], [0], [0], [1], [0, 0, 1, 1], [], []>} : vector<64x128xf32>, vector<128x128xf32>, vector<64x128xf32> -> vector<64x128xf32>
    %169 = vector.broadcast %15 : vector<1x128xf32> to vector<64x128xf32>
    %170 = arith.addf %168, %169 : vector<64x128xf32>
    %171 = arith.negf %170 : vector<64x128xf32>
    %172 = math.exp %171 : vector<64x128xf32>
    %cst_58 = arith.constant 1.000000e+00 : f32
    %173 = vector.broadcast %cst_58 : f32 to vector<64x128xf32>
    %174 = arith.addf %173, %172 : vector<64x128xf32>
    %175 = arith.divf %173, %174 : vector<64x128xf32>
    %176 = arith.mulf %170, %175 : vector<64x128xf32>
    %177 = arith.mulf %166, %176 : vector<64x128xf32>
    %178 = vector.shape_cast %177 : vector<64x128xf32> to vector<4x16x128xf32>
    %c0_59 = arith.constant 0 : index
    %c0_60 = arith.constant 0 : index
    %c0_61 = arith.constant 0 : index
    %179 = vector.load %arg11[%c0_59, %c0_60, %c0_61] : memref<4x16x128xf32, #tpu.memory_space<vmem>>, vector<4x16x128xf32>
    tpu.vector_store %arg11[%c0_59, %c0_60, %c0_61], %178 {strides = array<i32>} : memref<4x16x128xf32, #tpu.memory_space<vmem>>, vector<4x16x128xf32>,
    return
  }
  func.func @transform_0(%arg0: i32) -> (i32, i32, i32) {
    %c0_i32 = arith.constant 0 : i32
    %c0_i32_0 = arith.constant 0 : i32
    %c0_i32_1 = arith.constant 0 : i32
    return %arg0, %c0_i32, %c0_i32_0 : i32, i32, i32
  }
  func.func @transform_1(%arg0: i32) -> (i32, i32, i32) {
    %c0_i32 = arith.constant 0 : i32
    %c0_i32_0 = arith.constant 0 : i32
    %c0_i32_1 = arith.constant 0 : i32
    return %arg0, %c0_i32, %c0_i32_0 : i32, i32, i32
  }
  func.func @transform_2(%arg0: i32) -> (i32, i32) {
    %c0_i32 = arith.constant 0 : i32
    %c0_i32_0 = arith.constant 0 : i32
    %c0_i32_1 = arith.constant 0 : i32
    return %c0_i32, %c0_i32_0 : i32, i32
  }
  func.func @transform_3(%arg0: i32) -> (i32, i32) {
    %c0_i32 = arith.constant 0 : i32
    %c0_i32_0 = arith.constant 0 : i32
    %c0_i32_1 = arith.constant 0 : i32
    return %c0_i32, %c0_i32_0 : i32, i32
  }
  func.func @transform_4(%arg0: i32) -> (i32, i32) {
    %c0_i32 = arith.constant 0 : i32
    %c0_i32_0 = arith.constant 0 : i32
    %c0_i32_1 = arith.constant 0 : i32
    return %c0_i32, %c0_i32_0 : i32, i32
  }
  func.func @transform_5(%arg0: i32) -> (i32, i32) {
    %c0_i32 = arith.constant 0 : i32
    %c0_i32_0 = arith.constant 0 : i32
    %c0_i32_1 = arith.constant 0 : i32
    return %c0_i32, %c0_i32_0 : i32, i32
  }
  func.func @transform_6(%arg0: i32) -> (i32, i32) {
    %c0_i32 = arith.constant 0 : i32
    %c0_i32_0 = arith.constant 0 : i32
    %c0_i32_1 = arith.constant 0 : i32
    return %c0_i32, %c0_i32_0 : i32, i32
  }
  func.func @transform_7(%arg0: i32) -> (i32, i32) {
    %c0_i32 = arith.constant 0 : i32
    %c0_i32_0 = arith.constant 0 : i32
    %c0_i32_1 = arith.constant 0 : i32
    return %c0_i32, %c0_i32_0 : i32, i32
  }
  func.func @transform_8(%arg0: i32) -> (i32, i32) {
    %c0_i32 = arith.constant 0 : i32
    %c0_i32_0 = arith.constant 0 : i32
    %c0_i32_1 = arith.constant 0 : i32
    return %c0_i32, %c0_i32_0 : i32, i32
  }
  func.func @transform_9(%arg0: i32) -> (i32, i32) {
    %c0_i32 = arith.constant 0 : i32
    %c0_i32_0 = arith.constant 0 : i32
    %c0_i32_1 = arith.constant 0 : i32
    return %c0_i32, %c0_i32_0 : i32, i32
  }
  func.func @transform_10(%arg0: i32) -> (i32, i32, i32) {
    %c0_i32 = arith.constant 0 : i32
    %c0_i32_0 = arith.constant 0 : i32
    %c0_i32_1 = arith.constant 0 : i32
    return %arg0, %c0_i32, %c0_i32_0 : i32, i32, i32
  }
}

</mosaic_0001>

<bundles_post_ra>
// kernel: tpu_custom_call.1
= control target key start
LH: loop header
LB: loop body
LE: loop exit
PB: predicated region body
PF: predicated region fallthrough
CT: control target
= control target key end

     0   :  { %s9104_s0 = inlined_call_operand.hbm [shape: f32[8,16,128], index: 0, kind: input, shape index: {}]   ;;  %s9105_s1 = inlined_call_operand.hbm [shape: f32[8,16,128], index: 1, kind: input, shape index: {}]   ;;  %s9106_s2 = inlined_call_operand.hbm [shape: f32[128,128], index: 2, kind: input, shape index: {}]   ;;  %s9107_s3 = inlined_call_operand.hbm [shape: f32[128,128], index: 3, kind: input, shape index: {}]   ;;  %s9108_s4 = inlined_call_operand.hbm [shape: f32[128,128], index: 4, kind: input, shape index: {}]   ;;  %s9109_s5 = inlined_call_operand.hbm [shape: f32[128,128], index: 5, kind: input, shape index: {}]   ;;  %s9110_s6 = inlined_call_operand.hbm [shape: f32[128,128], index: 6, kind: input, shape index: {}]   ;;  %s9111_s7 = inlined_call_operand.hbm [shape: f32[128,128], index: 7, kind: input, shape index: {}]   ;;  %s9112_s8 = inlined_call_operand.hbm [shape: f32[128,128], index: 8, kind: input, shape index: {}]   ;;  %s9113_s9 = inlined_call_operand.vmem [shape: f32[16,128], index: 9, kind: input, shape index: {}]   ;;  %s9114_s10 = inlined_call_operand.hbm [shape: f32[8,16,128], index: 10, kind: output, shape index: {}]  }
   0x1   :  { %9124 = sst [smem:[#allocation25_spill]] %s9104_s0 }
   0x2   :  { %9125 = sst [smem:[#allocation26_spill]] %s9106_s2 }
   0x3   :  { %9126 = sst [smem:[#allocation27_spill]] %s9107_s3 }
   0x4   :  { %9127 = sst [smem:[#allocation28_spill]] %s9108_s4 }
   0x5   :  { %9128 = sst [smem:[#allocation29_spill]] %s9109_s5 }
   0x6   :  { %9129 = sst [smem:[#allocation30_spill]] %s9110_s6 }
   0x7   :  { %9130 = sst [smem:[#allocation31_spill]] %s9111_s7 }
   0x8   :  { %9131 = sst [smem:[#allocation32_spill]] %s9113_s9 }
   0x9   :  { %9132 = sst [smem:[#allocation33_spill]] %s9114_s10 }
   0xa   :  { %15 = vsyncpa [#allocation3], 0 }
   0xb   :  { %17 = vsyncpa [#allocation3 + $0x1], 0 }
   0xc   :  { %18 = vsyncpa [#allocation6], 0 }
   0xd   :  { %20 = vsyncpa [#allocation6 + $0x1], 0 }
   0xe   :  { %21 = vsyncpa [#allocation9], 0 }
   0xf   :  { %22 = vsyncpa [#allocation12], 0 }
  0x10   :  { %23 = vsyncpa [#allocation15], 0 }
  0x11   :  { %24 = vsyncpa [#allocation4], 0 }
  0x12   :  { %26 = vsyncpa [#allocation4 + $0x1], 0  ;;  %s7859_s13 = smov 0   ;;  %s7861_s14 = smov 0  }
  0x13   :  { %s7863_s15 = smov 0   ;;  %s7865_s16 = smov 0  }
  0x14 LB: > { %s7787_s17 = smov [#allocation7]   ;;  %s7880_s19 = sadd.s32 4294967295, %s7785_s16   ;;  %s7785_s16 = sphi %s7865_s16, %s9169_s16   ;;  %s7781_s15 = sphi %s7863_s15, %s9168_s15   ;;  %s7777_s14 = sphi %s7861_s14, %s9167_s14   ;;  %s7773_s13 = sphi %s7859_s13, %s9166_s13  }
  0x15   : > { %s295_s18 = sshll.u32 %s7787_s17, 4  ;;  %p5521_p0 = scmp.ge.s32.totalorder %s7785_s16, 1  ;;  %s7885_s18 = int_to_ptr.vmem [resolvable:$true] %s295_s18 }
  0x16   : > { %p9117_p1 = scmp.eq.s32.totalorder %s7880_s19, 0  ;;  %p283_p2 = scmp.lt.s32.totalorder %s7785_s16, 3 }
  0x17   : > { %s7788_s21 = smov [#allocation8]   ;;  %s7789_s24 = smov [#allocation11]  }
  0x18   : > { %p7887_p3 = pnand %p5521_p0, %p283_p2  ;;  %s308_s22 = sshll.u32 %s7788_s21, 4  ;;  %s7900_s22 = int_to_ptr.vmem [resolvable:$true] %s308_s22 }
  0x19   : > { %s334_s25 = sshll.u32 %s7789_s24, 4  ;;  %s9135_s2 = sld [smem:[#allocation26_spill]]  ;;  %s7902_s25 = int_to_ptr.vmem [resolvable:$true] %s334_s25 }
  0x1a   : > { %s9133_s20 = scalar_select %p7887_p3, 1, 0 }
  0x1b   : > { %p7027_p5 = pneg %p7887_p3 }
  0x1d   : > { %p7896_p6 = pnand %p7027_p5, %p9117_p1 }
  0x1f   : > { %s7443_s28 = scalar_lea.hbm %s9135_s2, 2048  ;;  %p7912_p8 = pneg %p7896_p6 }
  0x20   : > { %p7444_p7 = scmp.ne.s32.totalorder %s9135_s2, %s7443_s28  ;;  %p7450_p11 = scmp.lt.u32.totalorder %s7443_s28, %s9135_s2 }
  0x22   : > { %p7446_p9 = pnand %p7912_p8, %p7444_p7 }
  0x24   : > { %p7447_p10 = pneg %p7446_p9 }
  0x26   : > { %p7452_p12 = pnand %p7450_p11, %p7447_p10 }
  0x28   : > { %7455 = shalt.err (!%p7452_p12)
}
  0x29   : > { %s7456_s21 = scalar_lea.vmem %s7885_s18, 2048  ;;  %p7464_p5 = scmp.lt.s32.totalorder %s7885_s18, %s7885_s18 }
  0x2a   : > { %p7457_p13 = scmp.ne.s32.totalorder %s7885_s18, %s7456_s21  ;;  %p7465_p4 = scmp.lt.s32.totalorder %s7456_s21, %s7456_s21 }
  0x2c   : > { %p7459_p0 = pnand %p7457_p13, %p7912_p8  ;;  %p7466_p7 = por %p7465_p4, %p7464_p5 }
  0x2e   : > { %p7460_p2 = pneg %p7459_p0 }
  0x30   : > { %p7467_p9 = pnand %p7466_p7, %p7460_p2 }
  0x32   : > { %7470 = shalt.err (!%p7467_p9)
}
  0x33   : > { %s9119_s24 = smov 128   ;;  %s9121_s26 = smov 8  }
  0x34   : > { %7030 = dma.hbm_to_vmem [thread:$0]  (!%p7896_p6), %s9135_s2, 2048, %s7885_s18, [#allocation6], %s9119_s24, %s9119_s24, %s9121_s26  }
  0x35   : > { %s9137_s3 = sld [smem:[#allocation27_spill]] }
  0x3b   : > { %s7471_s12 = scalar_lea.hbm %s9137_s3, 2048 }
  0x3c   : > { %p7472_p4 = scmp.ne.s32.totalorder %s9137_s3, %s7471_s12  ;;  %p7478_p12 = scmp.lt.u32.totalorder %s7471_s12, %s9137_s3 }
  0x3e   : > { %p7474_p10 = pnand %p7472_p4, %p7912_p8 }
  0x40   : > { %p7475_p11 = pneg %p7474_p10 }
  0x42   : > { %p7480_p13 = pnand %p7478_p12, %p7475_p11 }
  0x44   : > { %7483 = shalt.err (!%p7480_p13)
}
  0x45   : > { %s7484_s18 = scalar_lea.vmem %s7900_s22, 2048  ;;  %p7492_p7 = scmp.lt.s32.totalorder %s7900_s22, %s7900_s22 }
  0x46   : > { %p7485_p0 = scmp.ne.s32.totalorder %s7900_s22, %s7484_s18  ;;  %p7493_p9 = scmp.lt.s32.totalorder %s7484_s18, %s7484_s18 }
  0x48   : > { %p7487_p2 = pnand %p7485_p0, %p7912_p8  ;;  %p7494_p4 = por %p7493_p9, %p7492_p7 }
  0x4a   : > { %p7488_p5 = pneg %p7487_p2 }
  0x4c   : > { %p7495_p10 = pnand %p7494_p4, %p7488_p5 }
  0x4e   : > { %7498 = shalt.err (!%p7495_p10)
}
  0x4f   : > { %7033 = dma.hbm_to_vmem [thread:$0]  (!%p7896_p6), %s9137_s3, 2048, %s7900_s22, [#allocation9], %s9119_s24, %s9119_s24, %s9121_s26  }
  0x50   : > { %s9138_s5 = sld [smem:[#allocation29_spill]] }
  0x56   : > { %s7499_s29 = scalar_lea.hbm %s9138_s5, 2048 }
  0x57   : > { %p7500_p11 = scmp.ne.s32.totalorder %s9138_s5, %s7499_s29  ;;  %p7506_p0 = scmp.lt.u32.totalorder %s7499_s29, %s9138_s5 }
  0x59   : > { %p7502_p12 = pnand %p7500_p11, %p7912_p8 }
  0x5b   : > { %p7503_p13 = pneg %p7502_p12 }
  0x5d   : > { %p7508_p2 = pnand %p7506_p0, %p7503_p13 }
  0x5f   : > { %7511 = shalt.err (!%p7508_p2)
}
  0x60   : > { %s7512_s22 = scalar_lea.vmem %s7902_s25, 2048  ;;  %p7520_p4 = scmp.lt.s32.totalorder %s7902_s25, %s7902_s25 }
  0x61   : > { %p7513_p5 = scmp.ne.s32.totalorder %s7902_s25, %s7512_s22  ;;  %p7521_p10 = scmp.lt.s32.totalorder %s7512_s22, %s7512_s22 }
  0x63   : > { %p7515_p7 = pnand %p7513_p5, %p7912_p8  ;;  %p7522_p11 = por %p7521_p10, %p7520_p4 }
  0x65   : > { %p7516_p9 = pneg %p7515_p7 }
  0x67   : > { %p7523_p12 = pnand %p7522_p11, %p7516_p9 }
  0x69   : > { %7526 = shalt.err (!%p7523_p12)
}
  0x6a   : > { %7039 = dma.hbm_to_vmem [thread:$0]  (!%p7896_p6), %s9138_s5, 2048, %s7902_s25, [#allocation12], %s9119_s24, %s9119_s24, %s9121_s26  }
  0x6b   : > { %s7792_s10 = smov [#allocation14]   ;;  %s7793_s28 = smov [#allocation10]  }
  0x6c   : > { %s360_s27 = sshll.u32 %s7792_s10, 4  ;;  %s321_s29 = sshll.u32 %s7793_s28, 4  ;;  %s361_s27 = int_to_ptr.vmem [resolvable:$true] %s360_s27  ;;  %s322_s29 = int_to_ptr.vmem [resolvable:$true] %s321_s29 }
  0x6d   : > { %s9139_s7 = sld [smem:[#allocation31_spill]] }
  0x73   : > { %s7527_s17 = scalar_lea.hbm %s9139_s7, 2048 }
  0x74   : > { %p7528_p13 = scmp.ne.s32.totalorder %s9139_s7, %s7527_s17  ;;  %p7534_p5 = scmp.lt.u32.totalorder %s7527_s17, %s9139_s7 }
  0x76   : > { %p7530_p0 = pnand %p7528_p13, %p7912_p8 }
  0x78   : > { %p7531_p2 = pneg %p7530_p0 }
  0x7a   : > { %p7536_p7 = pnand %p7534_p5, %p7531_p2 }
  0x7c   : > { %7539 = shalt.err (!%p7536_p7)
}
  0x7d   : > { %s7540_s25 = scalar_lea.vmem %s361_s27, 2048  ;;  %p7548_p11 = scmp.lt.s32.totalorder %s361_s27, %s361_s27 }
  0x7e   : > { %p7541_p9 = scmp.ne.s32.totalorder %s361_s27, %s7540_s25  ;;  %p7549_p12 = scmp.lt.s32.totalorder %s7540_s25, %s7540_s25 }
  0x80   : > { %p7543_p4 = pnand %p7541_p9, %p7912_p8  ;;  %p7550_p1 = por %p7549_p12, %p7548_p11 }
  0x82   : > { %p7544_p10 = pneg %p7543_p4 }
  0x84   : > { %p7551_p3 = pnand %p7550_p1, %p7544_p10 }
  0x86   : > { %7554 = shalt.err (!%p7551_p3)
}
  0x87   : > { %7045 = dma.hbm_to_vmem [thread:$0]  (!%p7896_p6), %s9139_s7, 2048, %s361_s27, [#allocation15], %s9119_s24, %s9119_s24, %s9121_s26  }
  0x88   : > { %s9140_s4 = sld [smem:[#allocation28_spill]] }
  0x8e   : > { %s7555_s30 = scalar_lea.hbm %s9140_s4, 2048 }
  0x8f   : > { %p7556_p1 = scmp.ne.s32.totalorder %s9140_s4, %s7555_s30  ;;  %p7562_p0 = scmp.lt.u32.totalorder %s7555_s30, %s9140_s4 }
  0x91   : > { %p7558_p3 = pnand %p7556_p1, %p7912_p8 }
  0x93   : > { %p7559_p13 = pneg %p7558_p3 }
  0x95   : > { %p7564_p2 = pnand %p7562_p0, %p7559_p13 }
  0x97   : > { %7567 = shalt.err (!%p7564_p2)
}
  0x98   : > { %s7568_s18 = scalar_lea.vmem %s322_s29, 2048  ;;  %p7576_p4 = scmp.lt.s32.totalorder %s322_s29, %s322_s29 }
  0x99   : > { %p7569_p5 = scmp.ne.s32.totalorder %s322_s29, %s7568_s18  ;;  %p7577_p10 = scmp.lt.s32.totalorder %s7568_s18, %s7568_s18 }
  0x9b   : > { %p7571_p7 = pnand %p7569_p5, %p7912_p8  ;;  %p7578_p11 = por %p7577_p10, %p7576_p4 }
  0x9d   : > { %p7572_p9 = pneg %p7571_p7 }
  0x9f   : > { %p7579_p12 = pnand %p7578_p11, %p7572_p9 }
  0xa1   : > { %7582 = shalt.err (!%p7579_p12)
}
  0xa2   : > { %7036 = dma.hbm_to_vmem [thread:$0]  (!%p7896_p6), %s9140_s4, 2048, %s322_s29, [#allocation9], %s9119_s24, %s9119_s24, %s9121_s26  }
  0xa3   : > { %s7794_s2 = smov [#allocation13]   ;;  %s7795_s10 = smov [#allocation16]  }
  0xa4   : > { %s347_s9 = sshll.u32 %s7794_s2, 4  ;;  %s373_s28 = sshll.u32 %s7795_s10, 4  ;;  %s348_s9 = int_to_ptr.vmem [resolvable:$true] %s347_s9  ;;  %s374_s28 = int_to_ptr.vmem [resolvable:$true] %s373_s28 }
  0xa5   : > { %s9141_s6 = sld [smem:[#allocation30_spill]] }
  0xab   : > { %s7583_s17 = scalar_lea.hbm %s9141_s6, 2048 }
  0xac   : > { %p7584_p1 = scmp.ne.s32.totalorder %s9141_s6, %s7583_s17  ;;  %p7590_p0 = scmp.lt.u32.totalorder %s7583_s17, %s9141_s6 }
  0xae   : > { %p7586_p3 = pnand %p7584_p1, %p7912_p8 }
  0xb0   : > { %p7587_p13 = pneg %p7586_p3 }
  0xb2   : > { %p7592_p2 = pnand %p7590_p0, %p7587_p13 }
  0xb4   : > { %7595 = shalt.err (!%p7592_p2)
}
  0xb5   : > { %s7596_s29 = scalar_lea.vmem %s348_s9, 2048  ;;  %p7604_p4 = scmp.lt.s32.totalorder %s348_s9, %s348_s9 }
  0xb6   : > { %p7597_p5 = scmp.ne.s32.totalorder %s348_s9, %s7596_s29  ;;  %p7605_p10 = scmp.lt.s32.totalorder %s7596_s29, %s7596_s29 }
  0xb8   : > { %p7599_p7 = pnand %p7597_p5, %p7912_p8  ;;  %p7606_p11 = por %p7605_p10, %p7604_p4 }
  0xba   : > { %p7600_p9 = pneg %p7599_p7 }
  0xbc   : > { %p7607_p12 = pnand %p7606_p11, %p7600_p9 }
  0xbe   : > { %7610 = shalt.err (!%p7607_p12)
}
  0xbf   : > { %7042 = dma.hbm_to_vmem [thread:$0]  (!%p7896_p6), %s9141_s6, 2048, %s348_s9, [#allocation12], %s9119_s24, %s9119_s24, %s9121_s26  }
  0xc0   : > { %s7611_s12 = scalar_lea.hbm %s9112_s8, 2048 }
  0xc1   : > { %p7612_p1 = scmp.ne.s32.totalorder %s9112_s8, %s7611_s12  ;;  %p7618_p0 = scmp.lt.u32.totalorder %s7611_s12, %s9112_s8 }
  0xc3   : > { %p7614_p3 = pnand %p7612_p1, %p7912_p8 }
  0xc5   : > { %p7615_p13 = pneg %p7614_p3 }
  0xc7   : > { %p7620_p2 = pnand %p7618_p0, %p7615_p13 }
  0xc9   : > { %7623 = shalt.err (!%p7620_p2)
}
  0xca   : > { %s7624_s27 = scalar_lea.vmem %s374_s28, 2048  ;;  %p7632_p4 = scmp.lt.s32.totalorder %s374_s28, %s374_s28 }
  0xcb   : > { %p7625_p5 = scmp.ne.s32.totalorder %s374_s28, %s7624_s27  ;;  %p7633_p10 = scmp.lt.s32.totalorder %s7624_s27, %s7624_s27 }
  0xcd   : > { %p7627_p7 = pnand %p7625_p5, %p7912_p8  ;;  %p7634_p11 = por %p7633_p10, %p7632_p4 }
  0xcf   : > { %p7628_p9 = pneg %p7627_p7 }
  0xd1   : > { %p7635_p12 = pnand %p7634_p11, %p7628_p9 }
  0xd3   : > { %7638 = shalt.err (!%p7635_p12)
}
  0xd4   : > { %7048 = dma.hbm_to_vmem [thread:$0]  (!%p7896_p6), %s9112_s8, 2048, %s374_s28, [#allocation15], %s9119_s24, %s9119_s24, %s9121_s26  }
  0xd5   : > { %s5520_s23 = sadd.s32 4294967294, %s7785_s16   ;;  %s8074_s11 = sadd.s32 1, %s7785_s16  }
  0xd6   : > { %s39_s25 = sadd.s32 1, %s7781_s15  ;;  %s36_s2 = ssub.s32 %s7785_s16, %s8074_s11 }
  0xd7   : > { %p46_p8 = scmp.ne.s32.totalorder %s7781_s15, %s7777_s14  ;;  %p37_p1 = scmp.eq.s32.totalorder %s36_s2, 0 }
  0xd8   : > { %p47_p3 = scmp.eq.s32.totalorder %s7785_s16, 0  ;;  %p52_p13 = scmp.ne.s32.totalorder %s7777_s14, %s7773_s13 }
  0xd9   : > { %p270_p0 = scmp.eq.s32.totalorder %s7880_s19, 1  ;;  %p9142_p5 = scmp.eq.s32.totalorder %s7880_s19, 0 }
  0xda   : > { %s8086_s10 = scalar_select %p37_p1, %s7781_s15, %s39_s25  }
  0xdb   : > { %p48_p2 = por %p47_p3, %p46_p8  ;;  %p8090_p7 = por %p9142_p5, %p52_p13 }
  0xdc   : > { %p8094_p6 = por %p270_p0, %p46_p8  ;;  %p276_p9 = scmp.eq.s32.totalorder %s5520_s23, 1 }
  0xdd   : > { %p7067_p4 = scmp.lt.s32.totalorder %s7785_s16, 2  ;;  %s390_s12 = sand.u32 1, %s7781_s15  }
  0xde   : > { %s9144_s28 = scalar_select %p8094_p6, 1, 0 }
  0xdf   : > { %p8100_p10 = por %p276_p9, %p52_p13  ;;  %s8104_s21 = sshll.u32 %s390_s12, 6 }
  0xe0   : > { %s5692_s22 = sshll.u32 %s7785_s16, 10  ;;  %s9146_s0 = sld [smem:[#allocation25_spill]] }
  0xe1   : > { %s9145_s17 = scalar_select %p8100_p10, 1, 0 }
  0xe2   : > { %s394_s29 = scalar_lea.vmem [#allocation2], %s8104_s21  ;;  %p8113_p11 = pnand %p7067_p4, %p48_p2 }
  0xe3   : > { %s402_s23 = sshll.u32 %s394_s29, 4  ;;  %s8122_s18 = scalar_lea.hbm %s9105_s1, %s5692_s22  ;;  %s8117_s23 = int_to_ptr.vmem [resolvable:$true] %s402_s23 }
  0xe4   : > { %s8124_s27 = scalar_lea.sflag [#allocation3], %s390_s12  ;;  %p7641_p8 = pneg %p8113_p11 }
  0xe6   : > { %s8110_s9 = scalar_lea.hbm %s9146_s0, %s5692_s22  ;;  %s7644_s4 = scalar_lea.hbm %s9146_s0, 2048 }
  0xe7   : > { %s7639_s26 = scalar_lea.hbm %s8110_s9, 1024  ;;  %p7645_p13 = scmp.lt.u32.totalorder %s8110_s9, %s9146_s0 }
  0xe8   : > { %p7640_p12 = scmp.ne.s32.totalorder %s8110_s9, %s7639_s26  ;;  %p7646_p0 = scmp.lt.u32.totalorder %s7644_s4, %s7639_s26 }
  0xe9   : > { %p7648_p5 = scmp.lt.u32.totalorder %s7639_s26, %s8110_s9 }
  0xea   : > { %p7642_p1 = pnand %p7641_p8, %p7640_p12  ;;  %p7647_p2 = por %p7646_p0, %p7645_p13 }
  0xec   : > { %p7643_p3 = pneg %p7642_p1  ;;  %p7649_p9 = por %p7648_p5, %p7647_p2 }
  0xee   : > { %p7650_p4 = pnand %p7649_p9, %p7643_p3 }
  0xf0   : > { %7653 = shalt.err (!%p7650_p4)
}
  0xf1   : > { %s7654_s24 = scalar_lea.vmem %s8117_s23, 1024  ;;  %s7796_s3 = smov [#allocation2]  }
  0xf2   : > { %p7655_p12 = scmp.ne.s32.totalorder %s8117_s23, %s7654_s24  ;;  %s7659_s12 = sshll.u32 %s7796_s3, 4  ;;  %s7660_s12 = int_to_ptr.vmem [resolvable:$false] %s7659_s12 }
  0xf3   : > { %s7661_s5 = scalar_lea.vmem %s7660_s12, 2048  ;;  %p7662_p6 = scmp.lt.s32.totalorder %s8117_s23, %s7660_s12 }
  0xf4   : > { %p7657_p1 = pnand %p7655_p12, %p7641_p8  ;;  %p7663_p13 = scmp.lt.s32.totalorder %s7661_s5, %s7654_s24 }
  0xf6   : > { %p7658_p10 = pneg %p7657_p1  ;;  %p7664_p0 = por %p7663_p13, %p7662_p6 }
  0xf8   : > { %p7665_p2 = pnand %p7664_p0, %p7658_p10 }
  0xfa   : > { %7668 = shalt.err (!%p7665_p2)
}
  0xfb   : > { %s9148_s4 = smov 8   ;;  %s9149_s6 = smov 128  }
  0xfc   : > { %7052 = dma.hbm_to_vmem [thread:$0]  (!%p8113_p11), %s8110_s9, 1024, %s8117_s23, %s8124_s27, %s9149_s6, %s9149_s6, %s9148_s4  }
  0xfd   : > { %s416_s26 = scalar_lea.vmem [#allocation5], %s8104_s21  ;;  %s412_s2 = sand.u32 1, %s7785_s16  }
  0xfe   : > { %s424_s22 = sshll.u32 %s416_s26, 4  ;;  %s8159_s29 = scalar_lea.sflag [#allocation6], %s412_s2  ;;  %s8157_s22 = int_to_ptr.vmem [resolvable:$true] %s424_s22 }
  0xff   : > { %s7669_s24 = scalar_lea.hbm %s8122_s18, 1024  ;;  %s7674_s5 = scalar_lea.hbm %s9105_s1, 2048 }
 0x100   : > { %p7670_p6 = scmp.ne.s32.totalorder %s8122_s18, %s7669_s24  ;;  %p7675_p5 = scmp.lt.u32.totalorder %s8122_s18, %s9105_s1 }
 0x101   : > { %p7676_p9 = scmp.lt.u32.totalorder %s7674_s5, %s7669_s24  ;;  %p7678_p12 = scmp.lt.u32.totalorder %s7669_s24, %s8122_s18 }
 0x102   : > { %p7672_p10 = pnand %p7670_p6, %p7641_p8 }
 0x103   : > { %p7677_p4 = por %p7676_p9, %p7675_p5 }
 0x104   : > { %p7673_p3 = pneg %p7672_p10 }
 0x105   : > { %p7679_p1 = por %p7678_p12, %p7677_p4 }
 0x107   : > { %p7680_p13 = pnand %p7679_p1, %p7673_p3 }
 0x109   : > { %7683 = shalt.err (!%p7680_p13)
}
 0x10a   : > { %s7684_s21 = scalar_lea.vmem %s8157_s22, 1024  ;;  %s7797_s9 = smov [#allocation5]  }
 0x10b   : > { %p7685_p0 = scmp.ne.s32.totalorder %s8157_s22, %s7684_s21  ;;  %s7689_s23 = sshll.u32 %s7797_s9, 4  ;;  %s7690_s23 = int_to_ptr.vmem [resolvable:$false] %s7689_s23 }
 0x10c   : > { %s7691_s0 = scalar_lea.vmem %s7690_s23, 2048  ;;  %p7692_p10 = scmp.lt.s32.totalorder %s8157_s22, %s7690_s23 }
 0x10d   : > { %p7687_p2 = pnand %p7685_p0, %p7641_p8  ;;  %p7693_p5 = scmp.lt.s32.totalorder %s7691_s0, %s7684_s21 }
 0x10f   : > { %p7688_p6 = pneg %p7687_p2  ;;  %p7694_p9 = por %p7693_p5, %p7692_p10 }
 0x111   : > { %p7695_p4 = pnand %p7694_p9, %p7688_p6 }
 0x113   : > { %7698 = shalt.err (!%p7695_p4)
}
 0x114   : > { %7055 = dma.hbm_to_vmem [thread:$0]  (!%p8113_p11), %s8122_s18, 1024, %s8157_s22, %s8159_s29, %s9149_s6, %s9149_s6, %s9148_s4  }
 0x115   : > { %p9150_p8 = scmp.ne.s32.totalorder %s9133_s20, 0 }
 0x116   : > { %s8191_s7 = sand.u32 (!%p9150_p8), 1, %s7777_s14  }
 0x117   : > { %436 = sbr.rel (%p9150_p8) target bundleno = 4490 (0x118a), region = 60  ;;  %s8194_s27 = sshll.u32 (!%p9150_p8), %s8191_s7, 6 }
 0x118   : > { %s439_s25 = scalar_lea.sflag (!%p9150_p8), [#allocation3], %s8191_s7  ;;  %s8198_s26 = scalar_lea.vmem (!%p9150_p8), [#allocation2], %s8194_s27 }
 0x11e   : > { %7744 = dma.done.wait (%p8090_p7), %s439_s25, 1024  }
 0x11f   : > { %7746 = vsyncadd (%p8090_p7), %s439_s25, 4294966272  ;;  %s447_s20 = sand.u32 1, %s7880_s19   ;;  %s8206_s4 = scalar_lea.vmem [#allocation5], %s8194_s27 }
 0x120   : > { %s448_s18 = scalar_lea.sflag [#allocation6], %s447_s20 }
 0x121   : > { %7748 = dma.done.wait (%p8090_p7), %s448_s18, 1024  }
 0x122   : > { %7750 = vsyncadd (%p8090_p7), %s448_s18, 4294966272  ;;  %p9151_p11 = scmp.eq.s32.totalorder %s7880_s19, 0 }
 0x124   : > { %7752 = dma.done.wait (%p9151_p11), [#allocation6], 2048   ;;  %p9152_p3 = pmov %p9151_p11 }
 0x126   : > { %7754 = vsyncadd (%p9152_p3), [#allocation6], 4294965248  ;;  %p9153_p12 = pmov %p9152_p3 }
 0x127   : > { %p9154_p1 = pmov %p9152_p3 }
 0x128   : > { %7756 = dma.done.wait (%p9153_p12), [#allocation9], 4096  }
 0x129   : > { %7758 = vsyncadd (%p9154_p1), [#allocation9], 4294963200  ;;  %p9155_p13 = pmov %p9154_p1 }
 0x12a   : > { %p9156_p0 = pmov %p9154_p1 }
 0x12b   : > { %7760 = dma.done.wait (%p9155_p13), [#allocation12], 4096  }
 0x12c   : > { %7762 = vsyncadd (%p9156_p0), [#allocation12], 4294963200  ;;  %p9157_p7 = pmov %p9156_p0 }
 0x12d   : > { %p9158_p2 = pmov %p9156_p0 }
 0x12e   : > { %7764 = dma.done.wait (%p9157_p7), [#allocation15], 4096  }
 0x12f   : > { %7766 = vsyncadd (%p9158_p2), [#allocation15], 4294963200  ;;  %v542_v0 = vld [vmem:[#allocation7] sm:$0xff]  ;;  %v543_v1 = vld [vmem:[#allocation7 + $0x8] sm:$0xff]  ;;  %s9159_s22 = sld [smem:[#allocation32_spill]]  ;;  %vm1058_vm0 = vcmask 261120  }
 0x130   : > { %v544_v2 = vld [vmem:[#allocation7 + $0x10] sm:$0xff]  ;;  %v6585_v3 = vpack.c.bf16 %v543_v1, %v542_v0  ;;  %v545_v4 = vld [vmem:[#allocation7 + $0x18] sm:$0xff]  ;;  %v546_v6 = vld [vmem:[#allocation7 + $0x20] sm:$0xff]  ;;  %vm1407_vm2 = vcmask 130048   ;;  %s7798_s2 = smov 96   ;;  %s7799_s29 = smov 64  }
 0x131   : > { %v6589_v5 = vpack.c.bf16 %v545_v4, %v544_v2  ;;  %v547_v7 = vld [vmem:[#allocation7 + $0x28] sm:$0xff]  ;;  %v524_v9 = vld [vmem:[%s8198_s26] sm:$0xff]  ;;  %v548_v10 = vld [vmem:[#allocation7 + $0x30] sm:$0xff]  ;;  %s7800_s24 = smov 32   ;;  %s9019_s9 = scalar_lea.vmem [#allocation17], %s8194_s27 }
 0x132   : > { %6586 = vmatprep.subr.bf16.mxu0 %v6585_v3  ;;  %v6593_v8 = vpack.c.bf16 %v547_v7, %v546_v6  ;;  %v549_v11 = vld [vmem:[#allocation7 + $0x38] sm:$0xff]  ;;  %6049 = vmatprep.mubr.f32.mxu0 %v524_v9  ;;  %v550_v13 = vld [vmem:[#allocation7 + $0x40] sm:$0xff]  ;;  %v551_v14 = vld [vmem:[#allocation7 + $0x48] sm:$0xff]  ;;  %s5696_s23 = sshll.u32 %s7880_s19, 10  ;;  %s5358_s0 = sshll.u32 %s9019_s9, 4  ;;  %s9058_s0 = int_to_ptr.vmem [resolvable:$true] %s5358_s0 }
 0x133   : > { %6588 = vmatpush3.bf16.msra.mxu0 %v6585_v3  ;;  %v6597_v12 = vpack.c.bf16 %v549_v11, %v548_v10  ;;  %v667_v15 = vld [vmem:[#allocation8] sm:$0xff]  ;;  %v668_v16 = vld [vmem:[#allocation8 + $0x8] sm:$0xff]  ;;  %v669_v18 = vld [vmem:[#allocation8 + $0x10] sm:$0xff]  ;;  %v6601_v22 = vpack.c.bf16 %v551_v14, %v550_v13  ;;  %s5344_s19 = scalar_lea.sflag [#allocation4], %s8191_s7  ;;  %s7699_s18 = scalar_lea.vmem %s9058_s0, 1024 }
 0x134   : > { %6590 = vmatprep.subr.bf16.mxu0 %v6589_v5  ;;  %v6617_v17 = vpack.c.bf16 %v668_v16, %v667_v15  ;;  %v670_v19 = vld [vmem:[#allocation8 + $0x18] sm:$0xff]  ;;  %v671_v21 = vld [vmem:[#allocation8 + $0x20] sm:$0xff]  ;;  %v672_v23 = vld [vmem:[#allocation8 + $0x28] sm:$0xff]  ;;  %p7700_p6 = scmp.ne.s32.totalorder %s9058_s0, %s7699_s18  ;;  %p9163_p10 = scmp.ne.s32.totalorder %s9144_s28, 0 }
 0x135   : > { %v6621_v20 = vpack.c.bf16 %v670_v19, %v669_v18  ;;  %v552_v24 = vld [vmem:[#allocation7 + $0x50] sm:$0xff]  ;;  %v553_v25 = vld [vmem:[#allocation7 + $0x58] sm:$0xff]  ;;  %v6625_v26 = vpack.c.bf16 %v672_v23, %v671_v21  ;;  %v554_v30 = vld [vmem:[#allocation7 + $0x60] sm:$0xff] }
 0x136   : > { %6618 = vmatprep.subr.bf16.mxu1 %v6617_v17  ;;  %v673_v27 = vld [vmem:[#allocation8 + $0x30] sm:$0xff]  ;;  %v674_v28 = vld [vmem:[#allocation8 + $0x38] sm:$0xff]  ;;  %v6605_v29 = vpack.c.bf16 %v553_v25, %v552_v24  ;;  %v555_v31 = vld [vmem:[#allocation7 + $0x68] sm:$0xff]  ;;  %p7701_p5 = pnand %p7700_p6, %p9163_p10 }
 0x137   : > { %6592 = vmatpush3.bf16.msra.mxu0 %v6589_v5  ;;  %6620 = vmatpush3.bf16.msra.mxu1 %v6617_v17  ;;  %v6629_v32 = vpack.c.bf16 %v674_v28, %v673_v27  ;;  %v675_v33 = vld [vmem:[#allocation8 + $0x40] sm:$0xff]  ;;  %v676_v34 = vld [vmem:[#allocation8 + $0x48] sm:$0xff]  ;;  %v6609_v35 = vpack.c.bf16 %v555_v31, %v554_v30  ;;  %v556_v36 = vld [vmem:[#allocation7 + $0x70] sm:$0xff]  ;;  %v558_v27 = vlaneseq }
 0x138   : > { %6594 = vmatprep.subr.bf16.mxu0 %v6593_v8  ;;  %6622 = vmatprep.subr.bf16.mxu1 %v6621_v20  ;;  %v557_v37 = vld [vmem:[#allocation7 + $0x78] sm:$0xff]  ;;  %v6633_v38 = vpack.c.bf16 %v676_v34, %v675_v33  ;;  %v677_v39 = vld [vmem:[#allocation8 + $0x50] sm:$0xff]  ;;  %v792_v42 = vld [vmem:[#allocation10] sm:$0xff]  ;;  %p7702_p9 = pneg %p7701_p5 }
 0x139   : > { %v678_v40 = vld [vmem:[#allocation8 + $0x58] sm:$0xff]  ;;  %v6613_v41 = vpack.c.bf16 %v557_v37, %v556_v36  ;;  %v793_v43 = vld [vmem:[#allocation10 + $0x8] sm:$0xff]  ;;  %v679_v45 = vld [vmem:[#allocation8 + $0x60] sm:$0xff]  ;;  %v8268_v28 = vshrl.u32 %v558_v27, 7 }
 0x13a   : > { %v6637_v44 = vpack.c.bf16 %v678_v40, %v677_v39  ;;  %v680_v46 = vld [vmem:[#allocation8 + $0x68] sm:$0xff]  ;;  %v6649_v47 = vpack.c.bf16 %v793_v43, %v792_v42  ;;  %v794_v48 = vld [vmem:[#allocation10 + $0x10] sm:$0xff]  ;;  %v795_v49 = vld [vmem:[#allocation10 + $0x18] sm:$0xff] }
 0x13b   : > { %6596 = vmatpush3.bf16.msra.mxu0 %v6593_v8  ;;  %6624 = vmatpush3.bf16.msra.mxu1 %v6621_v20  ;;  %v6641_v50 = vpack.c.bf16 %v680_v46, %v679_v45  ;;  %v525_v51 = vld [vmem:[%s8198_s26 + $0x8] sm:$0xff]  ;;  %v526_v52 = vld [vmem:[%s8198_s26 + $0x10] sm:$0xff]  ;;  %v6653_v53 = vpack.c.bf16 %v795_v49, %v794_v48  ;;  %v796_v54 = vld [vmem:[#allocation10 + $0x20] sm:$0xff] }
 0x13c   : > { %6598 = vmatprep.subr.bf16.mxu0 %v6597_v12  ;;  %6626 = vmatprep.subr.bf16.mxu1 %v6625_v26  ;;  %v797_v55 = vld [vmem:[#allocation10 + $0x28] sm:$0xff]  ;;  %v527_v56 = vld [vmem:[%s8198_s26 + $0x18] sm:$0xff]  ;;  %v528_v57 = vld [vmem:[%s8198_s26 + $0x20] sm:$0xff] }
 0x13d   : > { %v6657_v58 = vpack.c.bf16 %v797_v55, %v796_v54  ;;  %v798_v59 = vld [vmem:[#allocation10 + $0x30] sm:$0xff]  ;;  %v799_v60 = vld [vmem:[#allocation10 + $0x38] sm:$0xff]  ;;  %v529_v61 = vld [vmem:[%s8198_s26 + $0x28] sm:$0xff] }
 0x13e   : > { %v530_v62 = vld [vmem:[%s8198_s26 + $0x30] sm:$0xff]  ;;  %v6661_v63 = vpack.c.bf16 %v799_v60, %v798_v59  ;;  %v800_v0 = vld [vmem:[#allocation10 + $0x40] sm:$0xff]  ;;  %v801_v1 = vld [vmem:[#allocation10 + $0x48] sm:$0xff] }
 0x13f   : > { %6600 = vmatpush3.bf16.msra.mxu0 %v6597_v12  ;;  %6628 = vmatpush3.bf16.msra.mxu1 %v6625_v26  ;;  %v531_v2 = vld [vmem:[%s8198_s26 + $0x38] sm:$0xff]  ;;  %v6665_v3 = vpack.c.bf16 %v801_v1, %v800_v0  ;;  %v8237_v4 = vld [vmem:[%s8206_s4] sm:$0xff]  ;;  %v802_v5 = vld [vmem:[#allocation10 + $0x50] sm:$0xff] }
 0x140   : > { %6602 = vmatprep.subr.bf16.mxu0 %v6601_v22  ;;  %6630 = vmatprep.subr.bf16.mxu1 %v6629_v32  ;;  %v803_v6 = vld [vmem:[#allocation10 + $0x58] sm:$0xff]  ;;  %v804_v8 = vld [vmem:[#allocation10 + $0x60] sm:$0xff]  ;;  %v805_v9 = vld [vmem:[#allocation10 + $0x68] sm:$0xff] }
 0x141   : > { %v6669_v7 = vpack.c.bf16 %v803_v6, %v802_v5  ;;  %v6673_v10 = vpack.c.bf16 %v805_v9, %v804_v8  ;;  %v806_v11 = vld [vmem:[#allocation10 + $0x70] sm:$0xff]  ;;  %v807_v12 = vld [vmem:[#allocation10 + $0x78] sm:$0xff]  ;;  %v8241_v14 = vld [vmem:[%s8206_s4 + $0x8] sm:$0xff]  ;;  %v810_v5 = vsub.s32 2, %v8268_v28 }
 0x142   : > { %v6677_v13 = vpack.c.bf16 %v807_v12, %v806_v11  ;;  %v8244_v15 = vld [vmem:[%s8206_s4 + $0x10] sm:$0xff]  ;;  %v682_v17 = vld [vmem:[#allocation8 + $0x78] sm:$0xff]  ;;  %v8253_v20 = vld [vmem:[%s8206_s4 + $0x20] sm:$0xff] }
 0x143   : > { %6604 = vmatpush3.bf16.msra.mxu0 %v6601_v22  ;;  %6632 = vmatpush3.bf16.msra.mxu1 %v6629_v32  ;;  %v681_v16 = vld [vmem:[#allocation8 + $0x70] sm:$0xff]  ;;  %v8249_v18 = vld [vmem:[%s8206_s4 + $0x18] sm:$0xff]  ;;  %v8257_v21 = vld [vmem:[%s8206_s4 + $0x28] sm:$0xff] }
 0x144   : > { %6606 = vmatprep.subr.bf16.mxu0 %v6605_v29  ;;  %6634 = vmatprep.subr.bf16.mxu1 %v6633_v38  ;;  %v6645_v19 = vpack.c.bf16 %v682_v17, %v681_v16  ;;  %v8261_v22 = vld [vmem:[%s8206_s4 + $0x30] sm:$0xff]  ;;  %v8265_v23 = vld [vmem:[%s8206_s4 + $0x38] sm:$0xff]  ;;  %v917_v24 = vld [vmem:[#allocation11] sm:$0xff]  ;;  %s7801_s4 = smov [#allocation17]  }
 0x145   : > { %v918_v25 = vld [vmem:[#allocation11 + $0x8] sm:$0xff]  ;;  %v8274_v30 = vld [vmem:[%s9159_s22] sm:$0xff]  ;;  %v919_v33 = vld [vmem:[#allocation11 + $0x10] sm:$0xff]  ;;  %s7703_s30 = sshll.u32 %s7801_s4, 4  ;;  %s7704_s30 = int_to_ptr.vmem [resolvable:$false] %s7703_s30 }
 0x146   : > { %v6681_v26 = vpack.c.bf16 %v918_v25, %v917_v24  ;;  %v920_v34 = vld [vmem:[#allocation11 + $0x18] sm:$0xff]  ;;  %v921_v40 = vld [vmem:[#allocation11 + $0x20] sm:$0xff]  ;;  %v926_v55 = vld [vmem:[#allocation11 + $0x48] sm:$0xff]  ;;  %s7705_s6 = scalar_lea.vmem %s7704_s30, 2048  ;;  %p7706_p4 = scmp.lt.s32.totalorder %s9058_s0, %s7704_s30 }
 0x147   : > { %6608 = vmatpush3.bf16.msra.mxu0 %v6605_v29  ;;  %6636 = vmatpush3.bf16.msra.mxu1 %v6633_v38  ;;  %v560_v29 = vsub.s32 0, %v8268_v28  ;;  %v6685_v38 = vpack.c.bf16 %v920_v34, %v919_v33  ;;  %v924_v48 = vld [vmem:[#allocation11 + $0x38] sm:$0xff]  ;;  %v925_v54 = vld [vmem:[#allocation11 + $0x40] sm:$0xff]  ;;  %v927_v60 = vld [vmem:[#allocation11 + $0x50] sm:$0xff]  ;;  %p7707_p8 = scmp.lt.s32.totalorder %s7705_s6, %s7699_s18 }
 0x148   : > { %6610 = vmatprep.subr.bf16.mxu0 %v6609_v35  ;;  %6638 = vmatprep.subr.bf16.mxu1 %v6637_v44  ;;  %v6697_v59 = vpack.c.bf16 %v926_v55, %v925_v54  ;;  %v930_v0 = vld [vmem:[#allocation11 + $0x68] sm:$0xff]  ;;  %vm8310_vm1 = vmpackc.low %vm1058_vm0, %vm1058_vm0 }
 0x149   : > { %v561_v31 = vrot.slane %v8274_v30, %v560_v29  ;;  %p7708_p11 = por %p7707_p8, %p7706_p4 }
 0x14b   : > { %6612 = vmatpush3.bf16.msra.mxu0 %v6609_v35  ;;  %6640 = vmatpush3.bf16.msra.mxu1 %v6637_v44  ;;  %p7709_p3 = pnand %p7708_p11, %p7702_p9 }
 0x14c   : > { %6614 = vmatprep.subr.bf16.mxu0 %v6613_v41  ;;  %6642 = vmatprep.subr.bf16.mxu1 %v6641_v50 }
 0x14f   : > { %6616 = vmatpush3.bf16.msra.mxu0 %v6613_v41  ;;  %6644 = vmatpush3.bf16.msra.mxu1 %v6641_v50  ;;  %v922_v41 = vld [vmem:[#allocation11 + $0x28] sm:$0xff] }
 0x150   : > { %6650 = vmatprep.subr.bf16.mxu0 %v6649_v47  ;;  %6646 = vmatprep.subr.bf16.mxu1 %v6645_v19  ;;  %v6689_v45 = vpack.c.bf16 %v922_v41, %v921_v40 }
 0x152   : > { %6050 = vmatmul.mubr.f32.vlgmr.msra.gmra.mrb[0].mxu0 %v525_v51 }
 0x153   : > { %6052 = vmatprep.mubr.f32.mxu0 %v526_v52  ;;  %6652 = vmatpush3.bf16.msra.mxu0 %v6649_v47  ;;  %v923_v47 = vld [vmem:[#allocation11 + $0x30] sm:$0xff] }
 0x154   : > { %6654 = vmatprep.subr.bf16.mxu0 %v6653_v53  ;;  %6648 = vmatpush3.bf16.msra.mxu1 %v6645_v19  ;;  %v6693_v52 = vpack.c.bf16 %v924_v48, %v923_v47 }
 0x155   : > { %6682 = vmatprep.subr.bf16.mxu1 %v6681_v26 }
 0x156   : > { %6053 = vmatmul.mubr.f32.gmra.mrb[2].mxu0 %v527_v56 }
 0x157   : > { %6055 = vmatprep.mubr.f32.mxu0 %v528_v57  ;;  %6656 = vmatpush3.bf16.msra.mxu0 %v6653_v53 }
 0x158   : > { %6658 = vmatprep.subr.bf16.mxu0 %v6657_v58 }
 0x15a   : > { %6056 = vmatmul.mubr.f32.gmra.mrb[4].mxu0 %v529_v61  ;;  %v928_v61 = vld [vmem:[#allocation11 + $0x58] sm:$0xff] }
 0x15b   : > { %6058 = vmatprep.mubr.f32.mxu0 %v530_v62  ;;  %6660 = vmatpush3.bf16.msra.mxu0 %v6657_v58  ;;  %v6701_v62 = vpack.c.bf16 %v928_v61, %v927_v60  ;;  %v935_v61 = vsub.s32 3, %v8268_v28 }
 0x15c   : > { %6662 = vmatprep.subr.bf16.mxu0 %v6661_v63 }
 0x15e   : > { %6059 = vmatmul.mubr.f32.gmra.mrb[6].mxu0 %v531_v2  ;;  %v931_v2 = vld [vmem:[#allocation11 + $0x70] sm:$0xff] }
 0x15f   : > { %6664 = vmatpush3.bf16.msra.mxu0 %v6661_v63  ;;  %6137 = vmatprep.mubr.f32.mxu0 %v8237_v4  ;;  %v929_v63 = vld [vmem:[#allocation11 + $0x60] sm:$0xff] }
 0x160   : > { %6666 = vmatprep.subr.bf16.mxu0 %v6665_v3  ;;  %v6705_v1 = vpack.c.bf16 %v930_v0, %v929_v63 }
 0x163   : > { %6668 = vmatpush3.bf16.msra.mxu0 %v6665_v3  ;;  %v932_v3 = vld [vmem:[#allocation11 + $0x78] sm:$0xff] }
 0x164   : > { %6670 = vmatprep.subr.bf16.mxu0 %v6669_v7  ;;  %v6709_v6 = vpack.c.bf16 %v932_v3, %v931_v2 }
 0x167   : > { %6672 = vmatpush3.bf16.msra.mxu0 %v6669_v7  ;;  %v811_v7 = vrot.slane %v8274_v30, %v810_v5 }
 0x168   : > { %6674 = vmatprep.subr.bf16.mxu0 %v6673_v10 }
 0x16b   : > { %6676 = vmatpush3.bf16.msra.mxu0 %v6673_v10 }
 0x16c   : > { %6678 = vmatprep.subr.bf16.mxu0 %v6677_v13 }
 0x16f   : > { %6680 = vmatpush3.bf16.msra.mxu0 %v6677_v13 }
 0x172   : > { %6138 = vmatmul.mubr.f32.vlgmr.msra.gmra.mrb[8].mxu0 %v8241_v14 }
 0x173   : > { %6140 = vmatprep.mubr.f32.mxu0 %v8244_v15 }
 0x176   : > { %6141 = vmatmul.mubr.f32.gmra.mrb[10].mxu0 %v8249_v18 }
 0x177   : > { %6143 = vmatprep.mubr.f32.mxu0 %v8253_v20 }
 0x17a   : > { %6144 = vmatmul.mubr.f32.gmra.mrb[12].mxu0 %v8257_v21 }
 0x17b   : > { %6146 = vmatprep.mubr.f32.mxu0 %v8261_v22 }
 0x17e   : > { %6147 = vmatmul.mubr.f32.gmra.mrb[14].mxu0 %v8265_v23 }
 0x225   : > { %v6051_v32 = vpop.f32.mrb[0].mxu0 }
 0x226   : > { %v628_v35 = vpop.f32.mrb[1].mxu0  ;;  %v8281_v37 = vadd.f32 %v6051_v32, %v561_v31 }
 0x227   : > { %v8279_v36 = vadd.f32 %v628_v35, %v561_v31  ;;  %v685_v35 = vsub.s32 1, %v8268_v28 }
 0x229   : > { %v6054_v39 = vpop.f32.mrb[2].mxu0  ;;  %6093 = vmatprep.mubr.f32.mxu1 %v8279_v36 }
 0x22a   : > { %v8284_v42 = vadd.f32 %v6054_v39, %v561_v31  ;;  %v638_v43 = vpop.f32.mrb[3].mxu0  ;;  %6094 = vmatmul.mubr.f32.vlgmr.msra.gmra.mrb[0].mxu1 %v8281_v37 }
 0x22b   : > { %v8287_v44 = vadd.f32 %v638_v43, %v561_v31  ;;  %6684 = vmatpush3.bf16.msra.mxu1 %v6681_v26 }
 0x22c   : > { %6686 = vmatprep.subr.bf16.mxu1 %v6685_v38 }
 0x22d   : > { %v6057_v46 = vpop.f32.mrb[4].mxu0  ;;  %6096 = vmatprep.mubr.f32.mxu1 %v8287_v44 }
 0x22e   : > { %v8290_v49 = vadd.f32 %v6057_v46, %v561_v31  ;;  %v648_v50 = vpop.f32.mrb[5].mxu0  ;;  %6097 = vmatmul.mubr.f32.gmra.mrb[2].mxu1 %v8284_v42 }
 0x22f   : > { %v8293_v51 = vadd.f32 %v648_v50, %v561_v31  ;;  %6688 = vmatpush3.bf16.msra.mxu1 %v6685_v38  ;;  %v686_v38 = vrot.slane %v8274_v30, %v685_v35 }
 0x230   : > { %6690 = vmatprep.subr.bf16.mxu1 %v6689_v45 }
 0x231   : > { %6099 = vmatprep.mubr.f32.mxu1 %v8293_v51  ;;  %v6060_v53 = vpop.f32.mrb[6].mxu0 }
 0x232   : > { %v8296_v56 = vadd.f32 %v6060_v53, %v561_v31  ;;  %6100 = vmatmul.mubr.f32.gmra.mrb[4].mxu1 %v8290_v49  ;;  %v658_v57 = vpop.f32.mrb[7].mxu0 }
 0x233   : > { %v8299_v58 = vadd.f32 %v658_v57, %v561_v31  ;;  %6692 = vmatpush3.bf16.msra.mxu1 %v6689_v45 }
 0x234   : > { %6694 = vmatprep.subr.bf16.mxu1 %v6693_v52 }
 0x235   : > { %6102 = vmatprep.mubr.f32.mxu1 %v8299_v58 }
 0x236   : > { %6103 = vmatmul.mubr.f32.gmra.mrb[6].mxu1 %v8296_v56 }
 0x237   : > { %6696 = vmatpush3.bf16.msra.mxu1 %v6693_v52  ;;  %6181 = vmatprep.mubr.f32.mxu1 %v8237_v4 }
 0x238   : > { %6698 = vmatprep.subr.bf16.mxu1 %v6697_v59 }
 0x23b   : > { %6700 = vmatpush3.bf16.msra.mxu1 %v6697_v59 }
 0x23c   : > { %6702 = vmatprep.subr.bf16.mxu1 %v6701_v62 }
 0x23f   : > { %6704 = vmatpush3.bf16.msra.mxu1 %v6701_v62  ;;  %v936_v62 = vrot.slane %v8274_v30, %v935_v61 }
 0x240   : > { %6706 = vmatprep.subr.bf16.mxu1 %v6705_v1 }
 0x243   : > { %6708 = vmatpush3.bf16.msra.mxu1 %v6705_v1 }
 0x244   : > { %6710 = vmatprep.subr.bf16.mxu1 %v6709_v6 }
 0x245   : > { %v6139_v4 = vpop.f32.mrb[8].mxu0 }
 0x246   : > { %v884_v8 = vadd.f32 %v6139_v4, %v811_v7  ;;  %v878_v9 = vpop.f32.mrb[9].mxu0 }
 0x247   : > { %6712 = vmatpush3.bf16.msra.mxu1 %v6709_v6  ;;  %v879_v10 = vadd.f32 %v878_v9, %v811_v7 }
 0x249   : > { %v6713_v12 = vpack.c.bf16 %v884_v8, %v879_v10  ;;  %v6142_v13 = vpop.f32.mrb[10].mxu0 }
 0x24a   : > { %6182 = vmatmul.mubr.f32.vlgmr.msra.gmra.mrb[8].mxu1 %v8241_v14  ;;  %v8325_v14 = vpack.i.bf16 %v884_v8, %v879_v10  ;;  %v894_v16 = vadd.f32 %v6142_v13, %v811_v7 }
 0x24b   : > { %6184 = vmatprep.mubr.f32.mxu1 %v8244_v15  ;;  %6715 = vmatprep.subr.msk.bf16.mxu1 %vm8310_vm1, %v6713_v12  ;;  %v888_v15 = vpop.f32.mrb[11].mxu0 }
 0x24c   : > { %v889_v17 = vadd.f32 %v888_v15, %v811_v7 }
 0x24d   : > { %v6145_v19 = vpop.f32.mrb[12].mxu0 }
 0x24e   : > { %6185 = vmatmul.mubr.f32.gmra.mrb[10].mxu1 %v8249_v18  ;;  %v904_v24 = vadd.f32 %v6145_v19, %v811_v7  ;;  %v898_v18 = vpop.f32.mrb[13].mxu0  ;;  %v8327_v26 = vpack.i.bf16 %v894_v16, %v889_v17 }
 0x24f   : > { %6187 = vmatprep.mubr.f32.mxu1 %v8253_v20  ;;  %v899_v25 = vadd.f32 %v898_v18, %v811_v7  ;;  %v6719_v20 = vpack.c.bf16 %v894_v16, %v889_v17 }
 0x250   : > { %6718 = vmatpush3.bf16.xpose.msk.msra.mxu1 %vm8310_vm1, %v6713_v12 }
 0x251   : > { %6721 = vmatprep.subr.msk.bf16.mxu1 %vm8310_vm1, %v6719_v20  ;;  %v8335_v32 = vpack.i.bf16 %v904_v24, %v899_v25 }
 0x252   : > { %6188 = vmatmul.mubr.f32.gmra.mrb[12].mxu1 %v8257_v21  ;;  %v6725_v21 = vpack.c.bf16 %v904_v24, %v899_v25 }
 0x253   : > { %6190 = vmatprep.mubr.f32.mxu1 %v8261_v22  ;;  %v6148_v22 = vpop.f32.mrb[14].mxu0 }
 0x254   : > { %6727 = vmatprep.subr.msk.bf16.mxu0 %vm8310_vm1, %v6725_v21  ;;  %v908_v27 = vpop.f32.mrb[15].mxu0 }
 0x255   : > { %6730 = vmatpush3.bf16.xpose.msk.msra.mxu0 %vm8310_vm1, %v6725_v21  ;;  %v909_v31 = vadd.f32 %v908_v27, %v811_v7 }
 0x256   : > { %6191 = vmatmul.mubr.f32.gmra.mrb[14].mxu1 %v8265_v23  ;;  %v914_v23 = vadd.f32 %v6148_v22, %v811_v7 }
 0x258   : > { %v6731_v33 = vpack.c.bf16 %v914_v23, %v909_v31  ;;  %v8337_v34 = vpack.i.bf16 %v914_v23, %v909_v31 }
 0x2fd   : > { %v6095_v39 = vpop.f32.mrb[0].mxu1 }
 0x2fe   : > { %v753_v40 = vpop.f32.mrb[1].mxu1  ;;  %v8345_v43 = vadd.f32 %v6095_v39, %v686_v38 }
 0x2ff   : > { %v8343_v41 = vadd.f32 %v753_v40, %v686_v38 }
 0x301   : > { %v6098_v45 = vpop.f32.mrb[2].mxu1  ;;  %6197 = vmatprep.mubr.msk.f32.mxu1 %vm1058_vm0, %v8343_v41 }
 0x302   : > { %v763_v46 = vpop.f32.mrb[3].mxu1  ;;  %6198 = vmatmul.mubr.msk.f32.vlgmr.msra.gmra.mrb[16].mxu1 %vm1058_vm0, %v8345_v43  ;;  %v8363_v54 = vadd.f32 %v6098_v45, %v686_v38 }
 0x303   : > { %v8351_v47 = vadd.f32 %v763_v46, %v686_v38  ;;  %6724 = vmatpush3.bf16.xpose.msk.msra.mxu1 %vm8310_vm1, %v6719_v20 }
 0x304   : > { %6733 = vmatprep.subr.msk.bf16.mxu1 %vm8310_vm1, %v6731_v33 }
 0x305   : > { %v6101_v48 = vpop.f32.mrb[4].mxu1  ;;  %6204 = vmatprep.mubr.msk.f32.mxu1 %vm1058_vm0, %v8351_v47 }
 0x306   : > { %v8359_v50 = vadd.f32 %v6101_v48, %v686_v38  ;;  %v773_v52 = vpop.f32.mrb[5].mxu1 }
 0x307   : > { %v8361_v53 = vadd.f32 %v773_v52, %v686_v38 }
 0x309   : > { %6211 = vmatprep.mubr.msk.f32.mxu0 %vm1058_vm0, %v8361_v53  ;;  %v6104_v55 = vpop.f32.mrb[6].mxu1 }
 0x30a   : > { %6205 = vmatmul.mubr.msk.f32.vlgmr.msra.gmra.mrb[18].mxu1 %vm1058_vm0, %v8363_v54  ;;  %6212 = vmatmul.mubr.msk.f32.vlgmr.msra.gmra.mrb[16].mxu0 %vm1058_vm0, %v8359_v50  ;;  %v783_v57 = vpop.f32.mrb[7].mxu1  ;;  %v8377_v60 = vadd.f32 %v6104_v55, %v686_v38 }
 0x30b   : > { %6736 = vmatpush3.bf16.xpose.msk.msra.mxu1 %vm8310_vm1, %v6731_v33  ;;  %v8373_v59 = vadd.f32 %v783_v57, %v686_v38 }
 0x30d   : > { %6218 = vmatprep.mubr.msk.f32.mxu1 %vm1058_vm0, %v8373_v59 }
 0x312   : > { %6219 = vmatmul.mubr.msk.f32.vlgmr.msra.gmra.mrb[20].mxu1 %vm1058_vm0, %v8377_v60 }
 0x31d   : > { %v6183_v63 = vpop.f32.mrb[8].mxu1 }
 0x31e   : > { %v1009_v0 = vadd.f32 %v6183_v63, %v936_v62  ;;  %v1003_v1 = vpop.f32.mrb[9].mxu1 }
 0x31f   : > { %v1004_v2 = vadd.f32 %v1003_v1, %v936_v62 }
 0x321   : > { %v6186_v3 = vpop.f32.mrb[10].mxu1  ;;  %v6737_v6 = vpack.c.bf16 %v1009_v0, %v1004_v2  ;;  %v8386_v19 = vpack.i.bf16 %v1009_v0, %v1004_v2 }
 0x322   : > { %v1019_v7 = vadd.f32 %v6186_v3, %v936_v62  ;;  %v1013_v4 = vpop.f32.mrb[11].mxu1 }
 0x323   : > { %v1014_v8 = vadd.f32 %v1013_v4, %v936_v62  ;;  %6738 = vmatprep.subr.bf16.mxu0 %v6737_v6 }
 0x324   : > { %6740 = vmatpush3.bf16.msra.mxu0 %v6737_v6 }
 0x325   : > { %v6189_v9 = vpop.f32.mrb[12].mxu1  ;;  %v6741_v10 = vpack.c.bf16 %v1019_v7, %v1014_v8  ;;  %v8388_v24 = vpack.i.bf16 %v1019_v7, %v1014_v8 }
 0x326   : > { %v1029_v12 = vadd.f32 %v6189_v9, %v936_v62  ;;  %v1023_v13 = vpop.f32.mrb[13].mxu1 }
 0x327   : > { %v1024_v15 = vadd.f32 %v1023_v13, %v936_v62  ;;  %6742 = vmatprep.subr.bf16.mxu1 %v6741_v10 }
 0x328   : > { %6744 = vmatpush3.bf16.msra.mxu1 %v6741_v10 }
 0x329   : > { %v6192_v16 = vpop.f32.mrb[14].mxu1  ;;  %v8383_v30 = vpack.c.bf16 %v1029_v12, %v1024_v15  ;;  %v8390_v20 = vpack.i.bf16 %v1029_v12, %v1024_v15 }
 0x32a   : > { %v1033_v17 = vpop.f32.mrb[15].mxu1  ;;  %v1039_v18 = vadd.f32 %v6192_v16, %v936_v62 }
 0x32b   : > { %6746 = vmatprep.subr.bf16.mxu0 %v8383_v30  ;;  %v1034_v25 = vadd.f32 %v1033_v17, %v936_v62 }
 0x32d   : > { %v8392_v21 = vpack.c.bf16 %v1039_v18, %v1034_v25  ;;  %v8394_v22 = vpack.i.bf16 %v1039_v18, %v1034_v25 }
 0x32f   : > { %6750 = vmatprep.subr.bf16.mxu1 %v8392_v21 }
 0x3d5   : > { %v8397_v23 = vpop.f32.mrb[16].mxu1 }
 0x3d6   : > { %v8399_v27 = vpop.f32.mrb[17].mxu1 }
 0x3d7   : > { %v1408_v25 = vsel %vm1407_vm2, %v8399_v27, -inf }
 0x3dd   : > { %v6206_v31 = vpop.f32.mrb[18].mxu1  ;;  %v8401_v33 = vpop.f32.mrb[16].mxu0 }
 0x3de   : > { %v1224_v38 = vpop.f32.mrb[19].mxu1  ;;  %v8403_v39 = vpop.f32.mrb[17].mxu0  ;;  %v1417_v45 = vsel %vm1407_vm2, %v6206_v31, -inf }
 0x3df   : > { %v1414_v40 = vsel %vm1407_vm2, %v1224_v38, -inf }
 0x3e0   : > { %1415 = vmax.xlane.f32.xlu0 %v1414_v40  ;;  %v1411_v40 = vsel %vm1407_vm2, %v8397_v23, -inf }
 0x3e4   : > { %1418 = vmax.xlane.f32.xlu0 %v1417_v45 }
 0x3e5   : > { %v6220_v46 = vpop.f32.mrb[20].mxu1 }
 0x3e6   : > { %v1398_v48 = vpop.f32.mrb[21].mxu1  ;;  %v1429_v55 = vsel %vm1407_vm2, %v6220_v46, -inf }
 0x3e7   : > { %v1426_v52 = vsel %vm1407_vm2, %v1398_v48, -inf }
 0x3e8   : > { %1427 = vmax.xlane.f32.xlu1 %v1426_v52 }
 0x3ec   : > { %1430 = vmax.xlane.f32.xlu1 %v1429_v55 }
 0x46d   : > { %v1416_v57 = vpop.xlane.xlu0 %1415 }
 0x46e   : > { %v1434_v61 = vsub.f32 %v1224_v38, %v1416_v57  ;;  %v1423_v38 = vsel %vm1407_vm2, %v8401_v33, -inf }
 0x470   : > { %v1444_v62 = vmul.f32 1.442695, %v1434_v61 }
 0x471   : > { %v1419_v63 = vpop.xlane.xlu0 %1418 }
 0x472   : > { %7242 = vpow2.f32 %v1444_v62  ;;  %v1435_v0 = vsub.f32 %v6206_v31, %v1419_v63  ;;  %v1420_v31 = vsel %vm1407_vm2, %v8403_v39, -inf }
 0x474   : > { %v1446_v1 = vmul.f32 1.442695, %v1435_v0 }
 0x475   : > { %v1428_v2 = vpop.xlane.xlu1 %1427 }
 0x476   : > { %7244 = vpow2.f32 %v1446_v1  ;;  %v1438_v3 = vsub.f32 %v1398_v48, %v1428_v2 }
 0x478   : > { %v1452_v6 = vmul.f32 1.442695, %v1438_v3 }
 0x479   : > { %v1431_v7 = vpop.xlane.xlu1 %1430 }
 0x47a   : > { %7246 = vpow2.f32 %v1452_v6  ;;  %v1439_v4 = vsub.f32 %v6220_v46, %v1431_v7 }
 0x47c   : > { %v7243_v8 = vpop.eup %7242  ;;  %v1454_v9 = vmul.f32 1.442695, %v1439_v4 }
 0x47d   : > { %v1462_v10 = vsel %vm1407_vm2, %v7243_v8, 0.0 }
 0x47e   : > { %7248 = vpow2.f32 %v1454_v9  ;;  %1463 = vadd.xlane.f32.xlu0 %v1462_v10 }
 0x480   : > { %v7245_v12 = vpop.eup %7244 }
 0x481   : > { %v1465_v13 = vsel %vm1407_vm2, %v7245_v12, 0.0 }
 0x482   : > { %1466 = vadd.xlane.f32.xlu1 %v1465_v13 }
 0x484   : > { %v7247_v15 = vpop.eup %7246 }
 0x485   : > { %v1474_v16 = vsel %vm1407_vm2, %v7247_v15, 0.0 }
 0x486   : > { %1475 = vadd.xlane.f32.xlu0 %v1474_v16 }
 0x488   : > { %v7249_v17 = vpop.eup %7248 }
 0x489   : > { %v1477_v18 = vsel %vm1407_vm2, %v7249_v17, 0.0 }
 0x48a   : > { %1478 = vadd.xlane.f32.xlu1 %v1477_v18 }
 0x49b   : > { %1911 = vrot.lane.b32.xlu1 %v8351_v47, %s7798_s2 }
 0x49c   : > { %7123 = vrot.lane.b32.xlu0 %v8327_v26, %s7798_s2 }
 0x49f   : > { %7128 = vrot.lane.b32.xlu1 %v8337_v34, %s7798_s2 }
 0x4a0   : > { %2093 = vrot.lane.b32.xlu0 %v8373_v59, %s7798_s2 }
 0x4a3   : > { %1913 = vrot.lane.b32.xlu1 %v8363_v54, %s7798_s2 }
 0x4a7   : > { %2095 = vrot.lane.b32.xlu1 %v8377_v60, %s7798_s2 }
 0x4bf   : > { %1409 = vmax.xlane.f32.xlu0 %v1408_v25 }
 0x4c3   : > { %1421 = vmax.xlane.f32.xlu0 %v1420_v31 }
 0x4c7   : > { %1424 = vmax.xlane.f32.xlu0 %v1423_v38 }
 0x4cb   : > { %1412 = vmax.xlane.f32.xlu1 %v1411_v40 }
 0x50b   : > { %v1464_v45 = vpop.xlane.xlu0 %1463 }
 0x50c   : > { %7250 = vrcp.f32 %v1464_v45 }
 0x50f   : > { %v1467_v46 = vpop.xlane.xlu1 %1466 }
 0x510   : > { %7252 = vrcp.f32 %v1467_v46 }
 0x513   : > { %v1476_v48 = vpop.xlane.xlu0 %1475 }
 0x514   : > { %7254 = vrcp.f32 %v1476_v48 }
 0x516   : > { %v7251_v52 = vpop.eup %7250 }
 0x517   : > { %v7124_v55 = vpop.permute.xlu0 %7123  ;;  %v1479_v57 = vpop.xlane.xlu1 %1478  ;;  %v1490_v61 = vmul.f32 %v7251_v52, %v7243_v8 }
 0x518   : > { %7256 = vrcp.f32 %v1479_v57  ;;  %v7126_v62 = vunpack.i.h.bf16 %v7124_v55  ;;  %v7125_v63 = vunpack.i.l.bf16 %v7124_v55 }
 0x519   : > { %6232 = vmatprep.mubr.msk.f32.mxu1 %vm1407_vm2, %v1490_v61 }
 0x51a   : > { %v7253_v0 = vpop.eup %7252  ;;  %v6759_v3 = vpack.c.bf16 %v7126_v62, %v7125_v63 }
 0x51b   : > { %v1912_v1 = vpop.permute.xlu1 %1911  ;;  %v1491_v2 = vmul.f32 %v7253_v0, %v7245_v12  ;;  %v2094_v16 = vpop.permute.xlu0 %2093 }
 0x51d   : > { %6233 = vmatmul.mubr.msk.f32.vlgmr.msra.gmra.mrb[22].mxu1 %vm1407_vm2, %v1491_v2 }
 0x51e   : > { %v7255_v6 = vpop.eup %7254  ;;  %6752 = vmatpush3.bf16.msra.mxu1 %v8392_v21 }
 0x51f   : > { %6761 = vmatprep.subr.msk.bf16.mxu1 %vm8310_vm1, %v6759_v3  ;;  %v7129_v7 = vpop.permute.xlu1 %7128  ;;  %v1494_v4 = vmul.f32 %v7255_v6, %v7247_v15 }
 0x520   : > { %v7131_v9 = vunpack.i.h.bf16 %v7129_v7  ;;  %v7130_v10 = vunpack.i.l.bf16 %v7129_v7 }
 0x521   : > { %6246 = vmatprep.mubr.msk.f32.mxu1 %vm1407_vm2, %v1494_v4 }
 0x522   : > { %v7257_v8 = vpop.eup %7256  ;;  %v6771_v12 = vpack.c.bf16 %v7131_v9, %v7130_v10 }
 0x523   : > { %v1495_v13 = vmul.f32 %v7257_v8, %v7249_v17  ;;  %v1914_v21 = vpop.permute.xlu1 %1913 }
 0x525   : > { %6247 = vmatmul.mubr.msk.f32.vlgmr.msra.gmra.mrb[24].mxu1 %vm1407_vm2, %v1495_v13 }
 0x526   : > { %6260 = vmatprep.mubr.msk.f32.mxu1 %vm1058_vm0, %v1912_v1 }
 0x527   : > { %6764 = vmatpush3.bf16.xpose.msk.msra.mxu1 %vm8310_vm1, %v6759_v3  ;;  %v2096_v15 = vpop.permute.xlu1 %2095 }
 0x528   : > { %6773 = vmatprep.subr.msk.bf16.mxu1 %vm8310_vm1, %v6771_v12 }
 0x52e   : > { %6261 = vmatmul.mubr.msk.f32.vlgmr.msra.gmra.mrb[26].mxu1 %vm1058_vm0, %v1914_v21 }
 0x52f   : > { %6776 = vmatpush3.bf16.xpose.msk.msra.mxu1 %vm8310_vm1, %v6771_v12  ;;  %6274 = vmatprep.mubr.msk.f32.mxu1 %vm1058_vm0, %v2094_v16 }
 0x536   : > { %6275 = vmatmul.mubr.msk.f32.vlgmr.msra.gmra.mrb[28].mxu1 %vm1058_vm0, %v2096_v15 }
 0x54c   : > { %v1410_v17 = vpop.xlane.xlu0 %1409 }
 0x54d   : > { %v1432_v18 = vsub.f32 %v8399_v27, %v1410_v17 }
 0x54f   : > { %v1440_v25 = vmul.f32 1.442695, %v1432_v18 }
 0x550   : > { %v1422_v31 = vpop.xlane.xlu0 %1421 }
 0x551   : > { %7258 = vpow2.f32 %v1440_v25  ;;  %v1436_v38 = vsub.f32 %v8403_v39, %v1422_v31 }
 0x553   : > { %v1448_v40 = vmul.f32 1.442695, %v1436_v38 }
 0x554   : > { %v1425_v45 = vpop.xlane.xlu0 %1424 }
 0x555   : > { %7260 = vpow2.f32 %v1448_v40  ;;  %v1437_v46 = vsub.f32 %v8401_v33, %v1425_v45 }
 0x557   : > { %v1450_v57 = vmul.f32 1.442695, %v1437_v46 }
 0x558   : > { %v1413_v48 = vpop.xlane.xlu1 %1412 }
 0x559   : > { %v1433_v52 = vsub.f32 %v8397_v23, %v1413_v48 }
 0x55b   : > { %v7259_v55 = vpop.eup %7258  ;;  %v1442_v61 = vmul.f32 1.442695, %v1433_v52 }
 0x55c   : > { %v1456_v62 = vsel %vm1407_vm2, %v7259_v55, 0.0 }
 0x55d   : > { %7262 = vpow2.f32 %v1442_v61  ;;  %1457 = vadd.xlane.f32.xlu0 %v1456_v62 }
 0x55e   : > { %7264 = vpow2.f32 %v1450_v57 }
 0x55f   : > { %v7261_v27 = vpop.eup %7260 }
 0x560   : > { %v1468_v63 = vsel %vm1407_vm2, %v7261_v27, 0.0 }
 0x561   : > { %1469 = vadd.xlane.f32.xlu0 %v1468_v63 }
 0x567   : > { %v7263_v39 = vpop.eup %7262 }
 0x568   : > { %v1459_v0 = vsel %vm1407_vm2, %v7263_v39, 0.0  ;;  %v7265_v1 = vpop.eup %7264 }
 0x569   : > { %1460 = vadd.xlane.f32.xlu1 %v1459_v0  ;;  %v1471_v33 = vsel %vm1407_vm2, %v7265_v1, 0.0 }
 0x56d   : > { %1472 = vadd.xlane.f32.xlu1 %v1471_v33 }
 0x577   : > { %7133 = vrot.lane.b32.xlu0 %v8325_v14, %s7798_s2 }
 0x57b   : > { %2002 = vrot.lane.b32.xlu0 %v8361_v53, %s7798_s2 }
 0x57e   : > { %7138 = vrot.lane.b32.xlu1 %v8335_v32, %s7798_s2 }
 0x582   : > { %1820 = vrot.lane.b32.xlu1 %v8343_v41, %s7798_s2 }
 0x586   : > { %1822 = vrot.lane.b32.xlu1 %v8345_v43, %s7798_s2 }
 0x58a   : > { %2004 = vrot.lane.b32.xlu1 %v8359_v50, %s7798_s2 }
 0x5ea   : > { %v1458_v23 = vpop.xlane.xlu0 %1457 }
 0x5eb   : > { %7266 = vrcp.f32 %v1458_v23 }
 0x5ee   : > { %v1470_v6 = vpop.xlane.xlu0 %1469 }
 0x5ef   : > { %7268 = vrcp.f32 %v1470_v6 }
 0x5f0   : > { %v8470_v2 = vpop.f32.mrb[22].mxu1 }
 0x5f1   : > { %v8472_v3 = vpop.f32.mrb[23].mxu1 }
 0x5f2   : > { %v7134_v12 = vpop.permute.xlu0 %7133 }
 0x5f3   : > { %v7136_v16 = vunpack.i.h.bf16 %v7134_v12  ;;  %v7135_v15 = vunpack.i.l.bf16 %v7134_v12 }
 0x5f5   : > { %v7267_v7 = vpop.eup %7266  ;;  %v6753_v48 = vpack.c.bf16 %v7136_v16, %v7135_v15 }
 0x5f6   : > { %v1461_v4 = vpop.xlane.xlu1 %1460  ;;  %v1488_v8 = vmul.f32 %v7267_v7, %v7259_v55  ;;  %v2003_v33 = vpop.permute.xlu0 %2002 }
 0x5f7   : > { %7270 = vrcp.f32 %v1461_v4 }
 0x5f8   : > { %6225 = vmatprep.mubr.msk.f32.mxu0 %vm1407_vm2, %v1488_v8  ;;  %v8475_v9 = vpop.f32.mrb[24].mxu1 }
 0x5f9   : > { %v8477_v10 = vpop.f32.mrb[25].mxu1  ;;  %v7269_v21 = vpop.eup %7268 }
 0x5fa   : > { %v1473_v13 = vpop.xlane.xlu1 %1472  ;;  %v1492_v46 = vmul.f32 %v7269_v21, %v7261_v27 }
 0x5fb   : > { %7272 = vrcp.f32 %v1473_v13 }
 0x5fe   : > { %v7139_v25 = vpop.permute.xlu1 %7138 }
 0x5ff   : > { %v7141_v61 = vunpack.i.h.bf16 %v7139_v25  ;;  %v7140_v62 = vunpack.i.l.bf16 %v7139_v25 }
 0x601   : > { %v7271_v17 = vpop.eup %7270  ;;  %v6262_v18 = vpop.f32.mrb[26].mxu1  ;;  %v6765_v0 = vpack.c.bf16 %v7141_v61, %v7140_v62 }
 0x602   : > { %v1993_v31 = vpop.f32.mrb[27].mxu1  ;;  %v2193_v38 = vsel %vm1407_vm2, %v6262_v18, -inf  ;;  %v1489_v40 = vmul.f32 %v7271_v17, %v7263_v39  ;;  %v1821_v57 = vpop.permute.xlu1 %1820 }
 0x603   : > { %2194 = vmax.xlane.f32.xlu1 %v2193_v38  ;;  %v2190_v45 = vsel %vm1407_vm2, %v1993_v31, -inf }
 0x604   : > { %2191 = vmax.xlane.f32.xlu0 %v2190_v45  ;;  %6226 = vmatmul.mubr.msk.f32.vlgmr.msra.gmra.mrb[18].mxu0 %vm1407_vm2, %v1489_v40 }
 0x605   : > { %v7273_v52 = vpop.eup %7272  ;;  %6748 = vmatpush3.bf16.msra.mxu0 %v8383_v30  ;;  %6239 = vmatprep.mubr.msk.f32.mxu0 %vm1407_vm2, %v1492_v46 }
 0x606   : > { %6755 = vmatprep.subr.msk.bf16.mxu0 %vm8310_vm1, %v6753_v48  ;;  %v1493_v55 = vmul.f32 %v7273_v52, %v7265_v1  ;;  %v1823_v1 = vpop.permute.xlu1 %1822 }
 0x608   : > { %6240 = vmatmul.mubr.msk.f32.vlgmr.msra.gmra.mrb[20].mxu0 %vm1407_vm2, %v1493_v55 }
 0x609   : > { %v6276_v63 = vpop.f32.mrb[28].mxu1  ;;  %6253 = vmatprep.mubr.msk.f32.mxu0 %vm1058_vm0, %v1821_v57 }
 0x60a   : > { %v2175_v27 = vpop.f32.mrb[29].mxu1  ;;  %v2205_v30 = vsel %vm1407_vm2, %v6276_v63, -inf  ;;  %v2005_v23 = vpop.permute.xlu1 %2004 }
 0x60b   : > { %v2202_v39 = vsel %vm1407_vm2, %v2175_v27, -inf }
 0x60c   : > { %2203 = vmax.xlane.f32.xlu0 %v2202_v39 }
 0x60e   : > { %6758 = vmatpush3.bf16.xpose.msk.msra.mxu0 %vm8310_vm1, %v6753_v48 }
 0x60f   : > { %6767 = vmatprep.subr.msk.bf16.mxu0 %vm8310_vm1, %v6765_v0 }
 0x610   : > { %2206 = vmax.xlane.f32.xlu0 %v2205_v30 }
 0x615   : > { %6254 = vmatmul.mubr.msk.f32.vlgmr.msra.gmra.mrb[22].mxu0 %vm1058_vm0, %v1823_v1 }
 0x616   : > { %6770 = vmatpush3.bf16.xpose.msk.msra.mxu0 %vm8310_vm1, %v6765_v0  ;;  %6267 = vmatprep.mubr.msk.f32.mxu0 %vm1058_vm0, %v2003_v33 }
 0x61d   : > { %6268 = vmatmul.mubr.msk.f32.vlgmr.msra.gmra.mrb[24].mxu0 %vm1058_vm0, %v2005_v23 }
 0x690   : > { %v2195_v6 = vpop.xlane.xlu1 %2194 }
 0x691   : > { %v2211_v7 = vsub.f32 %v6262_v18, %v2195_v6  ;;  %v2192_v4 = vpop.xlane.xlu0 %2191 }
 0x692   : > { %v2210_v8 = vsub.f32 %v1993_v31, %v2192_v4 }
 0x693   : > { %v2222_v13 = vmul.f32 1.442695, %v2211_v7 }
 0x694   : > { %v2220_v12 = vmul.f32 1.442695, %v2210_v8 }
 0x695   : > { %7274 = vpow2.f32 %v2222_v13 }
 0x696   : > { %7276 = vpow2.f32 %v2220_v12 }
 0x699   : > { %v2204_v21 = vpop.xlane.xlu0 %2203 }
 0x69a   : > { %v2214_v16 = vsub.f32 %v2175_v27, %v2204_v21 }
 0x69c   : > { %v2228_v15 = vmul.f32 1.442695, %v2214_v16 }
 0x69d   : > { %v2207_v17 = vpop.xlane.xlu0 %2206 }
 0x69e   : > { %7278 = vpow2.f32 %v2228_v15  ;;  %v2215_v25 = vsub.f32 %v6276_v63, %v2207_v17 }
 0x69f   : > { %v8499_v38 = vpop.eup %7274 }
 0x6a0   : > { %v7277_v40 = vpop.eup %7276  ;;  %v2230_v45 = vmul.f32 1.442695, %v2215_v25  ;;  %v2241_v46 = vsel %vm1407_vm2, %v8499_v38, 0.0 }
 0x6a1   : > { %2242 = vadd.xlane.f32.xlu1 %v2241_v46  ;;  %v2238_v18 = vsel %vm1407_vm2, %v7277_v40, 0.0 }
 0x6a2   : > { %7280 = vpow2.f32 %v2230_v45  ;;  %2239 = vadd.xlane.f32.xlu0 %v2238_v18 }
 0x6a8   : > { %v7279_v31 = vpop.eup %7278 }
 0x6a9   : > { %v2250_v48 = vsel %vm1407_vm2, %v7279_v31, 0.0 }
 0x6aa   : > { %2251 = vadd.xlane.f32.xlu0 %v2250_v48 }
 0x6ac   : > { %v8505_v52 = vpop.eup %7280 }
 0x6ad   : > { %v2253_v55 = vsel %vm1407_vm2, %v8505_v52, 0.0 }
 0x6ae   : > { %2254 = vadd.xlane.f32.xlu1 %v2253_v55 }
 0x6bf   : > { %7148 = vrot.lane.b32.xlu1 %v8394_v22, %s7798_s2 }
 0x6c0   : > { %7143 = vrot.lane.b32.xlu0 %v8388_v24, %s7798_s2 }
 0x6c3   : > { %7153 = vrot.lane.b32.xlu1 %v8325_v14, %s7799_s29 }
 0x6c4   : > { %2886 = vrot.lane.b32.xlu0 %v8343_v41, %s7799_s29 }
 0x6c7   : > { %7158 = vrot.lane.b32.xlu1 %v8327_v26, %s7799_s29 }
 0x6c8   : > { %7163 = vrot.lane.b32.xlu0 %v8335_v32, %s7799_s29 }
 0x6cb   : > { %2888 = vrot.lane.b32.xlu1 %v8345_v43, %s7799_s29 }
 0x6cc   : > { %2979 = vrot.lane.b32.xlu0 %v8363_v54, %s7799_s29 }
 0x6cf   : > { %2977 = vrot.lane.b32.xlu1 %v8351_v47, %s7799_s29 }
 0x6d0   : > { %3068 = vrot.lane.b32.xlu0 %v8361_v53, %s7799_s29 }
 0x6d3   : > { %7168 = vrot.lane.b32.xlu1 %v8337_v34, %s7799_s29 }
 0x6d4   : > { %3159 = vrot.lane.b32.xlu0 %v8373_v59, %s7799_s29 }
 0x6d7   : > { %3070 = vrot.lane.b32.xlu1 %v8359_v50, %s7799_s29  ;;  %v8535_v57 = vpop.f32.mrb[18].mxu0 }
 0x6d8   : > { %v8537_v61 = vpop.f32.mrb[19].mxu0 }
 0x6db   : > { %3161 = vrot.lane.b32.xlu1 %v8377_v60, %s7799_s29  ;;  %v8541_v62 = vpop.f32.mrb[20].mxu0 }
 0x6dc   : > { %v8543_v63 = vpop.f32.mrb[21].mxu0 }
 0x6e8   : > { %v8545_v27 = vpop.f32.mrb[22].mxu0 }
 0x6e9   : > { %v8547_v39 = vpop.f32.mrb[23].mxu0  ;;  %v2187_v6 = vsel %vm1407_vm2, %v8545_v27, -inf }
 0x6ea   : > { %v2184_v1 = vsel %vm1407_vm2, %v8547_v39, -inf }
 0x6f0   : > { %v8549_v0 = vpop.f32.mrb[24].mxu0 }
 0x6f1   : > { %v8551_v30 = vpop.f32.mrb[25].mxu0  ;;  %v2199_v23 = vsel %vm1407_vm2, %v8549_v0, -inf }
 0x6f2   : > { %v2196_v33 = vsel %vm1407_vm2, %v8551_v30, -inf }
 0x6f3   : > { %2185 = vmax.xlane.f32.xlu0 %v2184_v1 }
 0x6f7   : > { %2197 = vmax.xlane.f32.xlu0 %v2196_v33 }
 0x6fb   : > { %2200 = vmax.xlane.f32.xlu0 %v2199_v23 }
 0x6ff   : > { %2188 = vmax.xlane.f32.xlu1 %v2187_v6 }
 0x72e   : > { %v2243_v4 = vpop.xlane.xlu1 %2242 }
 0x72f   : > { %v2240_v7 = vpop.xlane.xlu0 %2239 }
 0x730   : > { %7282 = vrcp.f32 %v2240_v7 }
 0x731   : > { %7284 = vrcp.f32 %v2243_v4 }
 0x737   : > { %v2252_v8 = vpop.xlane.xlu0 %2251 }
 0x738   : > { %7286 = vrcp.f32 %v2252_v8 }
 0x73a   : > { %v7283_v13 = vpop.eup %7282 }
 0x73b   : > { %v2255_v12 = vpop.xlane.xlu1 %2254  ;;  %v7144_v21 = vpop.permute.xlu0 %7143  ;;  %v2266_v16 = vmul.f32 %v7283_v13, %v7277_v40 }
 0x73c   : > { %7288 = vrcp.f32 %v2255_v12  ;;  %v7146_v15 = vunpack.i.h.bf16 %v7144_v21  ;;  %v7145_v17 = vunpack.i.l.bf16 %v7144_v21  ;;  %v7285_v45 = vpop.eup %7284 }
 0x73d   : > { %6288 = vmatprep.mubr.msk.f32.mxu1 %vm1407_vm2, %v2266_v16  ;;  %v2267_v1 = vmul.f32 %v7285_v45, %v8499_v38 }
 0x73e   : > { %v6781_v25 = vpack.c.bf16 %v7146_v15, %v7145_v17 }
 0x73f   : > { %v7149_v46 = vpop.permute.xlu1 %7148  ;;  %v2887_v21 = vpop.permute.xlu0 %2886 }
 0x740   : > { %v7151_v18 = vunpack.i.h.bf16 %v7149_v46  ;;  %v7150_v48 = vunpack.i.l.bf16 %v7149_v46  ;;  %6782 = vmatprep.subr.bf16.mxu1 %v6781_v25 }
 0x741   : > { %6784 = vmatpush3.bf16.msra.mxu1 %v6781_v25 }
 0x742   : > { %v7287_v55 = vpop.eup %7286  ;;  %v6789_v33 = vpack.c.bf16 %v7151_v18, %v7150_v48 }
 0x743   : > { %v7154_v23 = vpop.permute.xlu1 %7153  ;;  %v2270_v6 = vmul.f32 %v7287_v55, %v7279_v31  ;;  %v7164_v17 = vpop.permute.xlu0 %7163 }
 0x744   : > { %v7156_v7 = vunpack.i.h.bf16 %v7154_v23  ;;  %v7155_v40 = vunpack.i.l.bf16 %v7154_v23  ;;  %6289 = vmatmul.mubr.msk.f32.vlgmr.msra.gmra.mrb[30].mxu1 %vm1407_vm2, %v2267_v1  ;;  %6790 = vmatprep.subr.bf16.mxu1 %v6789_v33  ;;  %v7166_v25 = vunpack.i.h.bf16 %v7164_v17  ;;  %v7165_v45 = vunpack.i.l.bf16 %v7164_v17 }
 0x745   : > { %6792 = vmatpush3.bf16.msra.mxu1 %v6789_v33  ;;  %6302 = vmatprep.mubr.msk.f32.mxu1 %vm1407_vm2, %v2270_v6 }
 0x746   : > { %v7289_v4 = vpop.eup %7288  ;;  %v6809_v8 = vpack.c.bf16 %v7156_v7, %v7155_v40  ;;  %v6821_v46 = vpack.c.bf16 %v7166_v25, %v7165_v45 }
 0x747   : > { %v7159_v13 = vpop.permute.xlu1 %7158  ;;  %v2271_v12 = vmul.f32 %v7289_v4, %v8505_v52  ;;  %v2980_v48 = vpop.permute.xlu0 %2979 }
 0x748   : > { %6811 = vmatprep.subr.msk.bf16.mxu1 %vm8310_vm1, %v6809_v8  ;;  %v7161_v38 = vunpack.i.h.bf16 %v7159_v13  ;;  %v7160_v16 = vunpack.i.l.bf16 %v7159_v13 }
 0x749   : > { %6303 = vmatmul.mubr.msk.f32.vlgmr.msra.gmra.mrb[32].mxu1 %vm1407_vm2, %v2271_v12 }
 0x74a   : > { %6349 = vmatprep.mubr.msk.f32.mxu1 %vm1058_vm0, %v2887_v21  ;;  %v6815_v15 = vpack.c.bf16 %v7161_v38, %v7160_v16 }
 0x74b   : > { %v2889_v31 = vpop.permute.xlu1 %2888  ;;  %v3069_v33 = vpop.permute.xlu0 %3068 }
 0x74e   : > { %6814 = vmatpush3.bf16.xpose.msk.msra.mxu1 %vm8310_vm1, %v6809_v8 }
 0x74f   : > { %6817 = vmatprep.subr.msk.bf16.mxu1 %vm8310_vm1, %v6815_v15  ;;  %v2978_v52 = vpop.permute.xlu1 %2977  ;;  %v3160_v7 = vpop.permute.xlu0 %3159 }
 0x753   : > { %v7169_v18 = vpop.permute.xlu1 %7168 }
 0x754   : > { %v7171_v55 = vunpack.i.h.bf16 %v7169_v18  ;;  %v7170_v1 = vunpack.i.l.bf16 %v7169_v18 }
 0x755   : > { %6350 = vmatmul.mubr.msk.f32.vlgmr.msra.gmra.mrb[34].mxu1 %vm1058_vm0, %v2889_v31 }
 0x756   : > { %6820 = vmatpush3.bf16.xpose.msk.msra.mxu1 %vm8310_vm1, %v6815_v15  ;;  %6356 = vmatprep.mubr.msk.f32.mxu1 %vm1058_vm0, %v2978_v52  ;;  %v6827_v23 = vpack.c.bf16 %v7171_v55, %v7170_v1 }
 0x757   : > { %6823 = vmatprep.subr.msk.bf16.mxu1 %vm8310_vm1, %v6821_v46  ;;  %v3071_v6 = vpop.permute.xlu1 %3070 }
 0x75b   : > { %v3162_v40 = vpop.permute.xlu1 %3161 }
 0x75d   : > { %6357 = vmatmul.mubr.msk.f32.vlgmr.msra.gmra.mrb[36].mxu1 %vm1058_vm0, %v2980_v48 }
 0x75e   : > { %6826 = vmatpush3.bf16.xpose.msk.msra.mxu1 %vm8310_vm1, %v6821_v46  ;;  %6363 = vmatprep.mubr.msk.f32.mxu1 %vm1058_vm0, %v3069_v33 }
 0x75f   : > { %6829 = vmatprep.subr.msk.bf16.mxu1 %vm8310_vm1, %v6827_v23 }
 0x765   : > { %6364 = vmatmul.mubr.msk.f32.vlgmr.msra.gmra.mrb[38].mxu1 %vm1058_vm0, %v3071_v6 }
 0x766   : > { %6832 = vmatpush3.bf16.xpose.msk.msra.mxu1 %vm8310_vm1, %v6827_v23  ;;  %6370 = vmatprep.mubr.msk.f32.mxu1 %vm1058_vm0, %v3160_v7 }
 0x76d   : > { %6371 = vmatmul.mubr.msk.f32.vlgmr.msra.gmra.mrb[40].mxu1 %vm1058_vm0, %v3162_v40 }
 0x780   : > { %v2186_v4 = vpop.xlane.xlu0 %2185 }
 0x781   : > { %v2208_v8 = vsub.f32 %v8547_v39, %v2186_v4 }
 0x783   : > { %v2216_v13 = vmul.f32 1.442695, %v2208_v8 }
 0x784   : > { %v2198_v12 = vpop.xlane.xlu0 %2197 }
 0x785   : > { %7290 = vpow2.f32 %v2216_v13  ;;  %v2212_v21 = vsub.f32 %v8551_v30, %v2198_v12 }
 0x787   : > { %v2224_v38 = vmul.f32 1.442695, %v2212_v21 }
 0x788   : > { %v2201_v16 = vpop.xlane.xlu0 %2200 }
 0x789   : > { %7292 = vpow2.f32 %v2224_v38  ;;  %v2213_v31 = vsub.f32 %v8549_v0, %v2201_v16 }
 0x78b   : > { %v2226_v25 = vmul.f32 1.442695, %v2213_v31 }
 0x78c   : > { %v2189_v15 = vpop.xlane.xlu1 %2188 }
 0x78d   : > { %v2209_v17 = vsub.f32 %v8545_v27, %v2189_v15 }
 0x78f   : > { %v7291_v52 = vpop.eup %7290  ;;  %v2218_v45 = vmul.f32 1.442695, %v2209_v17 }
 0x790   : > { %v2232_v46 = vsel %vm1407_vm2, %v7291_v52, 0.0 }
 0x791   : > { %7294 = vpow2.f32 %v2218_v45  ;;  %2233 = vadd.xlane.f32.xlu0 %v2232_v46 }
 0x792   : > { %7296 = vpow2.f32 %v2226_v25 }
 0x793   : > { %v7293_v39 = vpop.eup %7292 }
 0x794   : > { %v2244_v18 = vsel %vm1407_vm2, %v7293_v39, 0.0 }
 0x795   : > { %2245 = vadd.xlane.f32.xlu0 %v2244_v18 }
 0x79b   : > { %v7295_v30 = vpop.eup %7294 }
 0x79c   : > { %v2235_v48 = vsel %vm1407_vm2, %v7295_v30, 0.0  ;;  %v7297_v55 = vpop.eup %7296 }
 0x79d   : > { %2236 = vadd.xlane.f32.xlu1 %v2235_v48  ;;  %v2247_v0 = vsel %vm1407_vm2, %v7297_v55, 0.0 }
 0x7a1   : > { %2248 = vadd.xlane.f32.xlu1 %v2247_v0 }
 0x7ab   : > { %7173 = vrot.lane.b32.xlu0 %v8386_v19, %s7798_s2 }
 0x7b2   : > { %7178 = vrot.lane.b32.xlu1 %v8390_v20, %s7798_s2 }
 0x817   : > { %v8603_v27 = vpop.f32.mrb[30].mxu1 }
 0x818   : > { %v8605_v1 = vpop.f32.mrb[31].mxu1 }
 0x81c   : > { %v8607_v33 = vpop.f32.mrb[32].mxu1 }
 0x81d   : > { %v8609_v23 = vpop.f32.mrb[33].mxu1 }
 0x81e   : > { %v2234_v6 = vpop.xlane.xlu0 %2233 }
 0x81f   : > { %7298 = vrcp.f32 %v2234_v6 }
 0x822   : > { %v2246_v7 = vpop.xlane.xlu0 %2245 }
 0x823   : > { %7300 = vrcp.f32 %v2246_v7 }
 0x826   : > { %v7174_v40 = vpop.permute.xlu0 %7173 }
 0x827   : > { %v7176_v4 = vunpack.i.h.bf16 %v7174_v40  ;;  %v7175_v8 = vunpack.i.l.bf16 %v7174_v40 }
 0x828   : > { %v8611_v13 = vpop.f32.mrb[34].mxu1 }
 0x829   : > { %v7299_v12 = vpop.eup %7298  ;;  %v6777_v21 = vpack.c.bf16 %v7176_v4, %v7175_v8  ;;  %v8613_v38 = vpop.f32.mrb[35].mxu1  ;;  %v3253_v16 = vsel %vm1407_vm2, %v8611_v13, -inf }
 0x82a   : > { %v2237_v31 = vpop.xlane.xlu1 %2236  ;;  %3254 = vmax.xlane.f32.xlu0 %v3253_v16  ;;  %v3250_v15 = vsel %vm1407_vm2, %v8613_v38, -inf  ;;  %v2264_v17 = vmul.f32 %v7299_v12, %v7291_v52 }
 0x82b   : > { %7302 = vrcp.f32 %v2237_v31  ;;  %6778 = vmatprep.subr.bf16.mxu0 %v6777_v21  ;;  %3251 = vmax.xlane.f32.xlu1 %v3250_v15 }
 0x82c   : > { %6780 = vmatpush3.bf16.msra.mxu0 %v6777_v21  ;;  %6281 = vmatprep.mubr.msk.f32.mxu0 %vm1407_vm2, %v2264_v17 }
 0x82d   : > { %v7301_v52 = vpop.eup %7300 }
 0x82e   : > { %v2249_v25 = vpop.xlane.xlu1 %2248  ;;  %v2268_v12 = vmul.f32 %v7301_v52, %v7293_v39  ;;  %v1049_v52 = vld [vmem:[#allocation13 + $0x38] sm:$0xff] }
 0x82f   : > { %7304 = vrcp.f32 %v2249_v25 }
 0x830   : > { %v6358_v45 = vpop.f32.mrb[36].mxu1 }
 0x831   : > { %v3059_v46 = vpop.f32.mrb[37].mxu1  ;;  %v3259_v18 = vsel %vm1407_vm2, %v6358_v45, -inf }
 0x832   : > { %v7179_v48 = vpop.permute.xlu1 %7178  ;;  %3260 = vmax.xlane.f32.xlu1 %v3259_v18  ;;  %v3256_v0 = vsel %vm1407_vm2, %v3059_v46, -inf }
 0x833   : > { %v7181_v6 = vunpack.i.h.bf16 %v7179_v48  ;;  %v7180_v7 = vunpack.i.l.bf16 %v7179_v48  ;;  %3257 = vmax.xlane.f32.xlu0 %v3256_v0  ;;  %v1046_v0 = vld [vmem:[#allocation13 + $0x20] sm:$0xff] }
 0x835   : > { %v7303_v40 = vpop.eup %7302  ;;  %v6785_v4 = vpack.c.bf16 %v7181_v6, %v7180_v7  ;;  %v1047_v6 = vld [vmem:[#allocation13 + $0x28] sm:$0xff] }
 0x836   : > { %v2265_v8 = vmul.f32 %v7303_v40, %v7295_v30  ;;  %v6793_v7 = vpack.c.bf16 %v1047_v6, %v1046_v0 }
 0x837   : > { %6786 = vmatprep.subr.bf16.mxu0 %v6785_v4 }
 0x838   : > { %6282 = vmatmul.mubr.msk.f32.vlgmr.msra.gmra.mrb[26].mxu0 %vm1407_vm2, %v2265_v8  ;;  %v6365_v21 = vpop.f32.mrb[38].mxu1  ;;  %v1043_v8 = vld [vmem:[#allocation13 + $0x8] sm:$0xff] }
 0x839   : > { %v7305_v16 = vpop.eup %7304  ;;  %6788 = vmatpush3.bf16.msra.mxu0 %v6785_v4  ;;  %6295 = vmatprep.mubr.msk.f32.mxu0 %vm1407_vm2, %v2268_v12  ;;  %v3150_v31 = vpop.f32.mrb[39].mxu1  ;;  %v3265_v15 = vsel %vm1407_vm2, %v6365_v21, -inf  ;;  %v1042_v4 = vld [vmem:[#allocation13] sm:$0xff] }
 0x83a   : > { %v2269_v17 = vmul.f32 %v7305_v16, %v7297_v55  ;;  %3266 = vmax.xlane.f32.xlu1 %v3265_v15  ;;  %v3262_v25 = vsel %vm1407_vm2, %v3150_v31, -inf  ;;  %6794 = vmatprep.subr.bf16.mxu0 %v6793_v7  ;;  %v1048_v55 = vld [vmem:[#allocation13 + $0x30] sm:$0xff]  ;;  %v8629_v12 = vpack.c.bf16 %v1043_v8, %v1042_v4 }
 0x83b   : > { %3263 = vmax.xlane.f32.xlu0 %v3262_v25  ;;  %v6797_v40 = vpack.c.bf16 %v1049_v52, %v1048_v55 }
 0x83c   : > { %6296 = vmatmul.mubr.msk.f32.vlgmr.msra.gmra.mrb[28].mxu0 %vm1407_vm2, %v2269_v17 }
 0x83d   : > { %6796 = vmatpush3.bf16.msra.mxu0 %v6793_v7 }
 0x83e   : > { %6798 = vmatprep.subr.bf16.mxu0 %v6797_v40 }
 0x840   : > { %v6372_v30 = vpop.f32.mrb[40].mxu1 }
 0x841   : > { %v3241_v18 = vpop.f32.mrb[41].mxu1  ;;  %v3271_v39 = vsel %vm1407_vm2, %v6372_v30, -inf  ;;  %6800 = vmatpush3.bf16.msra.mxu0 %v6797_v40 }
 0x842   : > { %3272 = vmax.xlane.f32.xlu1 %v3271_v39  ;;  %v3268_v48 = vsel %vm1407_vm2, %v3241_v18, -inf  ;;  %6802 = vmatprep.subr.bf16.mxu0 %v8629_v12 }
 0x843   : > { %3269 = vmax.xlane.f32.xlu0 %v3268_v48 }
 0x8b7   : > { %v3255_v16 = vpop.xlane.xlu0 %3254 }
 0x8b8   : > { %v3275_v15 = vsub.f32 %v8611_v13, %v3255_v16  ;;  %v3252_v17 = vpop.xlane.xlu1 %3251 }
 0x8b9   : > { %v3274_v25 = vsub.f32 %v8613_v38, %v3252_v17 }
 0x8ba   : > { %v3284_v39 = vmul.f32 1.442695, %v3275_v15 }
 0x8bb   : > { %v3282_v48 = vmul.f32 1.442695, %v3274_v25 }
 0x8bc   : > { %7306 = vpow2.f32 %v3284_v39 }
 0x8bd   : > { %7308 = vpow2.f32 %v3282_v48 }
 0x8bf   : > { %v3261_v0 = vpop.xlane.xlu1 %3260 }
 0x8c0   : > { %v3277_v6 = vsub.f32 %v6358_v45, %v3261_v0  ;;  %v3258_v7 = vpop.xlane.xlu0 %3257 }
 0x8c1   : > { %v3276_v55 = vsub.f32 %v3059_v46, %v3258_v7 }
 0x8c2   : > { %v3288_v52 = vmul.f32 1.442695, %v3277_v6 }
 0x8c3   : > { %v3286_v40 = vmul.f32 1.442695, %v3276_v55 }
 0x8c4   : > { %7310 = vpow2.f32 %v3288_v52 }
 0x8c5   : > { %7312 = vpow2.f32 %v3286_v40 }
 0x8c6   : > { %v8634_v4 = vpop.eup %7306 }
 0x8c7   : > { %v8636_v8 = vpop.eup %7308  ;;  %v3267_v13 = vpop.xlane.xlu1 %3266  ;;  %v3301_v38 = vsel %vm1407_vm2, %v8634_v4, 0.0 }
 0x8c8   : > { %v3279_v16 = vsub.f32 %v6365_v21, %v3267_v13  ;;  %v3264_v15 = vpop.xlane.xlu0 %3263  ;;  %3302 = vadd.xlane.f32.xlu1 %v3301_v38  ;;  %v3298_v45 = vsel %vm1407_vm2, %v8636_v8, 0.0 }
 0x8c9   : > { %v3278_v17 = vsub.f32 %v3150_v31, %v3264_v15  ;;  %3299 = vadd.xlane.f32.xlu0 %v3298_v45 }
 0x8ca   : > { %v3292_v46 = vmul.f32 1.442695, %v3279_v16 }
 0x8cb   : > { %v3290_v25 = vmul.f32 1.442695, %v3278_v17 }
 0x8cc   : > { %7314 = vpow2.f32 %v3292_v46 }
 0x8cd   : > { %7316 = vpow2.f32 %v3290_v25 }
 0x8ce   : > { %v8642_v39 = vpop.eup %7310 }
 0x8cf   : > { %v8644_v48 = vpop.eup %7312  ;;  %v3273_v0 = vpop.xlane.xlu1 %3272  ;;  %v3307_v6 = vsel %vm1407_vm2, %v8642_v39, 0.0 }
 0x8d0   : > { %v3281_v21 = vsub.f32 %v6372_v30, %v3273_v0  ;;  %3308 = vadd.xlane.f32.xlu1 %v3307_v6  ;;  %v3270_v7 = vpop.xlane.xlu0 %3269  ;;  %v3304_v55 = vsel %vm1407_vm2, %v8644_v48, 0.0 }
 0x8d1   : > { %v3280_v31 = vsub.f32 %v3241_v18, %v3270_v7  ;;  %3305 = vadd.xlane.f32.xlu0 %v3304_v55 }
 0x8d2   : > { %v3296_v52 = vmul.f32 1.442695, %v3281_v21 }
 0x8d3   : > { %v3294_v40 = vmul.f32 1.442695, %v3280_v31 }
 0x8d4   : > { %7318 = vpow2.f32 %v3296_v52 }
 0x8d5   : > { %7320 = vpow2.f32 %v3294_v40 }
 0x8d6   : > { %v8650_v13 = vpop.eup %7314 }
 0x8d7   : > { %v8652_v38 = vpop.eup %7316  ;;  %v3313_v16 = vsel %vm1407_vm2, %v8650_v13, 0.0 }
 0x8d8   : > { %3314 = vadd.xlane.f32.xlu1 %v3313_v16  ;;  %v3310_v30 = vsel %vm1407_vm2, %v8652_v38, 0.0 }
 0x8d9   : > { %3311 = vadd.xlane.f32.xlu0 %v3310_v30 }
 0x8de   : > { %v8658_v15 = vpop.eup %7318 }
 0x8df   : > { %v8660_v18 = vpop.eup %7320  ;;  %v3319_v45 = vsel %vm1407_vm2, %v8658_v15, 0.0 }
 0x8e0   : > { %3320 = vadd.xlane.f32.xlu1 %v3319_v45  ;;  %v3316_v17 = vsel %vm1407_vm2, %v8660_v18, 0.0 }
 0x8e1   : > { %3317 = vadd.xlane.f32.xlu0 %v3316_v17 }
 0x8f1   : > { %7188 = vrot.lane.b32.xlu1 %v8388_v24, %s7799_s29 }
 0x8f5   : > { %7193 = vrot.lane.b32.xlu1 %v8390_v20, %s7799_s29 }
 0x8f7   : > { %7183 = vrot.lane.b32.xlu0 %v8386_v19, %s7799_s29 }
 0x8f9   : > { %7198 = vrot.lane.b32.xlu1 %v8394_v22, %s7799_s29 }
 0x8fb   : > { %7203 = vrot.lane.b32.xlu0 %v8325_v14, %s7800_s24  ;;  %v1044_v14 = vld [vmem:[#allocation13 + $0x10] sm:$0xff] }
 0x8fd   : > { %7208 = vrot.lane.b32.xlu1 %v8327_v26, %s7800_s24  ;;  %v1045_v26 = vld [vmem:[#allocation13 + $0x18] sm:$0xff] }
 0x8ff   : > { %3823 = vrot.lane.b32.xlu0 %v8343_v41, %s7800_s24 }
 0x901   : > { %3825 = vrot.lane.b32.xlu1 %v8345_v43, %s7800_s24 }
 0x903   : > { %7213 = vrot.lane.b32.xlu0 %v8335_v32, %s7800_s24  ;;  %v6805_v32 = vpack.c.bf16 %v1045_v26, %v1044_v14  ;;  %v1050_v14 = vld [vmem:[#allocation13 + $0x40] sm:$0xff]  ;;  %v1051_v26 = vld [vmem:[#allocation13 + $0x48] sm:$0xff] }
 0x905   : > { %3914 = vrot.lane.b32.xlu1 %v8351_v47, %s7800_s24 }
 0x907   : > { %3916 = vrot.lane.b32.xlu0 %v8363_v54, %s7800_s24 }
 0x909   : > { %7218 = vrot.lane.b32.xlu1 %v8337_v34, %s7800_s24 }
 0x90b   : > { %v6283_v46 = vpop.f32.mrb[26].mxu0  ;;  %4005 = vrot.lane.b32.xlu0 %v8361_v53, %s7800_s24 }
 0x90c   : > { %v2352_v41 = vpop.f32.mrb[27].mxu0 }
 0x90d   : > { %6313 = vmatprep.mubr.msk.f32.mxu0 %vm1058_vm0, %v2352_v41  ;;  %4007 = vrot.lane.b32.xlu1 %v8359_v50, %s7800_s24 }
 0x90e   : > { %6314 = vmatmul.mubr.msk.f32.vlgmr.msra.gmra.mrb[30].mxu0 %vm1058_vm0, %v6283_v46 }
 0x90f   : > { %v6297_v43 = vpop.f32.mrb[28].mxu0  ;;  %6316 = vmatprep.mubr.msk.f32.mxu0 %vm1058_vm0, %v8605_v1  ;;  %4096 = vrot.lane.b32.xlu0 %v8373_v59, %s7800_s24 }
 0x910   : > { %v2530_v34 = vpop.f32.mrb[29].mxu0  ;;  %6804 = vmatpush3.bf16.msra.mxu0 %v8629_v12 }
 0x911   : > { %4098 = vrot.lane.b32.xlu1 %v8377_v60, %s7800_s24  ;;  %6806 = vmatprep.subr.bf16.mxu0 %v6805_v32 }
 0x912   : > { %6317 = vmatmul.mubr.msk.f32.gmra.mrb[32].mxu0 %vm1058_vm0, %v8603_v27 }
 0x913   : > { %6319 = vmatprep.mubr.msk.f32.mxu0 %vm1058_vm0, %v2530_v34 }
 0x914   : > { %6808 = vmatpush3.bf16.msra.mxu0 %v6805_v32 }
 0x916   : > { %6320 = vmatmul.mubr.msk.f32.gmra.mrb[34].mxu0 %vm1058_vm0, %v6297_v43 }
 0x917   : > { %6322 = vmatprep.mubr.msk.f32.mxu0 %vm1058_vm0, %v8609_v23 }
 0x91a   : > { %6323 = vmatmul.mubr.msk.f32.gmra.mrb[36].mxu0 %vm1058_vm0, %v8607_v33 }
 0x91b   : > { %6333 = vmatprep.mubr.msk.f32.mxu0 %vm1058_vm0, %v8537_v61 }
 0x91e   : > { %6334 = vmatmul.mubr.msk.f32.vlgmr.msra.gmra.mrb[30].mxu0 %vm1058_vm0, %v8535_v57 }
 0x91f   : > { %6336 = vmatprep.mubr.msk.f32.mxu0 %vm1058_vm0, %v8472_v3 }
 0x922   : > { %6337 = vmatmul.mubr.msk.f32.gmra.mrb[32].mxu0 %vm1058_vm0, %v8470_v2 }
 0x923   : > { %6339 = vmatprep.mubr.msk.f32.mxu0 %vm1058_vm0, %v8543_v63 }
 0x926   : > { %6340 = vmatmul.mubr.msk.f32.gmra.mrb[34].mxu0 %vm1058_vm0, %v8541_v62 }
 0x927   : > { %6342 = vmatprep.mubr.msk.f32.mxu0 %vm1058_vm0, %v8477_v10 }
 0x92a   : > { %6343 = vmatmul.mubr.msk.f32.gmra.mrb[36].mxu0 %vm1058_vm0, %v8475_v9 }
 0x955   : > { %v3303_v54 = vpop.xlane.xlu1 %3302 }
 0x956   : > { %v3300_v47 = vpop.xlane.xlu0 %3299 }
 0x957   : > { %7322 = vrcp.f32 %v3300_v47 }
 0x95d   : > { %v3309_v60 = vpop.xlane.xlu1 %3308 }
 0x95e   : > { %v3306_v50 = vpop.xlane.xlu0 %3305 }
 0x95f   : > { %7324 = vrcp.f32 %v3306_v50 }
 0x960   : > { %7326 = vrcp.f32 %v3309_v60 }
 0x961   : > { %v7323_v53 = vpop.eup %7322  ;;  %7328 = vrcp.f32 %v3303_v54 }
 0x962   : > { %v3330_v59 = vmul.f32 %v7323_v53, %v8636_v8 }
 0x964   : > { %6377 = vmatprep.mubr.msk.f32.mxu1 %vm1407_vm2, %v3330_v59  ;;  %v1053_v59 = vld [vmem:[#allocation13 + $0x58] sm:$0xff] }
 0x965   : > { %v3315_v3 = vpop.xlane.xlu1 %3314 }
 0x966   : > { %v3312_v57 = vpop.xlane.xlu0 %3311 }
 0x967   : > { %7330 = vrcp.f32 %v3312_v57 }
 0x969   : > { %v7325_v2 = vpop.eup %7324 }
 0x96a   : > { %v3332_v61 = vmul.f32 %v7325_v2, %v8644_v48  ;;  %v7327_v8 = vpop.eup %7326 }
 0x96b   : > { %v7329_v0 = vpop.eup %7328  ;;  %v3333_v40 = vmul.f32 %v7327_v8, %v8642_v39 }
 0x96c   : > { %6384 = vmatprep.mubr.msk.f32.mxu0 %vm1407_vm2, %v3332_v61  ;;  %v3331_v45 = vmul.f32 %v7329_v0, %v8634_v4  ;;  %v6849_v4 = vpack.c.bf16 %v1051_v26, %v1050_v14 }
 0x96d   : > { %v3321_v9 = vpop.xlane.xlu1 %3320 }
 0x96e   : > { %v3318_v10 = vpop.xlane.xlu0 %3317 }
 0x96f   : > { %7332 = vrcp.f32 %v3318_v10 }
 0x970   : > { %7334 = vrcp.f32 %v3315_v3 }
 0x971   : > { %v7189_v62 = vpop.permute.xlu1 %7188  ;;  %7336 = vrcp.f32 %v3321_v9  ;;  %v7331_v55 = vpop.eup %7330 }
 0x972   : > { %v7191_v63 = vunpack.i.h.bf16 %v7189_v62  ;;  %v7190_v27 = vunpack.i.l.bf16 %v7189_v62  ;;  %v7184_v1 = vpop.permute.xlu0 %7183  ;;  %v3334_v43 = vmul.f32 %v7331_v55, %v8652_v38  ;;  %v1052_v38 = vld [vmem:[#allocation13 + $0x50] sm:$0xff] }
 0x973   : > { %v7186_v33 = vunpack.i.h.bf16 %v7184_v1  ;;  %v7185_v23 = vunpack.i.l.bf16 %v7184_v1 }
 0x974   : > { %v6837_v12 = vpack.c.bf16 %v7191_v63, %v7190_v27 }
 0x975   : > { %v6833_v25 = vpack.c.bf16 %v7186_v33, %v7185_v23  ;;  %v7194_v48 = vpop.permute.xlu1 %7193 }
 0x976   : > { %v7196_v6 = vunpack.i.h.bf16 %v7194_v48  ;;  %v7195_v21 = vunpack.i.l.bf16 %v7194_v48  ;;  %6838 = vmatprep.subr.bf16.mxu0 %v6837_v12  ;;  %v7204_v7 = vpop.permute.xlu0 %7203 }
 0x977   : > { %v7206_v31 = vunpack.i.h.bf16 %v7204_v7  ;;  %v7205_v52 = vunpack.i.l.bf16 %v7204_v7  ;;  %6834 = vmatprep.subr.bf16.mxu1 %v6833_v25  ;;  %6840 = vmatpush3.bf16.msra.mxu0 %v6837_v12 }
 0x978   : > { %v6841_v16 = vpack.c.bf16 %v7196_v6, %v7195_v21  ;;  %6836 = vmatpush3.bf16.msra.mxu1 %v6833_v25 }
 0x979   : > { %v7333_v30 = vpop.eup %7332  ;;  %v7199_v17 = vpop.permute.xlu1 %7198  ;;  %v6857_v47 = vpack.c.bf16 %v7206_v31, %v7205_v52 }
 0x97a   : > { %v7335_v46 = vpop.eup %7334  ;;  %v7201_v41 = vunpack.i.h.bf16 %v7199_v17  ;;  %v7200_v32 = vunpack.i.l.bf16 %v7199_v17  ;;  %6385 = vmatmul.mubr.msk.f32.vlgmr.msra.gmra.mrb[38].mxu0 %vm1407_vm2, %v3333_v40  ;;  %6842 = vmatprep.subr.bf16.mxu1 %v6841_v16  ;;  %v3336_v34 = vmul.f32 %v7333_v30, %v8660_v18  ;;  %v3824_v18 = vpop.permute.xlu0 %3823 }
 0x97b   : > { %6378 = vmatmul.mubr.msk.f32.vlgmr.msra.gmra.mrb[42].mxu1 %vm1407_vm2, %v3331_v45  ;;  %v7337_v50 = vpop.eup %7336  ;;  %v3335_v53 = vmul.f32 %v7335_v46, %v8650_v13  ;;  %v6853_v13 = vpack.c.bf16 %v1053_v59, %v1052_v38 }
 0x97c   : > { %v6845_v39 = vpack.c.bf16 %v7201_v41, %v7200_v32  ;;  %6844 = vmatpush3.bf16.msra.mxu1 %v6841_v16  ;;  %6391 = vmatprep.mubr.msk.f32.mxu1 %vm1407_vm2, %v3334_v43  ;;  %v3337_v60 = vmul.f32 %v7337_v50, %v8658_v15 }
 0x97d   : > { %6398 = vmatprep.mubr.msk.f32.mxu0 %vm1407_vm2, %v3336_v34  ;;  %v7209_v54 = vpop.permute.xlu1 %7208  ;;  %6859 = vmatprep.subr.msk.bf16.mxu1 %vm8310_vm1, %v6857_v47 }
 0x97e   : > { %6846 = vmatprep.subr.bf16.mxu0 %v6845_v39  ;;  %v7211_v2 = vunpack.i.h.bf16 %v7209_v54  ;;  %v7210_v3 = vunpack.i.l.bf16 %v7209_v54  ;;  %v7214_v9 = vpop.permute.xlu0 %7213 }
 0x97f   : > { %6392 = vmatmul.mubr.msk.f32.vlgmr.msra.gmra.mrb[44].mxu1 %vm1407_vm2, %v3335_v53  ;;  %6848 = vmatpush3.bf16.msra.mxu0 %v6845_v39  ;;  %v7216_v15 = vunpack.i.h.bf16 %v7214_v9  ;;  %v7215_v62 = vunpack.i.l.bf16 %v7214_v9 }
 0x980   : > { %6425 = vmatprep.mubr.msk.f32.mxu1 %vm1058_vm0, %v3824_v18  ;;  %6850 = vmatprep.subr.bf16.mxu0 %v6849_v4  ;;  %v6863_v61 = vpack.c.bf16 %v7211_v2, %v7210_v3 }
 0x981   : > { %v3826_v57 = vpop.permute.xlu1 %3825  ;;  %v6869_v33 = vpack.c.bf16 %v7216_v15, %v7215_v62 }
 0x982   : > { %6399 = vmatmul.mubr.msk.f32.vlgmr.msra.gmra.mrb[40].mxu0 %vm1407_vm2, %v3337_v60  ;;  %v3917_v12 = vpop.permute.xlu0 %3916 }
 0x983   : > { %6852 = vmatpush3.bf16.msra.mxu0 %v6849_v4 }
 0x984   : > { %6854 = vmatprep.subr.bf16.mxu0 %v6853_v13 }
 0x985   : > { %v3915_v10 = vpop.permute.xlu1 %3914  ;;  %6862 = vmatpush3.bf16.xpose.msk.msra.mxu1 %vm8310_vm1, %v6857_v47 }
 0x986   : > { %6865 = vmatprep.subr.msk.bf16.mxu1 %vm8310_vm1, %v6863_v61  ;;  %v4006_v8 = vpop.permute.xlu0 %4005 }
 0x987   : > { %6856 = vmatpush3.bf16.msra.mxu0 %v6853_v13 }
 0x989   : > { %v7219_v63 = vpop.permute.xlu1 %7218 }
 0x98a   : > { %v7221_v27 = vunpack.i.h.bf16 %v7219_v63  ;;  %v7220_v1 = vunpack.i.l.bf16 %v7219_v63  ;;  %v4097_v40 = vpop.permute.xlu0 %4096 }
 0x98c   : > { %v6875_v23 = vpack.c.bf16 %v7221_v27, %v7220_v1  ;;  %6426 = vmatmul.mubr.msk.f32.vlgmr.msra.gmra.mrb[46].mxu1 %vm1058_vm0, %v3826_v57 }
 0x98d   : > { %6868 = vmatpush3.bf16.xpose.msk.msra.mxu1 %vm8310_vm1, %v6863_v61  ;;  %6432 = vmatprep.mubr.msk.f32.mxu1 %vm1058_vm0, %v3915_v10  ;;  %v4008_v25 = vpop.permute.xlu1 %4007 }
 0x98e   : > { %6871 = vmatprep.subr.msk.bf16.mxu1 %vm8310_vm1, %v6869_v33  ;;  %6877 = vmatprep.subr.msk.bf16.mxu0 %vm8310_vm1, %v6875_v23 }
 0x991   : > { %v4099_v16 = vpop.permute.xlu1 %4098 }
 0x994   : > { %6433 = vmatmul.mubr.msk.f32.vlgmr.msra.gmra.mrb[48].mxu1 %vm1058_vm0, %v3917_v12 }
 0x995   : > { %6874 = vmatpush3.bf16.xpose.msk.msra.mxu1 %vm8310_vm1, %v6869_v33  ;;  %6439 = vmatprep.mubr.msk.f32.mxu1 %vm1058_vm0, %v4006_v8 }
 0x99c   : > { %6440 = vmatmul.mubr.msk.f32.vlgmr.msra.gmra.mrb[50].mxu1 %vm1058_vm0, %v4008_v25 }
 0xa4d   : > { %v6386_v48 = vpop.f32.mrb[38].mxu0 }
 0xa4e   : > { %v6379_v0 = vpop.f32.mrb[42].mxu1  ;;  %v3503_v6 = vpop.f32.mrb[39].mxu0 }
 0xa4f   : > { %v3416_v21 = vpop.f32.mrb[43].mxu1 }
 0xa50   : > { %6409 = vmatprep.mubr.msk.f32.mxu0 %vm1058_vm0, %v3416_v21 }
 0xa51   : > { %6410 = vmatmul.mubr.msk.f32.vlgmr.msra.gmra.mrb[30].mxu0 %vm1058_vm0, %v6379_v0 }
 0xa52   : > { %6880 = vmatpush3.bf16.xpose.msk.msra.mxu0 %vm8310_vm1, %v6875_v23  ;;  %v6393_v7 = vpop.f32.mrb[44].mxu1  ;;  %6412 = vmatprep.mubr.msk.f32.mxu0 %vm1058_vm0, %v3503_v6 }
 0xa53   : > { %v3590_v55 = vpop.f32.mrb[45].mxu1 }
 0xa55   : > { %v6400_v31 = vpop.f32.mrb[40].mxu0  ;;  %6413 = vmatmul.mubr.msk.f32.gmra.mrb[32].mxu0 %vm1058_vm0, %v6386_v48 }
 0xa56   : > { %v3677_v52 = vpop.f32.mrb[41].mxu0  ;;  %6415 = vmatprep.mubr.msk.f32.mxu0 %vm1058_vm0, %v3590_v55 }
 0xa59   : > { %6416 = vmatmul.mubr.msk.f32.gmra.mrb[34].mxu0 %vm1058_vm0, %v6393_v7 }
 0xa5a   : > { %6418 = vmatprep.mubr.msk.f32.mxu0 %vm1058_vm0, %v3677_v52 }
 0xa5d   : > { %6419 = vmatmul.mubr.msk.f32.gmra.mrb[36].mxu0 %vm1058_vm0, %v6400_v31 }
 0xa5e   : > { %6446 = vmatprep.mubr.msk.f32.mxu0 %vm1058_vm0, %v4097_v40 }
 0xa5f   : > { %v6427_v11 = vpop.f32.mrb[46].mxu1 }
 0xa60   : > { %v3905_v30 = vpop.f32.mrb[47].mxu1  ;;  %v4190_v45 = vsel %vm1407_vm2, %v6427_v11, -inf }
 0xa61   : > { %4191 = vmax.xlane.f32.xlu1 %v4190_v45  ;;  %6447 = vmatmul.mubr.msk.f32.vlgmr.msra.gmra.mrb[42].mxu0 %vm1058_vm0, %v4099_v16  ;;  %v4187_v17 = vsel %vm1407_vm2, %v3905_v30, -inf }
 0xa62   : > { %4188 = vmax.xlane.f32.xlu0 %v4187_v17 }
 0xa67   : > { %v6434_v14 = vpop.f32.mrb[48].mxu1 }
 0xa68   : > { %v3996_v26 = vpop.f32.mrb[49].mxu1  ;;  %v4196_v46 = vsel %vm1407_vm2, %v6434_v14, -inf }
 0xa69   : > { %4197 = vmax.xlane.f32.xlu0 %v4196_v46  ;;  %v4193_v41 = vsel %vm1407_vm2, %v3996_v26, -inf }
 0xa6d   : > { %4194 = vmax.xlane.f32.xlu0 %v4193_v41 }
 0xa6f   : > { %v6441_v32 = vpop.f32.mrb[50].mxu1 }
 0xa70   : > { %v4087_v43 = vpop.f32.mrb[51].mxu1  ;;  %v4202_v34 = vsel %vm1407_vm2, %v6441_v32, -inf }
 0xa71   : > { %4203 = vmax.xlane.f32.xlu1 %v4202_v34  ;;  %v4199_v47 = vsel %vm1407_vm2, %v4087_v43, -inf }
 0xa72   : > { %4200 = vmax.xlane.f32.xlu0 %v4199_v47 }
 0xaee   : > { %v4192_v50 = vpop.xlane.xlu1 %4191 }
 0xaef   : > { %v4189_v39 = vpop.xlane.xlu0 %4188  ;;  %v4212_v53 = vsub.f32 %v6427_v11, %v4192_v50 }
 0xaf0   : > { %v4211_v38 = vsub.f32 %v3905_v30, %v4189_v39 }
 0xaf1   : > { %v4221_v59 = vmul.f32 1.442695, %v4212_v53 }
 0xaf2   : > { %v4219_v60 = vmul.f32 1.442695, %v4211_v38 }
 0xaf3   : > { %7338 = vpow2.f32 %v4221_v59 }
 0xaf4   : > { %7340 = vpow2.f32 %v4219_v60 }
 0xaf6   : > { %v4198_v4 = vpop.xlane.xlu0 %4197 }
 0xaf7   : > { %v4214_v18 = vsub.f32 %v6434_v14, %v4198_v4 }
 0xaf9   : > { %v4225_v57 = vmul.f32 1.442695, %v4214_v18 }
 0xafa   : > { %v4195_v54 = vpop.xlane.xlu0 %4194 }
 0xafb   : > { %v4213_v2 = vsub.f32 %v3996_v26, %v4195_v54  ;;  %7342 = vpow2.f32 %v4225_v57 }
 0xafd   : > { %v4223_v9 = vmul.f32 1.442695, %v4213_v2  ;;  %v8782_v33 = vpop.eup %7338 }
 0xafe   : > { %v4204_v3 = vpop.xlane.xlu1 %4203  ;;  %v7341_v12 = vpop.eup %7340  ;;  %v4238_v8 = vsel %vm1407_vm2, %v8782_v33, 0.0 }
 0xaff   : > { %v4201_v13 = vpop.xlane.xlu0 %4200  ;;  %v4216_v61 = vsub.f32 %v6441_v32, %v4204_v3  ;;  %7344 = vpow2.f32 %v4223_v9  ;;  %v4235_v48 = vsel %vm1407_vm2, %v7341_v12, 0.0 }
 0xb00   : > { %v4215_v10 = vsub.f32 %v4087_v43, %v4201_v13 }
 0xb01   : > { %v4229_v15 = vmul.f32 1.442695, %v4216_v61 }
 0xb02   : > { %v4227_v62 = vmul.f32 1.442695, %v4215_v10 }
 0xb03   : > { %7346 = vpow2.f32 %v4229_v15 }
 0xb04   : > { %7348 = vpow2.f32 %v4227_v62 }
 0xb05   : > { %v8787_v25 = vpop.eup %7342 }
 0xb06   : > { %v4244_v6 = vsel %vm1407_vm2, %v8787_v25, 0.0 }
 0xb09   : > { %v7345_v0 = vpop.eup %7344 }
 0xb0a   : > { %v4241_v7 = vsel %vm1407_vm2, %v7345_v0, 0.0 }
 0xb0d   : > { %v8792_v21 = vpop.eup %7346 }
 0xb0e   : > { %v8795_v55 = vpop.eup %7348  ;;  %v4250_v31 = vsel %vm1407_vm2, %v8792_v21, 0.0 }
 0xb0f   : > { %v4247_v52 = vsel %vm1407_vm2, %v8795_v55, 0.0 }
 0xb34   : > { %v6448_v63 = vpop.f32.mrb[42].mxu0 }
 0xb35   : > { %v4178_v27 = vpop.f32.mrb[43].mxu0  ;;  %v4208_v1 = vsel %vm1407_vm2, %v6448_v63, -inf }
 0xb36   : > { %4209 = vmax.xlane.f32.xlu1 %v4208_v1  ;;  %v4205_v23 = vsel %vm1407_vm2, %v4178_v27, -inf }
 0xb37   : > { %4206 = vmax.xlane.f32.xlu0 %v4205_v23 }
 0xb3a   : > { %4239 = vadd.xlane.f32.xlu1 %v4238_v8  ;;  %v1054_v8 = vld [vmem:[#allocation13 + $0x60] sm:$0xff] }
 0xb3b   : > { %4236 = vadd.xlane.f32.xlu0 %v4235_v48  ;;  %v1055_v48 = vld [vmem:[#allocation13 + $0x68] sm:$0xff] }
 0xb3e   : > { %4245 = vadd.xlane.f32.xlu1 %v4244_v6 }
 0xb3f   : > { %4242 = vadd.xlane.f32.xlu0 %v4241_v7 }
 0xb42   : > { %4251 = vadd.xlane.f32.xlu1 %v4250_v31 }
 0xb43   : > { %4248 = vadd.xlane.f32.xlu0 %v4247_v52 }
 0xbc3   : > { %v4210_v40 = vpop.xlane.xlu1 %4209 }
 0xbc4   : > { %v4218_v11 = vsub.f32 %v6448_v63, %v4210_v40  ;;  %v4207_v16 = vpop.xlane.xlu0 %4206  ;;  %v6897_v40 = vpack.c.bf16 %v1055_v48, %v1054_v8  ;;  %v4897_v8 = vld [vmem:[#allocation14 + $0x20] sm:$0xff]  ;;  %v4898_v48 = vld [vmem:[#allocation14 + $0x28] sm:$0xff] }
 0xbc5   : > { %v4217_v30 = vsub.f32 %v4178_v27, %v4207_v16 }
 0xbc6   : > { %v4233_v45 = vmul.f32 1.442695, %v4218_v11 }
 0xbc7   : > { %v4231_v17 = vmul.f32 1.442695, %v4217_v30  ;;  %v4240_v50 = vpop.xlane.xlu1 %4239  ;;  %v1057_v30 = vld [vmem:[#allocation13 + $0x78] sm:$0xff] }
 0xbc8   : > { %7350 = vpow2.f32 %v4233_v45  ;;  %v4237_v14 = vpop.xlane.xlu0 %4236 }
 0xbc9   : > { %7352 = vpow2.f32 %v4231_v17 }
 0xbca   : > { %7354 = vrcp.f32 %v4237_v14 }
 0xbcb   : > { %v4246_v53 = vpop.xlane.xlu1 %4245 }
 0xbcc   : > { %v4243_v26 = vpop.xlane.xlu0 %4242 }
 0xbcd   : > { %7356 = vrcp.f32 %v4243_v26 }
 0xbce   : > { %7358 = vrcp.f32 %v4246_v53 }
 0xbcf   : > { %v4252_v54 = vpop.xlane.xlu1 %4251  ;;  %7360 = vrcp.f32 %v4240_v50 }
 0xbd0   : > { %v4249_v38 = vpop.xlane.xlu0 %4248 }
 0xbd1   : > { %7362 = vrcp.f32 %v4249_v38 }
 0xbd2   : > { %v8801_v46 = vpop.eup %7350 }
 0xbd3   : > { %v7353_v41 = vpop.eup %7352  ;;  %v4256_v32 = vsel %vm1407_vm2, %v8801_v46, 0.0 }
 0xbd4   : > { %4257 = vadd.xlane.f32.xlu1 %v4256_v32  ;;  %v4253_v43 = vsel %vm1407_vm2, %v7353_v41, 0.0  ;;  %v7355_v34 = vpop.eup %7354 }
 0xbd5   : > { %4254 = vadd.xlane.f32.xlu0 %v4253_v43  ;;  %v4267_v47 = vmul.f32 %v7355_v34, %v7341_v12  ;;  %v7434_v34 = vld [vmem:[%s8198_s26] sm:$0xff] }
 0xbd7   : > { %v7357_v39 = vpop.eup %7356  ;;  %6453 = vmatprep.mubr.msk.f32.mxu1 %vm1407_vm2, %v4267_v47  ;;  %v4762_v47 = vsub.s32 4, %v8268_v28 }
 0xbd8   : > { %v4269_v4 = vmul.f32 %v7357_v39, %v7345_v0  ;;  %v8840_v39 = vld [vmem:[%s9159_s22] sm:$0xff] }
 0xbda   : > { %6460 = vmatprep.mubr.msk.f32.mxu0 %vm1407_vm2, %v4269_v4  ;;  %v4763_v4 = vrot.slane %v8840_v39, %v4762_v47 }
 0xbe5   : > { %7228 = vrot.lane.b32.xlu1 %v8388_v24, %s7800_s24 }
 0xbe9   : > { %7233 = vrot.lane.b32.xlu1 %v8390_v20, %s7800_s24 }
 0xbeb   : > { %7223 = vrot.lane.b32.xlu0 %v8386_v19, %s7800_s24 }
 0xbed   : > { %7238 = vrot.lane.b32.xlu1 %v8394_v22, %s7800_s24  ;;  %v7359_v22 = vpop.eup %7358 }
 0xbee   : > { %v7361_v9 = vpop.eup %7360  ;;  %v4270_v63 = vmul.f32 %v7359_v22, %v8787_v25 }
 0xbef   : > { %v7363_v62 = vpop.eup %7362  ;;  %v4268_v23 = vmul.f32 %v7361_v9, %v8782_v33 }
 0xbf0   : > { %v4271_v31 = vmul.f32 %v7363_v62, %v8795_v55  ;;  %v1056_v55 = vld [vmem:[#allocation13 + $0x70] sm:$0xff] }
 0xbf1   : > { %v6901_v45 = vpack.c.bf16 %v1057_v30, %v1056_v55 }
 0xc61   : > { %v4258_v59 = vpop.xlane.xlu1 %4257 }
 0xc62   : > { %v4255_v18 = vpop.xlane.xlu0 %4254 }
 0xc63   : > { %7364 = vrcp.f32 %v4255_v18 }
 0xc64   : > { %7366 = vrcp.f32 %v4252_v54 }
 0xc65   : > { %v7229_v24 = vpop.permute.xlu1 %7228  ;;  %7368 = vrcp.f32 %v4258_v59 }
 0xc66   : > { %v7231_v60 = vunpack.i.h.bf16 %v7229_v24  ;;  %v7230_v20 = vunpack.i.l.bf16 %v7229_v24  ;;  %v7224_v2 = vpop.permute.xlu0 %7223 }
 0xc67   : > { %v7226_v19 = vunpack.i.h.bf16 %v7224_v2  ;;  %v7225_v3 = vunpack.i.l.bf16 %v7224_v2 }
 0xc68   : > { %v6885_v13 = vpack.c.bf16 %v7231_v60, %v7230_v20 }
 0xc69   : > { %v6881_v57 = vpack.c.bf16 %v7226_v19, %v7225_v3  ;;  %v7234_v61 = vpop.permute.xlu1 %7233 }
 0xc6a   : > { %v7236_v10 = vunpack.i.h.bf16 %v7234_v61  ;;  %v7235_v15 = vunpack.i.l.bf16 %v7234_v61  ;;  %6886 = vmatprep.subr.bf16.mxu0 %v6885_v13 }
 0xc6b   : > { %6882 = vmatprep.subr.bf16.mxu1 %v6881_v57  ;;  %6888 = vmatpush3.bf16.msra.mxu0 %v6885_v13 }
 0xc6c   : > { %v6889_v27 = vpack.c.bf16 %v7236_v10, %v7235_v15  ;;  %6884 = vmatpush3.bf16.msra.mxu1 %v6881_v57 }
 0xc6d   : > { %v7365_v1 = vpop.eup %7364  ;;  %v7239_v12 = vpop.permute.xlu1 %7238 }
 0xc6e   : > { %v7367_v0 = vpop.eup %7366  ;;  %v7241_v6 = vunpack.i.h.bf16 %v7239_v12  ;;  %v7240_v7 = vunpack.i.l.bf16 %v7239_v12  ;;  %6461 = vmatmul.mubr.msk.f32.vlgmr.msra.gmra.mrb[44].mxu0 %vm1407_vm2, %v4270_v63  ;;  %6890 = vmatprep.subr.bf16.mxu1 %v6889_v27  ;;  %v4273_v52 = vmul.f32 %v7365_v1, %v7353_v41  ;;  %v4895_v1 = vld [vmem:[#allocation14 + $0x10] sm:$0xff] }
 0xc6f   : > { %6454 = vmatmul.mubr.msk.f32.vlgmr.msra.gmra.mrb[52].mxu1 %vm1407_vm2, %v4268_v23  ;;  %v7369_v33 = vpop.eup %7368  ;;  %v4272_v11 = vmul.f32 %v7367_v0, %v8792_v21  ;;  %v4896_v23 = vld [vmem:[#allocation14 + $0x18] sm:$0xff] }
 0xc70   : > { %v6893_v25 = vpack.c.bf16 %v7241_v6, %v7240_v7  ;;  %6892 = vmatpush3.bf16.msra.mxu1 %v6889_v27  ;;  %6467 = vmatprep.mubr.msk.f32.mxu1 %vm1407_vm2, %v4271_v31  ;;  %v4274_v16 = vmul.f32 %v7369_v33, %v8801_v46  ;;  %v4893_v27 = vld [vmem:[#allocation14] sm:$0xff]  ;;  %v6909_v12 = vpack.c.bf16 %v4896_v23, %v4895_v1 }
 0xc71   : > { %6474 = vmatprep.mubr.msk.f32.mxu0 %vm1407_vm2, %v4273_v52 }
 0xc72   : > { %6894 = vmatprep.subr.bf16.mxu0 %v6893_v25 }
 0xc73   : > { %6468 = vmatmul.mubr.msk.f32.vlgmr.msra.gmra.mrb[54].mxu1 %vm1407_vm2, %v4272_v11  ;;  %6896 = vmatpush3.bf16.msra.mxu0 %v6893_v25 }
 0xc74   : > { %6898 = vmatprep.subr.bf16.mxu0 %v6897_v40 }
 0xc76   : > { %6475 = vmatmul.mubr.msk.f32.vlgmr.msra.gmra.mrb[46].mxu0 %vm1407_vm2, %v4274_v16 }
 0xc77   : > { %6900 = vmatpush3.bf16.msra.mxu0 %v6897_v40 }
 0xc78   : > { %6902 = vmatprep.subr.bf16.mxu0 %v6901_v45 }
 0xc7b   : > { %6904 = vmatpush3.bf16.msra.mxu0 %v6901_v45 }
 0xd41   : > { %v6462_v17 = vpop.f32.mrb[44].mxu0 }
 0xd42   : > { %v6455_v21 = vpop.f32.mrb[52].mxu1  ;;  %v4440_v14 = vpop.f32.mrb[45].mxu0 }
 0xd43   : > { %v4353_v26 = vpop.f32.mrb[53].mxu1 }
 0xd44   : > { %6485 = vmatprep.mubr.msk.f32.mxu0 %vm1058_vm0, %v4353_v26 }
 0xd45   : > { %6486 = vmatmul.mubr.msk.f32.vlgmr.msra.gmra.mrb[30].mxu0 %vm1058_vm0, %v6455_v21 }
 0xd46   : > { %v6469_v41 = vpop.f32.mrb[54].mxu1  ;;  %6488 = vmatprep.mubr.msk.f32.mxu0 %vm1058_vm0, %v4440_v14 }
 0xd47   : > { %v4527_v46 = vpop.f32.mrb[55].mxu1 }
 0xd49   : > { %v6476_v32 = vpop.f32.mrb[46].mxu0  ;;  %6489 = vmatmul.mubr.msk.f32.gmra.mrb[32].mxu0 %vm1058_vm0, %v6462_v17 }
 0xd4a   : > { %v4614_v43 = vpop.f32.mrb[47].mxu0  ;;  %6491 = vmatprep.mubr.msk.f32.mxu0 %vm1058_vm0, %v4527_v46 }
 0xd4d   : > { %6492 = vmatmul.mubr.msk.f32.gmra.mrb[34].mxu0 %vm1058_vm0, %v6469_v41 }
 0xd4e   : > { %6494 = vmatprep.mubr.msk.f32.mxu0 %vm1058_vm0, %v4614_v43 }
 0xd51   : > { %6495 = vmatmul.mubr.msk.f32.gmra.mrb[36].mxu0 %vm1058_vm0, %v6476_v32 }
 0xd52   : > { %6573 = vmatprep.mubr.f32.mxu0 %v7434_v34 }
 0xe18   : > { %v6487_v50 = vpop.f32.mrb[30].mxu0 }
 0xe19   : > { %v4765_v53 = vadd.f32 %v6487_v50, %v4763_v4  ;;  %v4713_v54 = vpop.f32.mrb[31].mxu0 }
 0xe1a   : > { %v4764_v38 = vadd.f32 %v4763_v4, %v4713_v54 }
 0xe1b   : > { %v4773_v59 = vadd.f32 %v4765_v53, %v8281_v37 }
 0xe1c   : > { %v4772_v18 = vadd.f32 %v4764_v38, %v8279_v36  ;;  %v6490_v24 = vpop.f32.mrb[32].mxu0 }
 0xe1d   : > { %v4767_v60 = vadd.f32 %v6490_v24, %v4763_v4  ;;  %4782 = vadd.xlane.f32.xlu1 %v4773_v59  ;;  %v4723_v20 = vpop.f32.mrb[33].mxu0  ;;  %v4899_v24 = vld [vmem:[#allocation14 + $0x30] sm:$0xff] }
 0xe1e   : > { %4780 = vadd.xlane.f32.xlu0 %v4772_v18  ;;  %v4766_v19 = vadd.f32 %v4763_v4, %v4723_v20 }
 0xe1f   : > { %v4775_v2 = vadd.f32 %v4767_v60, %v8284_v42  ;;  %v4900_v60 = vld [vmem:[#allocation14 + $0x38] sm:$0xff] }
 0xe20   : > { %v6493_v3 = vpop.f32.mrb[34].mxu0  ;;  %v4774_v61 = vadd.f32 %v4766_v19, %v8287_v44  ;;  %v6917_v20 = vpack.c.bf16 %v4900_v60, %v4899_v24  ;;  %v4902_v19 = vld [vmem:[#allocation14 + $0x48] sm:$0xff] }
 0xe21   : > { %v4769_v13 = vadd.f32 %v6493_v3, %v4763_v4  ;;  %v4733_v22 = vpop.f32.mrb[35].mxu0 }
 0xe22   : > { %4786 = vadd.xlane.f32.xlu0 %v4775_v2  ;;  %v4768_v9 = vadd.f32 %v4763_v4, %v4733_v22  ;;  %v4904_v22 = vld [vmem:[#allocation14 + $0x58] sm:$0xff] }
 0xe23   : > { %v4777_v57 = vadd.f32 %v4769_v13, %v8290_v49  ;;  %v4894_v49 = vld [vmem:[#allocation14 + $0x8] sm:$0xff]  ;;  %v4903_v13 = vld [vmem:[#allocation14 + $0x50] sm:$0xff] }
 0xe24   : > { %v6496_v37 = vpop.f32.mrb[36].mxu0  ;;  %v4776_v62 = vadd.f32 %v4768_v9, %v8293_v51  ;;  %v6905_v44 = vpack.c.bf16 %v4894_v49, %v4893_v27  ;;  %v4906_v9 = vld [vmem:[#allocation14 + $0x68] sm:$0xff] }
 0xe25   : > { %v4771_v10 = vadd.f32 %v6496_v37, %v4763_v4  ;;  %4790 = vadd.xlane.f32.xlu1 %v4777_v57  ;;  %v4743_v36 = vpop.f32.mrb[37].mxu0 }
 0xe26   : > { %4784 = vadd.xlane.f32.xlu0 %v4774_v61  ;;  %v4770_v42 = vadd.f32 %v4763_v4, %v4743_v36  ;;  %6906 = vmatprep.subr.bf16.mxu1 %v6905_v44  ;;  %v4908_v36 = vld [vmem:[#allocation14 + $0x78] sm:$0xff] }
 0xe27   : > { %v4779_v15 = vadd.f32 %v4771_v10, %v8296_v56  ;;  %6908 = vmatpush3.bf16.msra.mxu1 %v6905_v44  ;;  %v6913_v56 = vpack.c.bf16 %v4898_v48, %v4897_v8  ;;  %v4907_v10 = vld [vmem:[#allocation14 + $0x70] sm:$0xff] }
 0xe28   : > { %v4778_v63 = vadd.f32 %v4770_v42, %v8299_v58  ;;  %6910 = vmatprep.subr.bf16.mxu1 %v6909_v12 }
 0xe29   : > { %4794 = vadd.xlane.f32.xlu1 %v4779_v15 }
 0xe2a   : > { %4788 = vadd.xlane.f32.xlu0 %v4776_v62 }
 0xe2b   : > { %6912 = vmatpush3.bf16.msra.mxu1 %v6909_v12 }
 0xe2c   : > { %6914 = vmatprep.subr.bf16.mxu1 %v6913_v56 }
 0xe2e   : > { %4792 = vadd.xlane.f32.xlu0 %v4778_v63 }
 0xe2f   : > { %6916 = vmatpush3.bf16.msra.mxu1 %v6913_v56 }
 0xe30   : > { %6918 = vmatprep.subr.bf16.mxu1 %v6917_v20 }
 0xe33   : > { %6920 = vmatpush3.bf16.msra.mxu1 %v6917_v20 }
 0xeaa   : > { %v4783_v51 = vpop.xlane.xlu1 %4782 }
 0xeab   : > { %v4798_v0 = vmul.f32 0.0078125, %v4783_v51  ;;  %v4781_v6 = vpop.xlane.xlu0 %4780 }
 0xeac   : > { %v4797_v58 = vmul.f32 0.0078125, %v4781_v6 }
 0xead   : > { %v8851_v7 = vsub.f32 %v4773_v59, %v4798_v0  ;;  %v4871_v0 = vsub.s32 6, %v8268_v28 }
 0xeae   : > { %v8853_v31 = vsub.f32 %v4772_v18, %v4797_v58 }
 0xeaf   : > { %v4787_v52 = vpop.xlane.xlu0 %4786  ;;  %v4814_v25 = vmul.f32 %v8851_v7, %v8851_v7 }
 0xeb0   : > { %v4800_v40 = vmul.f32 0.0078125, %v4787_v52  ;;  %v4813_v33 = vmul.f32 %v8853_v31, %v8853_v31 }
 0xeb1   : > { %4823 = vadd.xlane.f32.xlu1 %v4814_v25 }
 0xeb2   : > { %v8859_v11 = vsub.f32 %v4775_v2, %v4800_v40  ;;  %v4791_v16 = vpop.xlane.xlu1 %4790  ;;  %4821 = vadd.xlane.f32.xlu0 %v4813_v33  ;;  %v4901_v2 = vld [vmem:[#allocation14 + $0x40] sm:$0xff]  ;;  %v4883_v40 = vsub.s32 7, %v8268_v28 }
 0xeb3   : > { %v4802_v55 = vmul.f32 0.0078125, %v4791_v16  ;;  %v4785_v30 = vpop.xlane.xlu0 %4784  ;;  %v6921_v3 = vpack.c.bf16 %v4902_v19, %v4901_v2 }
 0xeb4   : > { %v4799_v45 = vmul.f32 0.0078125, %v4785_v30  ;;  %v4816_v17 = vmul.f32 %v8859_v11, %v8859_v11 }
 0xeb5   : > { %v8863_v21 = vsub.f32 %v4777_v57, %v4802_v55  ;;  %6922 = vmatprep.subr.bf16.mxu1 %v6921_v3  ;;  %v6925_v57 = vpack.c.bf16 %v4904_v22, %v4903_v13  ;;  %v4872_v55 = vrot.slane %v8840_v39, %v4871_v0  ;;  %v5154_v0 = vld [vmem:[#allocation16 + $0x40] sm:$0xff] }
 0xeb6   : > { %v8865_v14 = vsub.f32 %v4774_v61, %v4799_v45  ;;  %4827 = vadd.xlane.f32.xlu1 %v4816_v17  ;;  %v4795_v26 = vpop.xlane.xlu1 %4794  ;;  %6924 = vmatpush3.bf16.msra.mxu1 %v6921_v3  ;;  %v4905_v61 = vld [vmem:[#allocation14 + $0x60] sm:$0xff] }
 0xeb7   : > { %v4804_v41 = vmul.f32 0.0078125, %v4795_v26  ;;  %v4789_v46 = vpop.xlane.xlu0 %4788  ;;  %v4818_v32 = vmul.f32 %v8863_v21, %v8863_v21  ;;  %6926 = vmatprep.subr.bf16.mxu1 %v6925_v57  ;;  %v6929_v37 = vpack.c.bf16 %v4906_v9, %v4905_v61 }
 0xeb8   : > { %v4801_v43 = vmul.f32 0.0078125, %v4789_v46  ;;  %v4815_v34 = vmul.f32 %v8865_v14, %v8865_v14 }
 0xeb9   : > { %v8871_v47 = vsub.f32 %v4779_v15, %v4804_v41  ;;  %v6933_v15 = vpack.c.bf16 %v4908_v36, %v4907_v10 }
 0xeba   : > { %v8873_v4 = vsub.f32 %v4776_v62, %v4801_v43  ;;  %4831 = vadd.xlane.f32.xlu1 %v4818_v32  ;;  %4825 = vadd.xlane.f32.xlu0 %v4815_v34  ;;  %v4884_v43 = vrot.slane %v8840_v39, %v4883_v40 }
 0xebb   : > { %v4793_v50 = vpop.xlane.xlu0 %4792  ;;  %v4820_v53 = vmul.f32 %v8871_v47, %v8871_v47  ;;  %6928 = vmatpush3.bf16.msra.mxu1 %v6925_v57 }
 0xebc   : > { %v4803_v54 = vmul.f32 0.0078125, %v4793_v50  ;;  %v4817_v38 = vmul.f32 %v8873_v4, %v8873_v4  ;;  %6930 = vmatprep.subr.bf16.mxu1 %v6929_v37 }
 0xebe   : > { %v8879_v59 = vsub.f32 %v4778_v63, %v4803_v54  ;;  %4835 = vadd.xlane.f32.xlu1 %v4820_v53  ;;  %4829 = vadd.xlane.f32.xlu0 %v4817_v38 }
 0xebf   : > { %6932 = vmatpush3.bf16.msra.mxu1 %v6929_v37 }
 0xec0   : > { %v4819_v18 = vmul.f32 %v8879_v59, %v8879_v59  ;;  %6934 = vmatprep.subr.bf16.mxu1 %v6933_v15 }
 0xec2   : > { %4833 = vadd.xlane.f32.xlu0 %v4819_v18 }
 0xec3   : > { %6936 = vmatpush3.bf16.msra.mxu1 %v6933_v15 }
 0xf3e   : > { %v4824_v62 = vpop.xlane.xlu1 %4823 }
 0xf3f   : > { %v4838_v42 = vmul.f32 0.0078125, %v4824_v62  ;;  %v4822_v63 = vpop.xlane.xlu0 %4821 }
 0xf40   : > { %v4837_v27 = vmul.f32 0.0078125, %v4822_v63  ;;  %v5146_v63 = vld [vmem:[#allocation16] sm:$0xff] }
 0xf41   : > { %v4846_v49 = vadd.f32 1e-05, %v4838_v42 }
 0xf42   : > { %v4845_v1 = vadd.f32 1e-05, %v4837_v27 }
 0xf43   : > { %7370 = vrsqrt.f32 %v4846_v49  ;;  %v4828_v44 = vpop.xlane.xlu1 %4827  ;;  %v5148_v49 = vld [vmem:[#allocation16 + $0x10] sm:$0xff] }
 0xf44   : > { %7372 = vrsqrt.f32 %v4845_v1  ;;  %v4840_v23 = vmul.f32 0.0078125, %v4828_v44  ;;  %v5149_v1 = vld [vmem:[#allocation16 + $0x18] sm:$0xff] }
 0xf45   : > { %v6941_v44 = vpack.c.bf16 %v5149_v1, %v5148_v49 }
 0xf46   : > { %v4848_v12 = vadd.f32 1e-05, %v4840_v23  ;;  %v5150_v23 = vld [vmem:[#allocation16 + $0x20] sm:$0xff] }
 0xf47   : > { %v4832_v8 = vpop.xlane.xlu1 %4831  ;;  %v4826_v48 = vpop.xlane.xlu0 %4825 }
 0xf48   : > { %7374 = vrsqrt.f32 %v4848_v12  ;;  %v4842_v56 = vmul.f32 0.0078125, %v4832_v8  ;;  %v4839_v51 = vmul.f32 0.0078125, %v4826_v48  ;;  %v5151_v12 = vld [vmem:[#allocation16 + $0x28] sm:$0xff]  ;;  %v5152_v48 = vld [vmem:[#allocation16 + $0x30] sm:$0xff] }
 0xf49   : > { %v6945_v8 = vpack.c.bf16 %v5151_v12, %v5150_v23 }
 0xf4a   : > { %v4850_v6 = vadd.f32 1e-05, %v4842_v56  ;;  %v4847_v58 = vadd.f32 1e-05, %v4839_v51  ;;  %v5153_v56 = vld [vmem:[#allocation16 + $0x38] sm:$0xff] }
 0xf4b   : > { %v4836_v52 = vpop.xlane.xlu1 %4835  ;;  %v4830_v25 = vpop.xlane.xlu0 %4829  ;;  %v6949_v51 = vpack.c.bf16 %v5153_v56, %v5152_v48 }
 0xf4c   : > { %7376 = vrsqrt.f32 %v4850_v6  ;;  %v4844_v33 = vmul.f32 0.0078125, %v4836_v52  ;;  %v4841_v16 = vmul.f32 0.0078125, %v4830_v25  ;;  %v5155_v6 = vld [vmem:[#allocation16 + $0x48] sm:$0xff]  ;;  %v5156_v52 = vld [vmem:[#allocation16 + $0x50] sm:$0xff]  ;;  %v5157_v25 = vld [vmem:[#allocation16 + $0x58] sm:$0xff] }
 0xf4d   : > { %v7371_v30 = vpop.eup %7370  ;;  %7378 = vrsqrt.f32 %v4847_v58  ;;  %v6953_v58 = vpack.c.bf16 %v5155_v6, %v5154_v0  ;;  %v6957_v40 = vpack.c.bf16 %v5157_v25, %v5156_v52 }
 0xf4e   : > { %v7373_v45 = vpop.eup %7372  ;;  %v4852_v17 = vadd.f32 1e-05, %v4844_v33  ;;  %v4849_v26 = vadd.f32 1e-05, %v4841_v16  ;;  %v4862_v41 = vmul.f32 %v7371_v30, %v8851_v7  ;;  %v5158_v33 = vld [vmem:[#allocation16 + $0x60] sm:$0xff]  ;;  %v5159_v16 = vld [vmem:[#allocation16 + $0x68] sm:$0xff] }
 0xf4f   : > { %v4834_v46 = vpop.xlane.xlu0 %4833  ;;  %v4861_v32 = vmul.f32 %v7373_v45, %v8853_v31  ;;  %v5160_v30 = vld [vmem:[#allocation16 + $0x70] sm:$0xff]  ;;  %v5161_v45 = vld [vmem:[#allocation16 + $0x78] sm:$0xff] }
 0xf50   : > { %7380 = vrsqrt.f32 %v4852_v17  ;;  %v4843_v34 = vmul.f32 0.0078125, %v4834_v46  ;;  %v4874_v50 = vmul.f32 %v4872_v55, %v4862_v41  ;;  %v6965_v17 = vpack.c.bf16 %v5161_v45, %v5160_v30  ;;  %v7437_v41 = vld [vmem:[%s8198_s26 + $0x10] sm:$0xff]  ;;  %v7438_v46 = vld [vmem:[%s8198_s26 + $0x18] sm:$0xff] }
 0xf51   : > { %7382 = vrsqrt.f32 %v4849_v26  ;;  %v4873_v53 = vmul.f32 %v4872_v55, %v4861_v32  ;;  %v7436_v26 = vld [vmem:[%s8198_s26 + $0x8] sm:$0xff]  ;;  %v7439_v32 = vld [vmem:[%s8198_s26 + $0x20] sm:$0xff] }
 0xf52   : > { %v7375_v54 = vpop.eup %7374  ;;  %v4851_v38 = vadd.f32 1e-05, %v4843_v34  ;;  %v8891_v24 = vadd.f32 %v4884_v43, %v4874_v50  ;;  %v7441_v34 = vld [vmem:[%s8198_s26 + $0x30] sm:$0xff]  ;;  %v7442_v50 = vld [vmem:[%s8198_s26 + $0x38] sm:$0xff] }
 0xf53   : > { %v8889_v18 = vadd.f32 %v4884_v43, %v4873_v53  ;;  %v4864_v7 = vmul.f32 %v7375_v54, %v8859_v11  ;;  %v4911_v53 = vsub.s32 5, %v8268_v28 }
 0xf54   : > { %7384 = vrsqrt.f32 %v4851_v38 }
 0xf55   : > { %6529 = vmatprep.mubr.f32.mxu1 %v8889_v18  ;;  %v4876_v2 = vmul.f32 %v4872_v55, %v4864_v7  ;;  %v4912_v54 = vrot.slane %v8840_v39, %v4911_v53 }
 0xf56   : > { %v7377_v60 = vpop.eup %7376  ;;  %6530 = vmatmul.mubr.f32.vlgmr.msra.gmra.mrb[56].mxu1 %v8891_v24 }
 0xf57   : > { %v7379_v31 = vpop.eup %7378  ;;  %v4866_v19 = vmul.f32 %v7377_v60, %v8863_v21  ;;  %v8901_v9 = vadd.f32 %v4884_v43, %v4876_v2 }
 0xf58   : > { %v4863_v20 = vmul.f32 %v7379_v31, %v8865_v14 }
 0xf59   : > { %v4878_v37 = vmul.f32 %v4872_v55, %v4866_v19 }
 0xf5a   : > { %v7381_v3 = vpop.eup %7380  ;;  %v4875_v13 = vmul.f32 %v4872_v55, %v4863_v20 }
 0xf5b   : > { %v7383_v22 = vpop.eup %7382  ;;  %v4868_v11 = vmul.f32 %v7381_v3, %v8871_v47  ;;  %v8909_v15 = vadd.f32 %v4884_v43, %v4878_v37 }
 0xf5c   : > { %v8898_v57 = vadd.f32 %v4884_v43, %v4875_v13  ;;  %v4865_v61 = vmul.f32 %v7383_v22, %v8873_v4 }
 0xf5d   : > { %v4880_v42 = vmul.f32 %v4872_v55, %v4868_v11 }
 0xf5e   : > { %v7385_v10 = vpop.eup %7384  ;;  %6532 = vmatprep.mubr.f32.mxu1 %v8898_v57  ;;  %v4877_v36 = vmul.f32 %v4872_v55, %v4865_v61 }
 0xf5f   : > { %6533 = vmatmul.mubr.f32.gmra.mrb[58].mxu1 %v8901_v9  ;;  %v4867_v21 = vmul.f32 %v7385_v10, %v8879_v59  ;;  %v8916_v47 = vadd.f32 %v4884_v43, %v4880_v42  ;;  %v5147_v59 = vld [vmem:[#allocation16 + $0x8] sm:$0xff] }
 0xf60   : > { %v8907_v14 = vadd.f32 %v4884_v43, %v4877_v36  ;;  %v6937_v27 = vpack.c.bf16 %v5147_v59, %v5146_v63 }
 0xf61   : > { %v4879_v62 = vmul.f32 %v4872_v55, %v4867_v21  ;;  %v6961_v55 = vpack.c.bf16 %v5159_v16, %v5158_v33 }
 0xf62   : > { %6535 = vmatprep.mubr.f32.mxu1 %v8907_v14  ;;  %6938 = vmatprep.subr.bf16.mxu0 %v6937_v27 }
 0xf63   : > { %6536 = vmatmul.mubr.f32.gmra.mrb[60].mxu1 %v8909_v15  ;;  %v8913_v4 = vadd.f32 %v4884_v43, %v4879_v62  ;;  %6940 = vmatpush3.bf16.msra.mxu0 %v6937_v27  ;;  %v7440_v43 = vld [vmem:[%s8198_s26 + $0x28] sm:$0xff]  ;;  %s9162_s26 = sld [smem:[#allocation33_spill]] }
 0xf64   : > { %6942 = vmatprep.subr.bf16.mxu0 %v6941_v44 }
 0xf65   : > { %6538 = vmatprep.mubr.f32.mxu1 %v8913_v4 }
 0xf67   : > { %6539 = vmatmul.mubr.f32.gmra.mrb[62].mxu1 %v8916_v47  ;;  %6944 = vmatpush3.bf16.msra.mxu0 %v6941_v44 }
 0xf68   : > { %6946 = vmatprep.subr.bf16.mxu0 %v6945_v8 }
 0xf69   : > { %s9056_s20 = scalar_lea.hbm %s9162_s26, %s5696_s23 }
 0xf6b   : > { %6948 = vmatpush3.bf16.msra.mxu0 %v6945_v8 }
 0xf6c   : > { %6950 = vmatprep.subr.bf16.mxu0 %v6949_v51 }
 0xf6f   : > { %6952 = vmatpush3.bf16.msra.mxu0 %v6949_v51 }
 0xf70   : > { %6954 = vmatprep.subr.bf16.mxu0 %v6953_v58 }
 0xf73   : > { %6956 = vmatpush3.bf16.msra.mxu0 %v6953_v58 }
 0xf74   : > { %6958 = vmatprep.subr.bf16.mxu0 %v6957_v40 }
 0xf77   : > { %6960 = vmatpush3.bf16.msra.mxu0 %v6957_v40 }
 0xf78   : > { %6962 = vmatprep.subr.bf16.mxu0 %v6961_v55 }
 0xf7b   : > { %6964 = vmatpush3.bf16.msra.mxu0 %v6961_v55 }
 0xf7c   : > { %6966 = vmatprep.subr.bf16.mxu0 %v6965_v17 }
 0xf7f   : > { %6968 = vmatpush3.bf16.msra.mxu0 %v6965_v17 }
 0xf82   : > { %6574 = vmatmul.mubr.f32.vlgmr.msra.gmra.mrb[48].mxu0 %v7436_v26 }
 0xf83   : > { %6576 = vmatprep.mubr.f32.mxu0 %v7437_v41 }
 0xf86   : > { %6577 = vmatmul.mubr.f32.gmra.mrb[50].mxu0 %v7438_v46 }
 0xf87   : > { %6579 = vmatprep.mubr.f32.mxu0 %v7439_v32 }
 0xf8a   : > { %6580 = vmatmul.mubr.f32.gmra.mrb[52].mxu0 %v7440_v43 }
 0xf8b   : > { %6582 = vmatprep.mubr.f32.mxu0 %v7441_v34 }
 0xf8e   : > { %6583 = vmatmul.mubr.f32.gmra.mrb[54].mxu0 %v7442_v50 }
0x1029   : > { %v6531_v38 = vpop.f32.mrb[56].mxu1 }
0x102a   : > { %v4985_v7 = vadd.f32 %v6531_v38, %v4912_v54  ;;  %v4979_v60 = vpop.f32.mrb[57].mxu1 }
0x102b   : > { %v4980_v31 = vadd.f32 %v4979_v60, %v4912_v54 }
0x102c   : > { %v5019_v20 = vmax.f32 %v4985_v7, 0.0 }
0x102d   : > { %v5018_v2 = vmax.f32 %v4980_v31, 0.0 }
0x102e   : > { %v5027_v19 = vadd.f32 %v5019_v20, %v8891_v24 }
0x102f   : > { %v5026_v3 = vadd.f32 %v5018_v2, %v8889_v18 }
0x1030   : > { %5036 = vadd.xlane.f32.xlu1 %v5027_v19 }
0x1031   : > { %5034 = vadd.xlane.f32.xlu0 %v5026_v3 }
0x1032   : > { %v6534_v13 = vpop.f32.mrb[58].mxu1 }
0x1033   : > { %v4995_v22 = vadd.f32 %v6534_v13, %v4912_v54  ;;  %v4989_v61 = vpop.f32.mrb[59].mxu1 }
0x1034   : > { %v4990_v37 = vadd.f32 %v4989_v61, %v4912_v54 }
0x1035   : > { %v5021_v11 = vmax.f32 %v4995_v22, 0.0 }
0x1036   : > { %v5020_v10 = vmax.f32 %v4990_v37, 0.0  ;;  %v6537_v36 = vpop.f32.mrb[60].mxu1 }
0x1037   : > { %v5029_v39 = vadd.f32 %v5021_v11, %v8901_v9  ;;  %v5005_v21 = vadd.f32 %v6537_v36, %v4912_v54  ;;  %v4999_v62 = vpop.f32.mrb[61].mxu1  ;;  %v8971_v11 = vld [vmem:[%s9159_s22 + $0x8] sm:$0xff] }
0x1038   : > { %v5028_v42 = vadd.f32 %v5020_v10, %v8898_v57  ;;  %v5000_v63 = vadd.f32 %v4999_v62, %v4912_v54  ;;  %v5165_v10 = vrot.slane %v8971_v11, %v810_v5 }
0x1039   : > { %v5023_v59 = vmax.f32 %v5005_v21, 0.0  ;;  %5040 = vadd.xlane.f32.xlu1 %v5029_v39 }
0x103a   : > { %v5022_v24 = vmax.f32 %v5000_v63, 0.0  ;;  %5038 = vadd.xlane.f32.xlu0 %v5028_v42  ;;  %v6540_v18 = vpop.f32.mrb[62].mxu1 }
0x103b   : > { %v5031_v27 = vadd.f32 %v5023_v59, %v8909_v15  ;;  %v5015_v49 = vadd.f32 %v6540_v18, %v4912_v54  ;;  %v5009_v1 = vpop.f32.mrb[63].mxu1 }
0x103c   : > { %v5030_v44 = vadd.f32 %v5022_v24, %v8907_v14  ;;  %v5010_v23 = vadd.f32 %v5009_v1, %v4912_v54 }
0x103d   : > { %v5025_v12 = vmax.f32 %v5015_v49, 0.0  ;;  %5044 = vadd.xlane.f32.xlu1 %v5031_v27 }
0x103e   : > { %v5024_v9 = vmax.f32 %v5010_v23, 0.0  ;;  %5042 = vadd.xlane.f32.xlu0 %v5030_v44 }
0x103f   : > { %v5033_v8 = vadd.f32 %v5025_v12, %v8916_v47 }
0x1040   : > { %v5032_v57 = vadd.f32 %v5024_v9, %v8913_v4 }
0x1041   : > { %5048 = vadd.xlane.f32.xlu1 %v5033_v8 }
0x1042   : > { %5046 = vadd.xlane.f32.xlu0 %v5032_v57 }
0x1055   : > { %v6575_v48 = vpop.f32.mrb[48].mxu0 }
0x1056   : > { %v5232_v56 = vpop.f32.mrb[49].mxu0  ;;  %v8976_v36 = vadd.f32 %v6575_v48, %v5165_v10 }
0x1058   : > { %v5678_v21 = vmul.f32 -1.442695, %v8976_v36 }
0x1059   : > { %v6578_v51 = vpop.f32.mrb[50].mxu0 }
0x105a   : > { %v5242_v0 = vpop.f32.mrb[51].mxu0  ;;  %7386 = vpow2.f32 %v5678_v21 }
0x105b   : > { %v8984_v63 = vadd.f32 %v5242_v0, %v5165_v10 }
0x105d   : > { %v6581_v15 = vpop.f32.mrb[52].mxu0  ;;  %v5679_v5 = vmul.f32 -1.442695, %v8984_v63 }
0x105e   : > { %v5252_v6 = vpop.f32.mrb[53].mxu0  ;;  %v8987_v24 = vadd.f32 %v6581_v15, %v5165_v10 }
0x105f   : > { %v8990_v18 = vadd.f32 %v5252_v6, %v5165_v10 }
0x1061   : > { %v6584_v40 = vpop.f32.mrb[54].mxu0  ;;  %v5681_v1 = vmul.f32 -1.442695, %v8990_v18 }
0x1062   : > { %v5262_v16 = vpop.f32.mrb[55].mxu0  ;;  %v8993_v49 = vadd.f32 %v6584_v40, %v5165_v10 }
0x1064   : > { %v5684_v23 = vmul.f32 -1.442695, %v8993_v49 }
0x10bd   : > { %v5037_v58 = vpop.xlane.xlu1 %5036 }
0x10be   : > { %v5051_v52 = vmul.f32 0.0078125, %v5037_v58  ;;  %v5035_v14 = vpop.xlane.xlu0 %5034 }
0x10bf   : > { %v5050_v25 = vmul.f32 0.0078125, %v5035_v14 }
0x10c0   : > { %v8936_v33 = vsub.f32 %v5027_v19, %v5051_v52 }
0x10c1   : > { %v8938_v55 = vsub.f32 %v5026_v3, %v5050_v25 }
0x10c2   : > { %v5067_v4 = vmul.f32 %v8936_v33, %v8936_v33 }
0x10c3   : > { %v5066_v47 = vmul.f32 %v8938_v55, %v8938_v55 }
0x10c4   : > { %5076 = vadd.xlane.f32.xlu1 %v5067_v4 }
0x10c5   : > { %5074 = vadd.xlane.f32.xlu0 %v5066_v47 }
0x10c6   : > { %v5041_v30 = vpop.xlane.xlu1 %5040 }
0x10c7   : > { %v5053_v45 = vmul.f32 0.0078125, %v5041_v30  ;;  %v5039_v17 = vpop.xlane.xlu0 %5038 }
0x10c8   : > { %v5052_v26 = vmul.f32 0.0078125, %v5039_v17 }
0x10c9   : > { %v8944_v41 = vsub.f32 %v5029_v39, %v5053_v45  ;;  %v8978_v39 = vadd.f32 %v5232_v56, %v5165_v10 }
0x10ca   : > { %v8946_v46 = vsub.f32 %v5028_v42, %v5052_v26  ;;  %v5045_v32 = vpop.xlane.xlu1 %5044  ;;  %v8982_v42 = vadd.f32 %v6578_v51, %v5165_v10 }
0x10cb   : > { %v5055_v43 = vmul.f32 0.0078125, %v5045_v32  ;;  %v5043_v34 = vpop.xlane.xlu0 %5042  ;;  %v5069_v50 = vmul.f32 %v8944_v41, %v8944_v41  ;;  %v5677_v62 = vmul.f32 -1.442695, %v8978_v39 }
0x10cc   : > { %v5054_v53 = vmul.f32 0.0078125, %v5043_v34  ;;  %v5068_v54 = vmul.f32 %v8946_v46, %v8946_v46  ;;  %v5680_v59 = vmul.f32 -1.442695, %v8982_v42 }
0x10cd   : > { %v8952_v38 = vsub.f32 %v5031_v27, %v5055_v43  ;;  %5080 = vadd.xlane.f32.xlu1 %v5069_v50  ;;  %7388 = vpow2.f32 %v5677_v62  ;;  %v5682_v27 = vmul.f32 -1.442695, %v8987_v24 }
0x10ce   : > { %v8954_v7 = vsub.f32 %v5030_v44, %v5054_v53  ;;  %v5049_v60 = vpop.xlane.xlu1 %5048  ;;  %5078 = vadd.xlane.f32.xlu0 %v5068_v54  ;;  %7390 = vpow2.f32 %v5680_v59  ;;  %v7387_v44 = vpop.eup %7386 }
0x10cf   : > { %v5057_v31 = vmul.f32 0.0078125, %v5049_v60  ;;  %v5047_v20 = vpop.xlane.xlu0 %5046  ;;  %v5071_v2 = vmul.f32 %v8952_v38, %v8952_v38  ;;  %7392 = vpow2.f32 %v5679_v5  ;;  %v5296_v9 = vadd.f32 1.0, %v7387_v44 }
0x10d0   : > { %v5056_v19 = vmul.f32 0.0078125, %v5047_v20  ;;  %v5070_v3 = vmul.f32 %v8954_v7, %v8954_v7  ;;  %7394 = vpow2.f32 %v5682_v27  ;;  %v9003_v60 = vrot.slane %v8971_v11, %v560_v29 }
0x10d1   : > { %v8960_v13 = vsub.f32 %v5033_v8, %v5057_v31  ;;  %5084 = vadd.xlane.f32.xlu1 %v5071_v2  ;;  %7396 = vpow2.f32 %v5681_v1  ;;  %v8997_v8 = vadd.f32 %v5262_v16, %v5165_v10 }
0x10d2   : > { %v8962_v22 = vsub.f32 %v5032_v57, %v5056_v19  ;;  %5082 = vadd.xlane.f32.xlu0 %v5070_v3  ;;  %7398 = vpow2.f32 %v5684_v23 }
0x10d3   : > { %v5073_v61 = vmul.f32 %v8960_v13, %v8960_v13  ;;  %7400 = vrcp.f32 %v5296_v9  ;;  %v5683_v6 = vmul.f32 -1.442695, %v8997_v8 }
0x10d4   : > { %v5072_v37 = vmul.f32 %v8962_v22, %v8962_v22 }
0x10d5   : > { %5088 = vadd.xlane.f32.xlu1 %v5073_v61  ;;  %v9008_v61 = vrot.slane %v8971_v11, %v685_v35 }
0x10d6   : > { %5086 = vadd.xlane.f32.xlu0 %v5072_v37 }
0x10d7   : > { %v7389_v12 = vpop.eup %7388 }
0x10d8   : > { %v5295_v0 = vadd.f32 1.0, %v7389_v12  ;;  %v7391_v52 = vpop.eup %7390 }
0x10d9   : > { %v7393_v14 = vpop.eup %7392  ;;  %v5298_v25 = vadd.f32 1.0, %v7391_v52 }
0x10da   : > { %v7395_v40 = vpop.eup %7394  ;;  %v5297_v16 = vadd.f32 1.0, %v7393_v14 }
0x10db   : > { %v7397_v47 = vpop.eup %7396  ;;  %v5300_v26 = vadd.f32 1.0, %v7395_v40 }
0x10dc   : > { %v7399_v43 = vpop.eup %7398  ;;  %v5299_v34 = vadd.f32 1.0, %v7397_v47 }
0x10dd   : > { %v7401_v54 = vpop.eup %7400 }
0x10de   : > { %v5320_v11 = vmul.f32 %v7401_v54, %v8976_v36 }
0x1151   : > { %v5077_v57 = vpop.xlane.xlu1 %5076 }
0x1152   : > { %v5091_v48 = vmul.f32 0.0078125, %v5077_v57  ;;  %v5075_v56 = vpop.xlane.xlu0 %5074 }
0x1153   : > { %v5090_v51 = vmul.f32 0.0078125, %v5075_v56 }
0x1154   : > { %v5099_v15 = vadd.f32 1e-05, %v5091_v48 }
0x1155   : > { %v5098_v58 = vadd.f32 1e-05, %v5090_v51 }
0x1156   : > { %7402 = vrsqrt.f32 %v5099_v15 }
0x1157   : > { %7404 = vrsqrt.f32 %v5098_v58 }
0x1158   : > { %7406 = vrcp.f32 %v5295_v0 }
0x1159   : > { %7408 = vpow2.f32 %v5683_v6 }
0x115a   : > { %v5081_v4 = vpop.xlane.xlu1 %5080  ;;  %7410 = vrcp.f32 %v5298_v25 }
0x115b   : > { %v5093_v30 = vmul.f32 0.0078125, %v5081_v4  ;;  %v5079_v45 = vpop.xlane.xlu0 %5078  ;;  %7412 = vrcp.f32 %v5297_v16 }
0x115c   : > { %v5092_v17 = vmul.f32 0.0078125, %v5079_v45 }
0x115d   : > { %v5101_v32 = vadd.f32 1e-05, %v5093_v30 }
0x115e   : > { %v5100_v50 = vadd.f32 1e-05, %v5092_v17  ;;  %v5085_v53 = vpop.xlane.xlu1 %5084 }
0x115f   : > { %7414 = vrsqrt.f32 %v5101_v32  ;;  %v5095_v31 = vmul.f32 0.0078125, %v5085_v53  ;;  %v5083_v20 = vpop.xlane.xlu0 %5082 }
0x1160   : > { %v7403_v2 = vpop.eup %7402  ;;  %7416 = vrsqrt.f32 %v5100_v50  ;;  %v5094_v19 = vmul.f32 0.0078125, %v5083_v20 }
0x1161   : > { %v7405_v3 = vpop.eup %7404  ;;  %7418 = vrcp.f32 %v5300_v26  ;;  %v5115_v37 = vmul.f32 %v7403_v2, %v8936_v33  ;;  %v5103_v10 = vadd.f32 1e-05, %v5095_v31  ;;  %v5302_v33 = vadd.f32 1.0, %v7399_v43 }
0x1162   : > { %v7407_v21 = vpop.eup %7406  ;;  %7420 = vrcp.f32 %v5299_v34  ;;  %v5114_v29 = vmul.f32 %v7405_v3, %v8938_v55  ;;  %v5102_v62 = vadd.f32 1e-05, %v5094_v19  ;;  %v5089_v59 = vpop.xlane.xlu1 %5088 }
0x1163   : > { %v7409_v5 = vpop.eup %7408  ;;  %v5127_v27 = vmul.f32 %v9003_v60, %v5115_v37  ;;  %7422 = vrsqrt.f32 %v5103_v10  ;;  %v5097_v1 = vmul.f32 0.0078125, %v5089_v59  ;;  %v5087_v44 = vpop.xlane.xlu0 %5086  ;;  %v5319_v55 = vmul.f32 %v7407_v21, %v8978_v39 }
0x1164   : > { %v5126_v28 = vmul.f32 %v9003_v60, %v5114_v29  ;;  %7424 = vrsqrt.f32 %v5102_v62  ;;  %v5096_v35 = vmul.f32 0.0078125, %v5087_v44  ;;  %v5301_v9 = vadd.f32 1.0, %v7409_v5  ;;  %v7411_v56 = vpop.eup %7410 }
0x1165   : > { %v5139_v23 = vadd.f32 %v9008_v61, %v5127_v27  ;;  %v5105_v12 = vadd.f32 1e-05, %v5097_v1  ;;  %v7413_v0 = vpop.eup %7412  ;;  %v5322_v47 = vmul.f32 %v7411_v56, %v8982_v42 }
0x1166   : > { %v5138_v57 = vadd.f32 %v9008_v61, %v5126_v28  ;;  %v5104_v48 = vadd.f32 1e-05, %v5096_v35 }
0x1167   : > { %v5328_v51 = vmul.f32 %v5320_v11, %v5139_v23  ;;  %7426 = vrsqrt.f32 %v5105_v12 }
0x1168   : > { %v5327_v15 = vmul.f32 %v5319_v55, %v5138_v57  ;;  %7428 = vrsqrt.f32 %v5104_v48 }
0x1169   : > { %v7415_v6 = vpop.eup %7414  ;;  %7430 = vrcp.f32 %v5302_v33  ;;  %5336 = vst [vmem:[%s9019_s9 + $0x8] sm:$0xff] %v5328_v51 }
0x116a   : > { %v7417_v36 = vpop.eup %7416  ;;  %7432 = vrcp.f32 %v5301_v9  ;;  %5335 = vst [vmem:[%s9019_s9] sm:$0xff] %v5327_v15  ;;  %v5117_v39 = vmul.f32 %v7415_v6, %v8944_v41  ;;  %v5321_v41 = vmul.f32 %v7413_v0, %v8984_v63 }
0x116b   : > { %v7419_v58 = vpop.eup %7418  ;;  %v5116_v52 = vmul.f32 %v7417_v36, %v8946_v46 }
0x116c   : > { %v7421_v14 = vpop.eup %7420  ;;  %v5129_v25 = vmul.f32 %v9003_v60, %v5117_v39  ;;  %v5324_v53 = vmul.f32 %v7419_v58, %v8987_v24 }
0x116d   : > { %v7423_v40 = vpop.eup %7422  ;;  %v5128_v16 = vmul.f32 %v9003_v60, %v5116_v52 }
0x116e   : > { %v7425_v4 = vpop.eup %7424  ;;  %v5141_v30 = vadd.f32 %v9008_v61, %v5129_v25  ;;  %v5119_v45 = vmul.f32 %v7423_v40, %v8952_v38 }
0x116f   : > { %v5140_v17 = vadd.f32 %v9008_v61, %v5128_v16  ;;  %v5118_v46 = vmul.f32 %v7425_v4, %v8954_v7  ;;  %v5323_v7 = vmul.f32 %v7421_v14, %v8990_v18 }
0x1170   : > { %v5330_v26 = vmul.f32 %v5322_v47, %v5141_v30  ;;  %v5131_v32 = vmul.f32 %v9003_v60, %v5119_v45 }
0x1171   : > { %v7427_v43 = vpop.eup %7426  ;;  %v5329_v34 = vmul.f32 %v5321_v41, %v5140_v17  ;;  %v5130_v50 = vmul.f32 %v9003_v60, %v5118_v46 }
0x1172   : > { %v7429_v42 = vpop.eup %7428  ;;  %5338 = vst [vmem:[%s9019_s9 + $0x18] sm:$0xff] %v5330_v26  ;;  %v5143_v38 = vadd.f32 %v9008_v61, %v5131_v32  ;;  %v5121_v63 = vmul.f32 %v7427_v43, %v8960_v13 }
0x1173   : > { %v7431_v54 = vpop.eup %7430  ;;  %5337 = vst [vmem:[%s9019_s9 + $0x10] sm:$0xff] %v5329_v34  ;;  %v5142_v31 = vadd.f32 %v9008_v61, %v5130_v50  ;;  %v5120_v20 = vmul.f32 %v7429_v42, %v8962_v22 }
0x1174   : > { %v7433_v2 = vpop.eup %7432  ;;  %v5332_v19 = vmul.f32 %v5324_v53, %v5143_v38  ;;  %v5133_v24 = vmul.f32 %v9003_v60, %v5121_v63  ;;  %v5326_v13 = vmul.f32 %v7431_v54, %v8993_v49 }
0x1175   : > { %v5331_v3 = vmul.f32 %v5323_v7, %v5142_v31  ;;  %v5132_v37 = vmul.f32 %v9003_v60, %v5120_v20  ;;  %v5325_v22 = vmul.f32 %v7433_v2, %v8997_v8 }
0x1176   : > { %5340 = vst [vmem:[%s9019_s9 + $0x28] sm:$0xff] %v5332_v19  ;;  %v5145_v18 = vadd.f32 %v9008_v61, %v5133_v24 }
0x1177   : > { %5339 = vst [vmem:[%s9019_s9 + $0x20] sm:$0xff] %v5331_v3  ;;  %v5144_v10 = vadd.f32 %v9008_v61, %v5132_v37 }
0x1178   : > { %v5334_v21 = vmul.f32 %v5326_v13, %v5145_v18 }
0x1179   : > { %v5333_v49 = vmul.f32 %v5325_v22, %v5144_v10 }
0x117a   : > { %5342 = vst [vmem:[%s9019_s9 + $0x38] sm:$0xff] %v5334_v21 }
0x117b   : > { %5341 = vst [vmem:[%s9019_s9 + $0x30] sm:$0xff] %v5333_v49 }
0x117c   : > { %7712 = shalt.err (!%p7709_p3)
}
0x117d   : > { %s7713_s2 = scalar_lea.hbm %s9056_s20, 1024  ;;  %s7717_s3 = scalar_lea.hbm %s9162_s26, 2048 }
0x117e   : > { %p7714_p12 = scmp.ne.s32.totalorder %s9056_s20, %s7713_s2  ;;  %p7718_p0 = scmp.lt.u32.totalorder %s9056_s20, %s9162_s26 }
0x117f   : > { %p7719_p7 = scmp.lt.u32.totalorder %s7717_s3, %s7713_s2  ;;  %p7721_p6 = scmp.lt.u32.totalorder %s7713_s2, %s9056_s20 }
0x1180   : > { %p7715_p1 = pnand %p7714_p12, %p9163_p10 }
0x1181   : > { %p7720_p2 = por %p7719_p7, %p7718_p0 }
0x1182   : > { %p7716_p13 = pneg %p7715_p1 }
0x1183   : > { %p7722_p5 = por %p7721_p6, %p7720_p2 }
0x1185   : > { %p7723_p9 = pnand %p7722_p5, %p7716_p13 }
0x1187   : > { %7726 = shalt.err (!%p7723_p9)
}
0x1188   : > { %s7802_s21 = smov 128   ;;  %s7803_s9 = smov 8  }
0x1189   : > { %7025 = dma.vmem_to_hbm [thread:$0]  (%p9163_p10), %s9058_s0, 1024, %s9056_s20, %s5344_s19, %s7802_s21, %s7802_s21, %s7803_s9  }
0x118a PF: > { %s5373_s23 = sand.u32 1, %s7773_s13   ;;  %p9164_p4 = scmp.ne.s32.totalorder %s9145_s17, 0 }
0x118b   : > { %p9165_p8 = scmp.ge.s32.totalorder %s7785_s16, 2  ;;  %s5374_s27 = scalar_lea.sflag [#allocation4], %s5373_s23 }
0x118d   : > { %p7057_p11 = pnand %p9165_p8, %p9164_p4 }
0x118f   : > { %7768 = dma.done.wait (!%p7057_p11), %s5374_s27, 1024  }
0x1190   : > { %7770 = vsyncadd (!%p7057_p11), %s5374_s27, 4294966272  ;;  %p29_p3 = scmp.ge.s32.totalorder %s8074_s11, 4   ;;  %s9166_s13 = smov %s7777_s14 }
0x1191   : > { %s9167_s14 = smov %s7781_s15  ;;  %s9168_s15 = smov %s8086_s10 }
0x1192   : > { %s9169_s16 = smov %s8074_s11  ;;  %31 = sbr.rel (!%p29_p3) target bundleno = 20 (0x14), region = 146 }
0x1199   :  { %5379 = vsyncpa [#allocation3], 1 }
0x119a   :  { %5381 = vsyncpa [#allocation3 + $0x1], 1 }
0x119b   :  { %5382 = vsyncpa [#allocation6], 1 }
0x119c   :  { %5384 = vsyncpa [#allocation6 + $0x1], 1 }
0x119d   :  { %5385 = vsyncpa [#allocation9], 1 }
0x119e   :  { %5386 = vsyncpa [#allocation12], 1 }
0x119f   :  { %5387 = vsyncpa [#allocation15], 1 }
0x11a0   :  { %5388 = vsyncpa [#allocation4], 1 }
0x11a1   :  { %5390 = vsyncpa [#allocation4 + $0x1], 1 }

</bundles_post_ra>
